<compile_context>
chip_gen: v7x
topology: tpu7x:2x2x1
jax: 0.10.0
libtpu: 0.0.40
codegen_flags: <defaults>
</compile_context>

<pallas_src>
import jax
import jax.numpy as jnp
from jax.experimental import pallas as pl
from jax.experimental.pallas import tpu as pltpu


def _mlp_kernel(x_ref, w1_ref, b1w2_ref, b2_ref, o_ref):
    tb = x_ref.shape[0]                    # batch tile (static, multiple of 1024)
    h_dim = w1_ref.shape[1]

    # Layer 1 on the MXU, f32 accumulate (accepts f32 or bf16 tiles).
    h = jnp.dot(x_ref[...], w1_ref[...],
                preferred_element_type=jnp.float32)            # (TB, H) f32
    bw = b1w2_ref[...]                                         # (2, H): row0=b1, row1=w2
    h = jnp.maximum(h + bw[0:1, :], 0.0)                       # bias + ReLU (VPU)

    # Layer 2: single output column -> keep it off the MXU.  Multiply by the w2
    # row (VPU), then reduce over the lane axis (XLU).  The leading-dim reshape
    # (TB, H) -> (TB//128, 128, H) is layout-preserving, so the reduction lands
    # directly in the lane-dense (TB//128, 128) slab: no (TB, 1) intermediate,
    # dense EUP sigmoid, and unmasked full-width stores.
    hw = (h * bw[1:2, :]).reshape(tb // 128, 128, h_dim)
    z = jnp.sum(hw, axis=-1) + b2_ref[0]                       # (TB//128, 128)
    o_ref[...] = jax.nn.sigmoid(z)                             # EUP on dense vregs


def _round_up(x, m):
    return ((x + m - 1) // m) * m


def _vmem_capacity_bytes():
    """Physical per-core VMEM, with a conservative (v7x-sized) fallback."""
    default = 64 * 1024 * 1024
    try:
        info = pltpu.get_tpu_info()
    except Exception:
        return default
    for name in ("vmem_capacity_bytes", "vmem_bytes", "vmem_size_bytes"):
        v = getattr(info, name, None)
        if isinstance(v, int) and v > 0:
            return v
    return default


def _pick_batch_tile(B, D, H, vmem_budget, max_tile=None):
    """Largest batch tile (multiple of 1024, <= 32K) fitting the VMEM budget.

    Accounts for 128-lane padding: an f32 row of D=32 occupies 512 B in VMEM,
    not 128 B.
    """
    d_pad = _round_up(D, 128)
    h_pad = _round_up(H, 128)
    # Resident weights: w1 (sublane/lane padded) + the (2, H) [b1; w2] slab.
    fixed = 4 * (_round_up(D, 8) * h_pad + 8 * h_pad)
    # Conservative per-row bytes: x double-buffer (2x, lane-padded) + up to four
    # (TB, H) f32 temporaries (h, h+bias/relu, h*w2, slack) + dense output slab
    # and its double buffer.
    per_row = 4 * (2 * d_pad + 4 * h_pad) + 64
    tb = (vmem_budget - fixed) // max(per_row, 1)
    cap = max_tile if max_tile is not None else 32768
    tb = min(int(tb), cap, _round_up(B, 1024))
    return max(1024, (tb // 1024) * 1024)


def neural_net_forward(x, w1, b1, w2, b2, *, max_tile=None):
    """x: (B, D); w1: (D, H); b1: (1, H); w2: (1, H) row; b2: (1,) -> (B, 1) f32.

    x / w1 may be f32 or bf16 (bf16 halves the HBM read traffic on the
    memory-bound large-batch path); all accumulation is f32.
    """
    B, D = x.shape
    H = w1.shape[1]

    vmem_cap = _vmem_capacity_bytes()
    # Per-generation budgets: ~36/56 MiB on v7x (64 MiB VMEM), ~96/120 MiB on
    # v5e/v6e (128 MiB VMEM).  Never request all of physical VMEM.
    vmem_budget = max(min(vmem_cap - 28 * 1024 * 1024, 96 * 1024 * 1024),
                      24 * 1024 * 1024)
    vmem_limit = max(min(vmem_cap - 8 * 1024 * 1024, 120 * 1024 * 1024),
                     32 * 1024 * 1024)

    TB = _pick_batch_tile(B, D, H, vmem_budget, max_tile)
    n_tiles = pl.cdiv(B, TB)
    B_pad = n_tiles * TB  # output rows (padded); x itself is NOT padded.

    # Fold b1 and the w2 row into one (2, H) VMEM operand; scalar b2 -> SMEM.
    b1w2 = jnp.concatenate(
        [b1.reshape(1, H).astype(jnp.float32), w2.reshape(1, H).astype(jnp.float32)],
        axis=0,
    )
    b2s = b2.reshape((1,)).astype(jnp.float32)

    out = pl.pallas_call(
        _mlp_kernel,
        # Lane-dense output slab: row-major flatten == batch order.
        out_shape=jax.ShapeDtypeStruct((B_pad // 128, 128), jnp.float32),
        grid_spec=pltpu.PrefetchScalarGridSpec(
            num_scalar_prefetch=0,
            grid=(n_tiles,),
            in_specs=[
                # x streamed per tile; final block may be ragged (OOB rows are
                # don't-care, per-row-independent compute, writes never OOB).
                pl.BlockSpec((TB, D), lambda i: (i, 0)),
                pl.BlockSpec((D, H), lambda i: (0, 0)),       # w1: resident
                pl.BlockSpec((2, H), lambda i: (0, 0)),       # [b1; w2]: resident
                pl.BlockSpec(memory_space=pltpu.MemorySpace.SMEM),  # b2 scalar
            ],
            out_specs=pl.BlockSpec((TB // 128, 128), lambda i: (i, 0)),
        ),
        compiler_params=pltpu.CompilerParams(
            dimension_semantics=("parallel",),   # consider pltpu.CORE_PARALLEL on v7x
            vmem_limit_bytes=int(vmem_limit),
        ),
    )(x, w1, b1w2, b2s)

    # Cheap metadata reshape/slice on a tiny (B_pad,) f32 array.
    return out.reshape(-1)[:B].reshape(B, 1)


def init_params(key, input_size, layer_length):
    """Deterministic PyTorch-style (Kaiming-uniform-ish) init.

    w1 stored transposed (D, H); w2 stored as the native PyTorch (1, H) row.
    """
    k1, k2, k3, k4 = jax.random.split(key, 4)
    bound1 = 1.0 / jnp.sqrt(input_size)
    bound2 = 1.0 / jnp.sqrt(layer_length)
    w1 = jax.random.uniform(k1, (input_size, layer_length),
                            minval=-bound1, maxval=bound1, dtype=jnp.float32)
    b1 = jax.random.uniform(k2, (1, layer_length),
                            minval=-bound1, maxval=bound1, dtype=jnp.float32)
    w2 = jax.random.uniform(k3, (1, layer_length),
                            minval=-bound2, maxval=bound2, dtype=jnp.float32)
    b2 = jax.random.uniform(k4, (1,),
                            minval=-bound2, maxval=bound2, dtype=jnp.float32)
    return w1, b1, w2, b2


def _reference(x, w1, b1, w2, b2):
    return jax.nn.sigmoid(jnp.maximum(x @ w1 + b1, 0.0) @ w2.T + b2)


if __name__ == "__main__":
    input_size = 32
    layer_length = 32

    key = jax.random.PRNGKey(0)
    kx, kp, kx2, kx3 = jax.random.split(key, 4)
    w1, b1, w2, b2 = init_params(kp, input_size, layer_length)

    # Case 1: small batch -> single ragged tile (reads clamp, extra rows dropped).
    batch = 8
    x = jax.random.normal(kx, (batch, input_size), dtype=jnp.float32)
    out = neural_net_forward(x, w1, b1, w2, b2)
    jax.block_until_ready(out)
    ref = _reference(x, w1, b1, w2, b2)
    assert out.shape == (batch, 1)
    assert jnp.allclose(out, ref, atol=1e-5, rtol=1e-5)

    # Case 2: batch not a multiple of 8 (sublane-unaligned row count).
    batch2 = 12
    x2 = jax.random.normal(kx2, (batch2, input_size), dtype=jnp.float32)
    out2 = neural_net_forward(x2, w1, b1, w2, b2)
    jax.block_until_ready(out2)
    ref2 = _reference(x2, w1, b1, w2, b2)
    assert out2.shape == (batch2, 1)
    assert jnp.allclose(out2, ref2, atol=1e-5, rtol=1e-5)

    # Case 3: multiple grid steps + ragged final tile (tile forced small to
    # exercise the multi-tile dense-output ordering at a modest batch size).
    batch3 = 2000
    x3 = jax.random.normal(kx3, (batch3, input_size), dtype=jnp.float32)
    out3 = neural_net_forward(x3, w1, b1, w2, b2, max_tile=1024)
    jax.block_until_ready(out3)
    ref3 = _reference(x3, w1, b1, w2, b2)
    assert out3.shape == (batch3, 1)
    assert jnp.allclose(out3, ref3, atol=1e-5, rtol=1e-5)

    print("KERNEL_OK")
</pallas_src>

<mosaic_0001>
module attributes {stable_mosaic.version = 11 : i64} {
  func.func @_mlp_kernel(%arg0: i32, %arg1: memref<1024x32xf32, #tpu.memory_space<vmem>>, %arg2: memref<32x32xf32, #tpu.memory_space<vmem>>, %arg3: memref<2x32xf32, #tpu.memory_space<vmem>>, %arg4: memref<1xf32, #tpu.memory_space<smem>>, %arg5: memref<8x128xf32, #tpu.memory_space<vmem>>) attributes {dimension_semantics = [#tpu.dimension_semantics<parallel>], iteration_bounds = array<i64: 1>, scalar_prefetch = 0 : i64, scratch_operands = 0 : i64, tpu.core_type = #tpu.core_type<tc>, window_params = [{transform_indices = @transform_0, window_bounds = array<i64: 1024, 32>}, {pipeline_mode = #tpu.pipeline_mode<synchronous>, transform_indices = @transform_1, window_bounds = array<i64: 32, 32>}, {pipeline_mode = #tpu.pipeline_mode<synchronous>, transform_indices = @transform_2, window_bounds = array<i64: 2, 32>}, {transform_indices = @transform_3, window_bounds = array<i64: 1>}, {transform_indices = @transform_4, window_bounds = array<i64: 8, 128>}]} {
    %c0 = arith.constant 0 : index
    %c0_0 = arith.constant 0 : index
    %0 = vector.load %arg1[%c0, %c0_0] : memref<1024x32xf32, #tpu.memory_space<vmem>>, vector<1024x32xf32>
    %c0_1 = arith.constant 0 : index
    %c0_2 = arith.constant 0 : index
    %1 = vector.load %arg2[%c0_1, %c0_2] : memref<32x32xf32, #tpu.memory_space<vmem>>, vector<32x32xf32>
    %cst = arith.constant dense<0.000000e+00> : vector<1024x32xf32>
    %2 = tpu.matmul %0, %1, %cst {dimension_numbers = #tpu.dot_dimension_numbers<[1], [0], [0], [1], [0, 0, 1, 1], [], []>} : vector<1024x32xf32>, vector<32x32xf32>, vector<1024x32xf32> -> vector<1024x32xf32>
    %c0_3 = arith.constant 0 : index
    %c0_4 = arith.constant 0 : index
    %3 = vector.load %arg3[%c0_3, %c0_4] : memref<2x32xf32, #tpu.memory_space<vmem>>, vector<2x32xf32>
    %4 = vector.extract_strided_slice %3 {offsets = [0, 0], sizes = [1, 32], strides = [1, 1]} : vector<2x32xf32> to vector<1x32xf32>
    %5 = vector.broadcast %4 : vector<1x32xf32> to vector<1024x32xf32>
    %6 = arith.addf %2, %5 : vector<1024x32xf32>
    %cst_5 = arith.constant 0.000000e+00 : f32
    %7 = vector.broadcast %cst_5 : f32 to vector<1024x32xf32>
    %8 = arith.maximumf %6, %7 : vector<1024x32xf32>
    %9 = vector.extract_strided_slice %3 {offsets = [1, 0], sizes = [1, 32], strides = [1, 1]} : vector<2x32xf32> to vector<1x32xf32>
    %10 = vector.broadcast %9 : vector<1x32xf32> to vector<1024x32xf32>
    %11 = arith.mulf %8, %10 : vector<1024x32xf32>
    %12 = vector.shape_cast %11 : vector<1024x32xf32> to vector<8x128x32xf32>
    %cst_6 = arith.constant dense<0.000000e+00> : vector<8x128xf32>
    %13 = vector.multi_reduction <add>, %12, %cst_6 [2] : vector<8x128x32xf32> to vector<8x128xf32>
    %c0_7 = arith.constant 0 : index
    %14 = memref.load %arg4[%c0_7] : memref<1xf32, #tpu.memory_space<smem>>
    %15 = vector.broadcast %14 : f32 to vector<8x128xf32>
    %16 = arith.addf %13, %15 : vector<8x128xf32>
    %17 = arith.negf %16 : vector<8x128xf32>
    %18 = math.exp %17 : vector<8x128xf32>
    %cst_8 = arith.constant 1.000000e+00 : f32
    %19 = vector.broadcast %cst_8 : f32 to vector<8x128xf32>
    %20 = arith.addf %19, %18 : vector<8x128xf32>
    %21 = arith.divf %19, %20 : vector<8x128xf32>
    %c0_9 = arith.constant 0 : index
    %c0_10 = arith.constant 0 : index
    %22 = vector.load %arg5[%c0_9, %c0_10] : memref<8x128xf32, #tpu.memory_space<vmem>>, vector<8x128xf32>
    tpu.vector_store %arg5[%c0_9, %c0_10], %21 {strides = array<i32>} : memref<8x128xf32, #tpu.memory_space<vmem>>, vector<8x128xf32>,
    return
  }
  func.func @transform_0(%arg0: i32) -> (i32, i32) {
    %c0_i32 = arith.constant 0 : i32
    %c0_i32_0 = arith.constant 0 : i32
    return %arg0, %c0_i32 : i32, i32
  }
  func.func @transform_1(%arg0: i32) -> (i32, i32) {
    %c0_i32 = arith.constant 0 : i32
    %c0_i32_0 = arith.constant 0 : i32
    %c0_i32_1 = arith.constant 0 : i32
    return %c0_i32, %c0_i32_0 : i32, i32
  }
  func.func @transform_2(%arg0: i32) -> (i32, i32) {
    %c0_i32 = arith.constant 0 : i32
    %c0_i32_0 = arith.constant 0 : i32
    %c0_i32_1 = arith.constant 0 : i32
    return %c0_i32, %c0_i32_0 : i32, i32
  }
  func.func @transform_3(%arg0: i32) -> i32 {
    %c0_i32 = arith.constant 0 : i32
    %c0_i32_0 = arith.constant 0 : i32
    return %c0_i32 : i32
  }
  func.func @transform_4(%arg0: i32) -> (i32, i32) {
    %c0_i32 = arith.constant 0 : i32
    %c0_i32_0 = arith.constant 0 : i32
    return %arg0, %c0_i32 : i32, i32
  }
}

</mosaic_0001>

<bundles_post_ra>
// kernel: tpu_custom_call.1
= control target key start
LH: loop header
LB: loop body
LE: loop exit
PB: predicated region body
PF: predicated region fallthrough
CT: control target
= control target key end

     0   :  { %10 = vsyncpa [#allocation4], 0  ;;  %s6709_s0 = inlined_call_operand.hbm [shape: f32[8,32], index: 0, kind: input, shape index: {}]   ;;  %s6710_s1 = inlined_call_operand.hbm [shape: f32[32,32], index: 1, kind: input, shape index: {}]   ;;  %s6711_s2 = inlined_call_operand.vmem [shape: f32[2,32], index: 2, kind: input, shape index: {}]   ;;  %s6712_s3 = inlined_call_operand.<no memory space> [shape: f32[1], index: 3, kind: input, shape index: {}]   ;;  %s6713_s4 = inlined_call_operand.hbm [shape: f32[8,128], index: 4, kind: output, shape index: {}]  }
   0x1   :  { %11 = vsyncpa [#allocation7], 0 }
   0x2   :  { %12 = vsyncpa [#allocation5], 0 }
   0x3   :  { %17 = vsyncadd [#allocation4], 16256  ;;  %s4829_s15 = smov [#allocation3]   ;;  %s4757_s19 = scalar_lea.hbm %s6709_s0, 128 }
   0x4   :  { %s18_s16 = sshll.u32 %s4829_s15, 4  ;;  %p4758_p0 = scmp.ne.s32.totalorder %s6709_s0, %s4757_s19  ;;  %s19_s16 = int_to_ptr.vmem [resolvable:$true] %s18_s16 }
   0x5   :  { %p4761_p1 = scmp.lt.u32.totalorder %s4757_s19, %s6709_s0 }
   0x7   :  { %p4763_p2 = pnand %p4761_p1, %p4758_p0 }
   0x9   :  { %4766 = shalt.err (!%p4763_p2)
}
   0xa   :  { %s4767_s24 = scalar_lea.vmem %s19_s16, 128  ;;  %s4771_s25 = scalar_lea.vmem %s19_s16, 16384 }
   0xb   :  { %p4768_p3 = scmp.ne.s32.totalorder %s19_s16, %s4767_s24  ;;  %p4772_p4 = scmp.lt.s32.totalorder %s19_s16, %s19_s16 }
   0xc   :  { %p4773_p5 = scmp.lt.s32.totalorder %s4771_s25, %s4767_s24 }
   0xe   :  { %p4774_p6 = por %p4773_p5, %p4772_p4 }
  0x10   :  { %p4775_p7 = pnand %p4774_p6, %p4768_p3 }
  0x12   :  { %4778 = shalt.err (!%p4775_p7)
}
  0x13   :  { %s4830_s26 = smov 128   ;;  %s4831_s27 = smov 8  }
  0x14   :  { %24 = dma.hbm_to_vmem [thread:$0]  %s6709_s0, 128, %s19_s16, [#allocation4], %s4830_s26, %s4830_s26, %s4831_s27  }
  0x15   :  { %s4832_s30 = smov [#allocation6]   ;;  %s4779_s8 = scalar_lea.hbm %s6710_s1, 512 }
  0x16   :  { %s30_s5 = sshll.u32 %s4832_s30, 4  ;;  %p4780_p8 = scmp.ne.s32.totalorder %s6710_s1, %s4779_s8  ;;  %s31_s5 = int_to_ptr.vmem [resolvable:$true] %s30_s5 }
  0x17   :  { %p4783_p9 = scmp.lt.u32.totalorder %s4779_s8, %s6710_s1 }
  0x19   :  { %p4785_p10 = pnand %p4783_p9, %p4780_p8 }
  0x1b   :  { %4788 = shalt.err (!%p4785_p10)
}
  0x1c   :  { %s4789_s13 = scalar_lea.vmem %s31_s5, 512  ;;  %p4794_p12 = scmp.lt.s32.totalorder %s31_s5, %s31_s5 }
  0x1d   :  { %p4790_p11 = scmp.ne.s32.totalorder %s31_s5, %s4789_s13  ;;  %p4795_p13 = scmp.lt.s32.totalorder %s4789_s13, %s4789_s13 }
  0x1f   :  { %p4796_p0 = por %p4795_p13, %p4794_p12 }
  0x21   :  { %p4797_p1 = pnand %p4796_p0, %p4790_p11 }
  0x23   :  { %4800 = shalt.err (!%p4797_p1)
}
  0x24   :  { %36 = dma.hbm_to_vmem [thread:$0]  %s6710_s1, 512, %s31_s5, [#allocation7], %s4830_s26, %s4830_s26, %s4831_s27  }
  0x25   :  { %4823 = dma.done.wait [#allocation4], 16384  }
  0x26   :  { %4824 = vsyncadd [#allocation4], 4294950912 }
  0x27   :  { %4825 = dma.done.wait [#allocation7], 512  }
  0x28   :  { %4826 = vsyncadd [#allocation7], 4294966784  ;;  %vm184_vm0 = vcmask 261120   ;;  %v175_v0 = vld [vmem:[#allocation6] sm:$0xff]  ;;  %v176_v1 = vld [vmem:[#allocation6 + $0x8] sm:$0xff]  ;;  %vm2955_vm1 = vcmask 130112  }
  0x29   :  { %v177_v2 = vld [vmem:[#allocation6 + $0x10] sm:$0xff]  ;;  %v4228_v3 = vpack.c.bf16 %v176_v1, %v175_v0  ;;  %v178_v4 = vld [vmem:[#allocation6 + $0x18] sm:$0xff]  ;;  %v47_v5 = vld [vmem:[#allocation3] sm:$0xff]  ;;  %vm2962_vm2 = vcmask 195712   ;;  %vm2969_vm3 = vcmask 261312   ;;  %vm2976_vm4 = vcmask 326912  }
  0x2a   :  { %v111_v6 = vld [vmem:[#allocation3 + $0x200] sm:$0xff]  ;;  %v4232_v7 = vpack.c.bf16 %v178_v4, %v177_v2  ;;  %4036 = vmatprep.mubr.msk.f32.mxu0 %vm184_vm0, %v47_v5  ;;  %v48_v8 = vld [vmem:[#allocation3 + $0x8] sm:$0xff]  ;;  %v49_v10 = vld [vmem:[#allocation3 + $0x10] sm:$0xff]  ;;  %vm2983_vm5 = vcmask 392512   ;;  %vm2990_vm6 = vcmask 458112   ;;  %vm2997_vm7 = vcmask 523712  }
  0x2b   :  { %4132 = vmatprep.mubr.msk.f32.mxu1 %vm184_vm0, %v111_v6  ;;  %4229 = vmatprep.subr.bf16.mxu0 %v4228_v3  ;;  %v112_v9 = vld [vmem:[#allocation3 + $0x208] sm:$0xff]  ;;  %v113_v11 = vld [vmem:[#allocation3 + $0x210] sm:$0xff]  ;;  %v50_v12 = vld [vmem:[#allocation3 + $0x18] sm:$0xff]  ;;  %vm3004_vm8 = vcmask 589312   ;;  %vm3011_vm9 = vcmask 654912   ;;  %vm3018_vm10 = vcmask 720512  }
  0x2c   :  { %4236 = vmatprep.subr.bf16.mxu1 %v4228_v3  ;;  %4231 = vmatpush3.bf16.msra.mxu0 %v4228_v3  ;;  %v114_v13 = vld [vmem:[#allocation3 + $0x218] sm:$0xff]  ;;  %v115_v14 = vld [vmem:[#allocation3 + $0x220] sm:$0xff]  ;;  %v116_v16 = vld [vmem:[#allocation3 + $0x228] sm:$0xff]  ;;  %vm3025_vm11 = vcmask 786112   ;;  %vm3032_vm12 = vcmask 851712   ;;  %vm3039_vm13 = vcmask 917312  }
  0x2d   :  { %4238 = vmatpush3.bf16.msra.mxu1 %v4228_v3  ;;  %4233 = vmatprep.subr.bf16.mxu0 %v4232_v7  ;;  %v51_v15 = vld [vmem:[#allocation3 + $0x20] sm:$0xff]  ;;  %v52_v17 = vld [vmem:[#allocation3 + $0x28] sm:$0xff]  ;;  %v117_v18 = vld [vmem:[#allocation3 + $0x230] sm:$0xff]  ;;  %vm3046_vm14 = vcmask 982912   ;;  %vm3053_vm15 = vcmask 1048512  }
  0x2e   :  { %4237 = vmatprep.subr.bf16.mxu1 %v4232_v7  ;;  %v53_v19 = vld [vmem:[#allocation3 + $0x30] sm:$0xff]  ;;  %v118_v20 = vld [vmem:[#allocation3 + $0x238] sm:$0xff]  ;;  %v55_v22 = vld [vmem:[#allocation3 + $0x40] sm:$0xff] }
  0x2f   :  { %v54_v21 = vld [vmem:[#allocation3 + $0x38] sm:$0xff]  ;;  %v119_v23 = vld [vmem:[#allocation3 + $0x240] sm:$0xff]  ;;  %v56_v24 = vld [vmem:[#allocation3 + $0x48] sm:$0xff] }
  0x30   :  { %4235 = vmatpush3.bf16.msra.mxu0 %v4232_v7  ;;  %v120_v25 = vld [vmem:[#allocation3 + $0x248] sm:$0xff]  ;;  %v57_v26 = vld [vmem:[#allocation3 + $0x50] sm:$0xff]  ;;  %v58_v28 = vld [vmem:[#allocation3 + $0x58] sm:$0xff] }
  0x31   :  { %4239 = vmatpush3.bf16.msra.mxu1 %v4232_v7  ;;  %v121_v27 = vld [vmem:[#allocation3 + $0x250] sm:$0xff]  ;;  %v122_v29 = vld [vmem:[#allocation3 + $0x258] sm:$0xff]  ;;  %v59_v30 = vld [vmem:[#allocation3 + $0x60] sm:$0xff] }
  0x32   :  { %v123_v31 = vld [vmem:[#allocation3 + $0x260] sm:$0xff]  ;;  %v60_v32 = vld [vmem:[#allocation3 + $0x68] sm:$0xff]  ;;  %v61_v34 = vld [vmem:[#allocation3 + $0x70] sm:$0xff] }
  0x33   :  { %4037 = vmatmul.mubr.msk.f32.vlgmr.msra.gmra.mrb[0].mxu0 %vm184_vm0, %v48_v8  ;;  %v124_v33 = vld [vmem:[#allocation3 + $0x268] sm:$0xff]  ;;  %v125_v35 = vld [vmem:[#allocation3 + $0x270] sm:$0xff]  ;;  %v62_v36 = vld [vmem:[#allocation3 + $0x78] sm:$0xff] }
  0x34   :  { %4133 = vmatmul.mubr.msk.f32.vlgmr.msra.gmra.mrb[0].mxu1 %vm184_vm0, %v112_v9  ;;  %4039 = vmatprep.mubr.msk.f32.mxu0 %vm184_vm0, %v49_v10  ;;  %v126_v37 = vld [vmem:[#allocation3 + $0x278] sm:$0xff]  ;;  %v63_v38 = vld [vmem:[#allocation3 + $0x80] sm:$0xff]  ;;  %v64_v40 = vld [vmem:[#allocation3 + $0x88] sm:$0xff] }
  0x35   :  { %4135 = vmatprep.mubr.msk.f32.mxu1 %vm184_vm0, %v113_v11  ;;  %v127_v39 = vld [vmem:[#allocation3 + $0x280] sm:$0xff]  ;;  %v128_v41 = vld [vmem:[#allocation3 + $0x288] sm:$0xff]  ;;  %v65_v42 = vld [vmem:[#allocation3 + $0x90] sm:$0xff] }
  0x36   :  { %v129_v43 = vld [vmem:[#allocation3 + $0x290] sm:$0xff]  ;;  %v66_v44 = vld [vmem:[#allocation3 + $0x98] sm:$0xff]  ;;  %v67_v46 = vld [vmem:[#allocation3 + $0xa0] sm:$0xff] }
  0x37   :  { %4040 = vmatmul.mubr.msk.f32.gmra.mrb[2].mxu0 %vm184_vm0, %v50_v12  ;;  %v130_v45 = vld [vmem:[#allocation3 + $0x298] sm:$0xff]  ;;  %v131_v47 = vld [vmem:[#allocation3 + $0x2a0] sm:$0xff]  ;;  %v68_v48 = vld [vmem:[#allocation3 + $0xa8] sm:$0xff] }
  0x38   :  { %4136 = vmatmul.mubr.msk.f32.gmra.mrb[2].mxu1 %vm184_vm0, %v114_v13  ;;  %4042 = vmatprep.mubr.msk.f32.mxu0 %vm184_vm0, %v51_v15  ;;  %v132_v49 = vld [vmem:[#allocation3 + $0x2a8] sm:$0xff]  ;;  %v69_v50 = vld [vmem:[#allocation3 + $0xb0] sm:$0xff]  ;;  %v70_v52 = vld [vmem:[#allocation3 + $0xb8] sm:$0xff] }
  0x39   :  { %4138 = vmatprep.mubr.msk.f32.mxu1 %vm184_vm0, %v115_v14  ;;  %v133_v51 = vld [vmem:[#allocation3 + $0x2b0] sm:$0xff]  ;;  %v134_v53 = vld [vmem:[#allocation3 + $0x2b8] sm:$0xff]  ;;  %v71_v54 = vld [vmem:[#allocation3 + $0xc0] sm:$0xff] }
  0x3a   :  { %v135_v55 = vld [vmem:[#allocation3 + $0x2c0] sm:$0xff]  ;;  %v72_v56 = vld [vmem:[#allocation3 + $0xc8] sm:$0xff]  ;;  %v73_v58 = vld [vmem:[#allocation3 + $0xd0] sm:$0xff] }
  0x3b   :  { %4043 = vmatmul.mubr.msk.f32.gmra.mrb[4].mxu0 %vm184_vm0, %v52_v17  ;;  %v136_v57 = vld [vmem:[#allocation3 + $0x2c8] sm:$0xff]  ;;  %v137_v59 = vld [vmem:[#allocation3 + $0x2d0] sm:$0xff]  ;;  %v74_v60 = vld [vmem:[#allocation3 + $0xd8] sm:$0xff] }
  0x3c   :  { %4139 = vmatmul.mubr.msk.f32.gmra.mrb[4].mxu1 %vm184_vm0, %v116_v16  ;;  %4045 = vmatprep.mubr.msk.f32.mxu0 %vm184_vm0, %v53_v19  ;;  %v138_v61 = vld [vmem:[#allocation3 + $0x2d8] sm:$0xff]  ;;  %v75_v62 = vld [vmem:[#allocation3 + $0xe0] sm:$0xff]  ;;  %v76_v0 = vld [vmem:[#allocation3 + $0xe8] sm:$0xff] }
  0x3d   :  { %4141 = vmatprep.mubr.msk.f32.mxu1 %vm184_vm0, %v117_v18  ;;  %v139_v63 = vld [vmem:[#allocation3 + $0x2e0] sm:$0xff]  ;;  %v140_v1 = vld [vmem:[#allocation3 + $0x2e8] sm:$0xff]  ;;  %v77_v2 = vld [vmem:[#allocation3 + $0xf0] sm:$0xff] }
  0x3e   :  { %v141_v3 = vld [vmem:[#allocation3 + $0x2f0] sm:$0xff]  ;;  %v78_v4 = vld [vmem:[#allocation3 + $0xf8] sm:$0xff]  ;;  %v79_v6 = vld [vmem:[#allocation3 + $0x100] sm:$0xff] }
  0x3f   :  { %4046 = vmatmul.mubr.msk.f32.gmra.mrb[6].mxu0 %vm184_vm0, %v54_v21  ;;  %v142_v5 = vld [vmem:[#allocation3 + $0x2f8] sm:$0xff]  ;;  %v143_v7 = vld [vmem:[#allocation3 + $0x300] sm:$0xff]  ;;  %v80_v8 = vld [vmem:[#allocation3 + $0x108] sm:$0xff] }
  0x40   :  { %4142 = vmatmul.mubr.msk.f32.gmra.mrb[6].mxu1 %vm184_vm0, %v118_v20  ;;  %4048 = vmatprep.mubr.msk.f32.mxu0 %vm184_vm0, %v55_v22  ;;  %v144_v9 = vld [vmem:[#allocation3 + $0x308] sm:$0xff]  ;;  %v81_v10 = vld [vmem:[#allocation3 + $0x110] sm:$0xff]  ;;  %v82_v12 = vld [vmem:[#allocation3 + $0x118] sm:$0xff] }
  0x41   :  { %4144 = vmatprep.mubr.msk.f32.mxu1 %vm184_vm0, %v119_v23  ;;  %v145_v11 = vld [vmem:[#allocation3 + $0x310] sm:$0xff]  ;;  %v146_v13 = vld [vmem:[#allocation3 + $0x318] sm:$0xff]  ;;  %v83_v14 = vld [vmem:[#allocation3 + $0x120] sm:$0xff] }
  0x42   :  { %v147_v15 = vld [vmem:[#allocation3 + $0x320] sm:$0xff]  ;;  %v84_v16 = vld [vmem:[#allocation3 + $0x128] sm:$0xff]  ;;  %v85_v18 = vld [vmem:[#allocation3 + $0x130] sm:$0xff] }
  0x43   :  { %4049 = vmatmul.mubr.msk.f32.gmra.mrb[8].mxu0 %vm184_vm0, %v56_v24  ;;  %v148_v17 = vld [vmem:[#allocation3 + $0x328] sm:$0xff]  ;;  %v149_v19 = vld [vmem:[#allocation3 + $0x330] sm:$0xff]  ;;  %v86_v20 = vld [vmem:[#allocation3 + $0x138] sm:$0xff] }
  0x44   :  { %4145 = vmatmul.mubr.msk.f32.gmra.mrb[8].mxu1 %vm184_vm0, %v120_v25  ;;  %4051 = vmatprep.mubr.msk.f32.mxu0 %vm184_vm0, %v57_v26  ;;  %v150_v21 = vld [vmem:[#allocation3 + $0x338] sm:$0xff]  ;;  %v87_v22 = vld [vmem:[#allocation3 + $0x140] sm:$0xff]  ;;  %v88_v24 = vld [vmem:[#allocation3 + $0x148] sm:$0xff] }
  0x45   :  { %4147 = vmatprep.mubr.msk.f32.mxu1 %vm184_vm0, %v121_v27  ;;  %v151_v23 = vld [vmem:[#allocation3 + $0x340] sm:$0xff]  ;;  %v152_v25 = vld [vmem:[#allocation3 + $0x348] sm:$0xff]  ;;  %v89_v26 = vld [vmem:[#allocation3 + $0x150] sm:$0xff] }
  0x46   :  { %v153_v27 = vld [vmem:[#allocation3 + $0x350] sm:$0xff] }
  0x47   :  { %4052 = vmatmul.mubr.msk.f32.gmra.mrb[10].mxu0 %vm184_vm0, %v58_v28  ;;  %v90_v28 = vld [vmem:[#allocation3 + $0x158] sm:$0xff] }
  0x48   :  { %4148 = vmatmul.mubr.msk.f32.gmra.mrb[10].mxu1 %vm184_vm0, %v122_v29  ;;  %4054 = vmatprep.mubr.msk.f32.mxu0 %vm184_vm0, %v59_v30  ;;  %v154_v29 = vld [vmem:[#allocation3 + $0x358] sm:$0xff]  ;;  %v91_v30 = vld [vmem:[#allocation3 + $0x160] sm:$0xff] }
  0x49   :  { %4150 = vmatprep.mubr.msk.f32.mxu1 %vm184_vm0, %v123_v31  ;;  %v155_v31 = vld [vmem:[#allocation3 + $0x360] sm:$0xff] }
  0x4b   :  { %4055 = vmatmul.mubr.msk.f32.gmra.mrb[12].mxu0 %vm184_vm0, %v60_v32  ;;  %v92_v32 = vld [vmem:[#allocation3 + $0x168] sm:$0xff] }
  0x4c   :  { %4151 = vmatmul.mubr.msk.f32.gmra.mrb[12].mxu1 %vm184_vm0, %v124_v33  ;;  %4057 = vmatprep.mubr.msk.f32.mxu0 %vm184_vm0, %v61_v34  ;;  %v156_v33 = vld [vmem:[#allocation3 + $0x368] sm:$0xff]  ;;  %v93_v34 = vld [vmem:[#allocation3 + $0x170] sm:$0xff] }
  0x4d   :  { %4153 = vmatprep.mubr.msk.f32.mxu1 %vm184_vm0, %v125_v35  ;;  %v157_v35 = vld [vmem:[#allocation3 + $0x370] sm:$0xff] }
  0x4f   :  { %4058 = vmatmul.mubr.msk.f32.gmra.mrb[14].mxu0 %vm184_vm0, %v62_v36  ;;  %v94_v36 = vld [vmem:[#allocation3 + $0x178] sm:$0xff] }
  0x50   :  { %4154 = vmatmul.mubr.msk.f32.gmra.mrb[14].mxu1 %vm184_vm0, %v126_v37  ;;  %4060 = vmatprep.mubr.msk.f32.mxu0 %vm184_vm0, %v63_v38  ;;  %v158_v37 = vld [vmem:[#allocation3 + $0x378] sm:$0xff]  ;;  %v95_v38 = vld [vmem:[#allocation3 + $0x180] sm:$0xff] }
  0x51   :  { %4156 = vmatprep.mubr.msk.f32.mxu1 %vm184_vm0, %v127_v39  ;;  %v159_v39 = vld [vmem:[#allocation3 + $0x380] sm:$0xff] }
  0x53   :  { %4061 = vmatmul.mubr.msk.f32.gmra.mrb[16].mxu0 %vm184_vm0, %v64_v40  ;;  %v96_v40 = vld [vmem:[#allocation3 + $0x188] sm:$0xff] }
  0x54   :  { %4157 = vmatmul.mubr.msk.f32.gmra.mrb[16].mxu1 %vm184_vm0, %v128_v41  ;;  %4063 = vmatprep.mubr.msk.f32.mxu0 %vm184_vm0, %v65_v42  ;;  %v160_v41 = vld [vmem:[#allocation3 + $0x388] sm:$0xff]  ;;  %v97_v42 = vld [vmem:[#allocation3 + $0x190] sm:$0xff] }
  0x55   :  { %4159 = vmatprep.mubr.msk.f32.mxu1 %vm184_vm0, %v129_v43  ;;  %v161_v43 = vld [vmem:[#allocation3 + $0x390] sm:$0xff] }
  0x57   :  { %4064 = vmatmul.mubr.msk.f32.gmra.mrb[18].mxu0 %vm184_vm0, %v66_v44  ;;  %v98_v44 = vld [vmem:[#allocation3 + $0x198] sm:$0xff] }
  0x58   :  { %4160 = vmatmul.mubr.msk.f32.gmra.mrb[18].mxu1 %vm184_vm0, %v130_v45  ;;  %4066 = vmatprep.mubr.msk.f32.mxu0 %vm184_vm0, %v67_v46  ;;  %v162_v45 = vld [vmem:[#allocation3 + $0x398] sm:$0xff]  ;;  %v99_v46 = vld [vmem:[#allocation3 + $0x1a0] sm:$0xff] }
  0x59   :  { %4162 = vmatprep.mubr.msk.f32.mxu1 %vm184_vm0, %v131_v47  ;;  %v163_v47 = vld [vmem:[#allocation3 + $0x3a0] sm:$0xff] }
  0x5b   :  { %4067 = vmatmul.mubr.msk.f32.gmra.mrb[20].mxu0 %vm184_vm0, %v68_v48  ;;  %v100_v48 = vld [vmem:[#allocation3 + $0x1a8] sm:$0xff] }
  0x5c   :  { %4163 = vmatmul.mubr.msk.f32.gmra.mrb[20].mxu1 %vm184_vm0, %v132_v49  ;;  %4069 = vmatprep.mubr.msk.f32.mxu0 %vm184_vm0, %v69_v50  ;;  %v164_v49 = vld [vmem:[#allocation3 + $0x3a8] sm:$0xff]  ;;  %v101_v50 = vld [vmem:[#allocation3 + $0x1b0] sm:$0xff] }
  0x5d   :  { %4165 = vmatprep.mubr.msk.f32.mxu1 %vm184_vm0, %v133_v51  ;;  %v165_v51 = vld [vmem:[#allocation3 + $0x3b0] sm:$0xff] }
  0x5f   :  { %4070 = vmatmul.mubr.msk.f32.gmra.mrb[22].mxu0 %vm184_vm0, %v70_v52  ;;  %v102_v52 = vld [vmem:[#allocation3 + $0x1b8] sm:$0xff] }
  0x60   :  { %4166 = vmatmul.mubr.msk.f32.gmra.mrb[22].mxu1 %vm184_vm0, %v134_v53  ;;  %4072 = vmatprep.mubr.msk.f32.mxu0 %vm184_vm0, %v71_v54  ;;  %v166_v53 = vld [vmem:[#allocation3 + $0x3b8] sm:$0xff]  ;;  %v103_v54 = vld [vmem:[#allocation3 + $0x1c0] sm:$0xff] }
  0x61   :  { %4168 = vmatprep.mubr.msk.f32.mxu1 %vm184_vm0, %v135_v55  ;;  %v167_v55 = vld [vmem:[#allocation3 + $0x3c0] sm:$0xff] }
  0x63   :  { %4073 = vmatmul.mubr.msk.f32.gmra.mrb[24].mxu0 %vm184_vm0, %v72_v56  ;;  %v104_v56 = vld [vmem:[#allocation3 + $0x1c8] sm:$0xff] }
  0x64   :  { %4169 = vmatmul.mubr.msk.f32.gmra.mrb[24].mxu1 %vm184_vm0, %v136_v57  ;;  %4075 = vmatprep.mubr.msk.f32.mxu0 %vm184_vm0, %v73_v58  ;;  %v168_v57 = vld [vmem:[#allocation3 + $0x3c8] sm:$0xff]  ;;  %v105_v58 = vld [vmem:[#allocation3 + $0x1d0] sm:$0xff] }
  0x65   :  { %4171 = vmatprep.mubr.msk.f32.mxu1 %vm184_vm0, %v137_v59  ;;  %v169_v59 = vld [vmem:[#allocation3 + $0x3d0] sm:$0xff] }
  0x67   :  { %4076 = vmatmul.mubr.msk.f32.gmra.mrb[26].mxu0 %vm184_vm0, %v74_v60  ;;  %v106_v60 = vld [vmem:[#allocation3 + $0x1d8] sm:$0xff] }
  0x68   :  { %4172 = vmatmul.mubr.msk.f32.gmra.mrb[26].mxu1 %vm184_vm0, %v138_v61  ;;  %4078 = vmatprep.mubr.msk.f32.mxu0 %vm184_vm0, %v75_v62  ;;  %v170_v61 = vld [vmem:[#allocation3 + $0x3d8] sm:$0xff]  ;;  %v171_v62 = vld [vmem:[#allocation3 + $0x3e0] sm:$0xff] }
  0x69   :  { %4174 = vmatprep.mubr.msk.f32.mxu1 %vm184_vm0, %v139_v63  ;;  %v107_v63 = vld [vmem:[#allocation3 + $0x1e0] sm:$0xff] }
  0x6b   :  { %4079 = vmatmul.mubr.msk.f32.gmra.mrb[28].mxu0 %vm184_vm0, %v76_v0  ;;  %v172_v0 = vld [vmem:[#allocation3 + $0x3e8] sm:$0xff] }
  0x6c   :  { %4175 = vmatmul.mubr.msk.f32.gmra.mrb[28].mxu1 %vm184_vm0, %v140_v1  ;;  %4081 = vmatprep.mubr.msk.f32.mxu0 %vm184_vm0, %v77_v2  ;;  %v108_v1 = vld [vmem:[#allocation3 + $0x1e8] sm:$0xff]  ;;  %v109_v2 = vld [vmem:[#allocation3 + $0x1f0] sm:$0xff] }
  0x6d   :  { %4177 = vmatprep.mubr.msk.f32.mxu1 %vm184_vm0, %v141_v3  ;;  %v173_v3 = vld [vmem:[#allocation3 + $0x3f0] sm:$0xff] }
  0x6f   :  { %4082 = vmatmul.mubr.msk.f32.gmra.mrb[30].mxu0 %vm184_vm0, %v78_v4  ;;  %v110_v4 = vld [vmem:[#allocation3 + $0x1f8] sm:$0xff] }
  0x70   :  { %4178 = vmatmul.mubr.msk.f32.gmra.mrb[30].mxu1 %vm184_vm0, %v142_v5  ;;  %4084 = vmatprep.mubr.msk.f32.mxu0 %vm184_vm0, %v79_v6  ;;  %v174_v5 = vld [vmem:[#allocation3 + $0x3f8] sm:$0xff]  ;;  %v6714_v6 = vlaneseq }
  0x71   :  { %4180 = vmatprep.mubr.msk.f32.mxu1 %vm184_vm0, %v143_v7 }
  0x72   :  { %v5012_v7 = vshrl.u32 %v6714_v6, 7 }
  0x73   :  { %4085 = vmatmul.mubr.msk.f32.gmra.mrb[32].mxu0 %vm184_vm0, %v80_v8 }
  0x74   :  { %4181 = vmatmul.mubr.msk.f32.gmra.mrb[32].mxu1 %vm184_vm0, %v144_v9  ;;  %4087 = vmatprep.mubr.msk.f32.mxu0 %vm184_vm0, %v81_v10  ;;  %v182_v8 = vsub.s32 0, %v5012_v7  ;;  %v179_v9 = vld [vmem:[%s6711_s2] sm:$0x3] }
  0x75   :  { %4183 = vmatprep.mubr.msk.f32.mxu1 %vm184_vm0, %v145_v11  ;;  %v1404_v11 = vsub.s32 1, %v5012_v7 }
  0x76   :  { %v5018_v10 = vrot.slane %v179_v9, %v182_v8 }
  0x77   :  { %4088 = vmatmul.mubr.msk.f32.gmra.mrb[34].mxu0 %vm184_vm0, %v82_v12 }
  0x78   :  { %4184 = vmatmul.mubr.msk.f32.gmra.mrb[34].mxu1 %vm184_vm0, %v146_v13  ;;  %4090 = vmatprep.mubr.msk.f32.mxu0 %vm184_vm0, %v83_v14 }
  0x79   :  { %4186 = vmatprep.mubr.msk.f32.mxu1 %vm184_vm0, %v147_v15 }
  0x7b   :  { %4091 = vmatmul.mubr.msk.f32.gmra.mrb[36].mxu0 %vm184_vm0, %v84_v16 }
  0x7c   :  { %4187 = vmatmul.mubr.msk.f32.gmra.mrb[36].mxu1 %vm184_vm0, %v148_v17  ;;  %4093 = vmatprep.mubr.msk.f32.mxu0 %vm184_vm0, %v85_v18  ;;  %v5023_v18 = vrot.slane %v179_v9, %v1404_v11 }
  0x7d   :  { %4189 = vmatprep.mubr.msk.f32.mxu1 %vm184_vm0, %v149_v19 }
  0x7f   :  { %4094 = vmatmul.mubr.msk.f32.gmra.mrb[38].mxu0 %vm184_vm0, %v86_v20 }
  0x80   :  { %4190 = vmatmul.mubr.msk.f32.gmra.mrb[38].mxu1 %vm184_vm0, %v150_v21  ;;  %4096 = vmatprep.mubr.msk.f32.mxu0 %vm184_vm0, %v87_v22 }
  0x81   :  { %4192 = vmatprep.mubr.msk.f32.mxu1 %vm184_vm0, %v151_v23 }
  0x83   :  { %4097 = vmatmul.mubr.msk.f32.gmra.mrb[40].mxu0 %vm184_vm0, %v88_v24 }
  0x84   :  { %4193 = vmatmul.mubr.msk.f32.gmra.mrb[40].mxu1 %vm184_vm0, %v152_v25  ;;  %4099 = vmatprep.mubr.msk.f32.mxu0 %vm184_vm0, %v89_v26 }
  0x85   :  { %4195 = vmatprep.mubr.msk.f32.mxu1 %vm184_vm0, %v153_v27 }
  0x87   :  { %4100 = vmatmul.mubr.msk.f32.gmra.mrb[42].mxu0 %vm184_vm0, %v90_v28 }
  0x88   :  { %4196 = vmatmul.mubr.msk.f32.gmra.mrb[42].mxu1 %vm184_vm0, %v154_v29  ;;  %4102 = vmatprep.mubr.msk.f32.mxu0 %vm184_vm0, %v91_v30 }
  0x89   :  { %4198 = vmatprep.mubr.msk.f32.mxu1 %vm184_vm0, %v155_v31 }
  0x8b   :  { %4103 = vmatmul.mubr.msk.f32.gmra.mrb[44].mxu0 %vm184_vm0, %v92_v32 }
  0x8c   :  { %4199 = vmatmul.mubr.msk.f32.gmra.mrb[44].mxu1 %vm184_vm0, %v156_v33  ;;  %4105 = vmatprep.mubr.msk.f32.mxu0 %vm184_vm0, %v93_v34 }
  0x8d   :  { %4201 = vmatprep.mubr.msk.f32.mxu1 %vm184_vm0, %v157_v35 }
  0x8f   :  { %4106 = vmatmul.mubr.msk.f32.gmra.mrb[46].mxu0 %vm184_vm0, %v94_v36 }
  0x90   :  { %4202 = vmatmul.mubr.msk.f32.gmra.mrb[46].mxu1 %vm184_vm0, %v158_v37  ;;  %4108 = vmatprep.mubr.msk.f32.mxu0 %vm184_vm0, %v95_v38 }
  0x91   :  { %4204 = vmatprep.mubr.msk.f32.mxu1 %vm184_vm0, %v159_v39 }
  0x93   :  { %4109 = vmatmul.mubr.msk.f32.gmra.mrb[48].mxu0 %vm184_vm0, %v96_v40 }
  0x94   :  { %4205 = vmatmul.mubr.msk.f32.gmra.mrb[48].mxu1 %vm184_vm0, %v160_v41  ;;  %4111 = vmatprep.mubr.msk.f32.mxu0 %vm184_vm0, %v97_v42 }
  0x95   :  { %4207 = vmatprep.mubr.msk.f32.mxu1 %vm184_vm0, %v161_v43 }
  0x97   :  { %4112 = vmatmul.mubr.msk.f32.gmra.mrb[50].mxu0 %vm184_vm0, %v98_v44 }
  0x98   :  { %4208 = vmatmul.mubr.msk.f32.gmra.mrb[50].mxu1 %vm184_vm0, %v162_v45  ;;  %4114 = vmatprep.mubr.msk.f32.mxu0 %vm184_vm0, %v99_v46 }
  0x99   :  { %4210 = vmatprep.mubr.msk.f32.mxu1 %vm184_vm0, %v163_v47 }
  0x9b   :  { %4115 = vmatmul.mubr.msk.f32.gmra.mrb[52].mxu0 %vm184_vm0, %v100_v48 }
  0x9c   :  { %4211 = vmatmul.mubr.msk.f32.gmra.mrb[52].mxu1 %vm184_vm0, %v164_v49  ;;  %4117 = vmatprep.mubr.msk.f32.mxu0 %vm184_vm0, %v101_v50 }
  0x9d   :  { %4213 = vmatprep.mubr.msk.f32.mxu1 %vm184_vm0, %v165_v51 }
  0x9f   :  { %4118 = vmatmul.mubr.msk.f32.gmra.mrb[54].mxu0 %vm184_vm0, %v102_v52 }
  0xa0   :  { %4214 = vmatmul.mubr.msk.f32.gmra.mrb[54].mxu1 %vm184_vm0, %v166_v53  ;;  %4120 = vmatprep.mubr.msk.f32.mxu0 %vm184_vm0, %v103_v54 }
  0xa1   :  { %4216 = vmatprep.mubr.msk.f32.mxu1 %vm184_vm0, %v167_v55 }
  0xa3   :  { %4121 = vmatmul.mubr.msk.f32.gmra.mrb[56].mxu0 %vm184_vm0, %v104_v56 }
  0xa4   :  { %4217 = vmatmul.mubr.msk.f32.gmra.mrb[56].mxu1 %vm184_vm0, %v168_v57  ;;  %4123 = vmatprep.mubr.msk.f32.mxu0 %vm184_vm0, %v105_v58 }
  0xa5   :  { %4219 = vmatprep.mubr.msk.f32.mxu1 %vm184_vm0, %v169_v59 }
  0xa7   :  { %4124 = vmatmul.mubr.msk.f32.gmra.mrb[58].mxu0 %vm184_vm0, %v106_v60 }
  0xa8   :  { %4220 = vmatmul.mubr.msk.f32.gmra.mrb[58].mxu1 %vm184_vm0, %v170_v61  ;;  %4126 = vmatprep.mubr.msk.f32.mxu0 %vm184_vm0, %v107_v63 }
  0xa9   :  { %4222 = vmatprep.mubr.msk.f32.mxu1 %vm184_vm0, %v171_v62 }
  0xab   :  { %4127 = vmatmul.mubr.msk.f32.gmra.mrb[60].mxu0 %vm184_vm0, %v108_v1 }
  0xac   :  { %4223 = vmatmul.mubr.msk.f32.gmra.mrb[60].mxu1 %vm184_vm0, %v172_v0  ;;  %4129 = vmatprep.mubr.msk.f32.mxu0 %vm184_vm0, %v109_v2 }
  0xad   :  { %4225 = vmatprep.mubr.msk.f32.mxu1 %vm184_vm0, %v173_v3 }
  0xaf   :  { %4130 = vmatmul.mubr.msk.f32.gmra.mrb[62].mxu0 %vm184_vm0, %v110_v4 }
  0xb0   :  { %4226 = vmatmul.mubr.msk.f32.gmra.mrb[62].mxu1 %vm184_vm0, %v174_v5 }
 0x106   :  { %v4038_v12 = vpop.f32.mrb[0].mxu0 }
 0x107   :  { %v4134_v13 = vpop.f32.mrb[0].mxu1  ;;  %v641_v14 = vadd.f32 %v4038_v12, %v5018_v10  ;;  %v635_v16 = vpop.f32.mrb[1].mxu0 }
 0x108   :  { %v961_v15 = vadd.f32 %v4134_v13, %v5018_v10  ;;  %v955_v17 = vpop.f32.mrb[1].mxu1  ;;  %v636_v19 = vadd.f32 %v635_v16, %v5018_v10 }
 0x109   :  { %v956_v20 = vadd.f32 %v955_v17, %v5018_v10  ;;  %v1275_v21 = vmax.f32 %v641_v14, 0.0 }
 0x10a   :  { %v1339_v22 = vmax.f32 %v961_v15, 0.0  ;;  %v1274_v23 = vmax.f32 %v636_v19, 0.0  ;;  %v4041_v24 = vpop.f32.mrb[2].mxu0 }
 0x10b   :  { %v4137_v25 = vpop.f32.mrb[2].mxu1  ;;  %v651_v26 = vadd.f32 %v4041_v24, %v5018_v10  ;;  %v645_v27 = vpop.f32.mrb[3].mxu0  ;;  %v1407_v30 = vmul.f32 %v5023_v18, %v1275_v21  ;;  %v1338_v32 = vmax.f32 %v956_v20, 0.0 }
 0x10c   :  { %v1471_v28 = vmul.f32 %v5023_v18, %v1339_v22  ;;  %v971_v29 = vadd.f32 %v4137_v25, %v5018_v10  ;;  %v965_v31 = vpop.f32.mrb[3].mxu1  ;;  %v646_v33 = vadd.f32 %v645_v27, %v5018_v10  ;;  %v1406_v35 = vmul.f32 %v5023_v18, %v1274_v23 }
 0x10d   :  { %v966_v34 = vadd.f32 %v965_v31, %v5018_v10  ;;  %v1277_v36 = vmax.f32 %v651_v26, 0.0  ;;  %v1537_v39 = vsel %vm184_vm0, %v1407_v30, 0.0  ;;  %v1470_v48 = vmul.f32 %v5023_v18, %v1338_v32 }
 0x10e   :  { %v1729_v37 = vsel %vm184_vm0, %v1471_v28, 0.0  ;;  %v1341_v38 = vmax.f32 %v971_v29, 0.0  ;;  %1538 = vadd.xlane.f32.xlu0 %v1537_v39  ;;  %v4044_v41 = vpop.f32.mrb[4].mxu0  ;;  %v1276_v49 = vmax.f32 %v646_v33, 0.0  ;;  %v1534_v52 = vsel %vm184_vm0, %v1406_v35, 0.0 }
 0x10f   :  { %1730 = vadd.xlane.f32.xlu1 %v1729_v37  ;;  %v4140_v40 = vpop.f32.mrb[4].mxu1  ;;  %v1409_v42 = vmul.f32 %v5023_v18, %v1277_v36  ;;  %v661_v46 = vadd.f32 %v4044_v41, %v5018_v10  ;;  %v655_v47 = vpop.f32.mrb[5].mxu0  ;;  %v1340_v50 = vmax.f32 %v966_v34, 0.0  ;;  %v1726_v60 = vsel %vm184_vm0, %v1470_v48, 0.0 }
 0x110   :  { %v981_v43 = vadd.f32 %v4140_v40, %v5018_v10  ;;  %v975_v44 = vpop.f32.mrb[5].mxu1  ;;  %v1473_v45 = vmul.f32 %v5023_v18, %v1341_v38  ;;  %v656_v62 = vadd.f32 %v655_v47, %v5018_v10  ;;  %v1408_v63 = vmul.f32 %v5023_v18, %v1276_v49 }
 0x111   :  { %v1543_v51 = vsel %vm184_vm0, %v1409_v42, 0.0  ;;  %v1279_v57 = vmax.f32 %v661_v46, 0.0  ;;  %v976_v61 = vadd.f32 %v975_v44, %v5018_v10  ;;  %v1472_v0 = vmul.f32 %v5023_v18, %v1340_v50 }
 0x112   :  { %1535 = vadd.xlane.f32.xlu0 %v1534_v52  ;;  %v4047_v54 = vpop.f32.mrb[6].mxu0  ;;  %v1343_v55 = vmax.f32 %v981_v43, 0.0  ;;  %v1735_v56 = vsel %vm184_vm0, %v1473_v45, 0.0  ;;  %v1278_v13 = vmax.f32 %v656_v62, 0.0  ;;  %v1540_v14 = vsel %vm184_vm0, %v1408_v63, 0.0 }
 0x113   :  { %1544 = vadd.xlane.f32.xlu1 %v1543_v51  ;;  %v4143_v53 = vpop.f32.mrb[6].mxu1  ;;  %v665_v59 = vpop.f32.mrb[7].mxu0  ;;  %v671_v1 = vadd.f32 %v4047_v54, %v5018_v10  ;;  %v1411_v5 = vmul.f32 %v5023_v18, %v1279_v57  ;;  %v1342_v12 = vmax.f32 %v976_v61, 0.0  ;;  %v1732_v15 = vsel %vm184_vm0, %v1472_v0, 0.0 }
 0x114   :  { %v985_v58 = vpop.f32.mrb[7].mxu1  ;;  %v991_v4 = vadd.f32 %v4143_v53, %v5018_v10  ;;  %v1475_v8 = vmul.f32 %v5023_v18, %v1343_v55  ;;  %v666_v26 = vadd.f32 %v665_v59, %v5018_v10  ;;  %v1410_v28 = vmul.f32 %v5023_v18, %v1278_v13 }
 0x115   :  { %v1281_v16 = vmax.f32 %v671_v1, 0.0  ;;  %v1549_v21 = vsel %vm184_vm0, %v1411_v5, 0.0  ;;  %v1474_v27 = vmul.f32 %v5023_v18, %v1342_v12  ;;  %v986_v37 = vadd.f32 %v985_v58, %v5018_v10 }
 0x116   :  { %1727 = vadd.xlane.f32.xlu0 %v1726_v60  ;;  %v4050_v2 = vpop.f32.mrb[8].mxu0  ;;  %v1345_v20 = vmax.f32 %v991_v4, 0.0  ;;  %v1741_v22 = vsel %vm184_vm0, %v1475_v8, 0.0  ;;  %v1280_v38 = vmax.f32 %v666_v26, 0.0  ;;  %v1546_v40 = vsel %vm184_vm0, %v1410_v28, 0.0 }
 0x117   :  { %1736 = vadd.xlane.f32.xlu1 %v1735_v56  ;;  %v4146_v3 = vpop.f32.mrb[8].mxu1  ;;  %v675_v9 = vpop.f32.mrb[9].mxu0  ;;  %v681_v23 = vadd.f32 %v4050_v2, %v5018_v10  ;;  %v1413_v29 = vmul.f32 %v5023_v18, %v1281_v16  ;;  %v1738_v39 = vsel %vm184_vm0, %v1474_v27, 0.0  ;;  %v1344_v50 = vmax.f32 %v986_v37, 0.0 }
 0x118   :  { %v5053_v11 = vpop.f32.mrb[9].mxu1  ;;  %v1477_v34 = vmul.f32 %v5023_v18, %v1345_v20  ;;  %v1001_v51 = vadd.f32 %v4146_v3, %v5018_v10  ;;  %v1412_v52 = vmul.f32 %v5023_v18, %v1280_v38  ;;  %v676_v61 = vadd.f32 %v675_v9, %v5018_v10 }
 0x119   :  { %v1283_v32 = vmax.f32 %v681_v23, 0.0  ;;  %v1555_v41 = vsel %vm184_vm0, %v1413_v29, 0.0  ;;  %v1476_v0 = vmul.f32 %v5023_v18, %v1344_v50 }
 0x11a   :  { %1733 = vadd.xlane.f32.xlu0 %v1732_v15  ;;  %v4053_v17 = vpop.f32.mrb[10].mxu0  ;;  %v1747_v45 = vsel %vm184_vm0, %v1477_v34, 0.0  ;;  %v1347_v62 = vmax.f32 %v1001_v51, 0.0  ;;  %v1552_v63 = vsel %vm184_vm0, %v1412_v52, 0.0  ;;  %v1282_v13 = vmax.f32 %v676_v61, 0.0 }
 0x11b   :  { %1541 = vadd.xlane.f32.xlu1 %v1540_v14  ;;  %v5057_v19 = vpop.f32.mrb[10].mxu1  ;;  %v5062_v24 = vpop.f32.mrb[11].mxu0  ;;  %v691_v33 = vadd.f32 %v4053_v17, %v5018_v10  ;;  %v1415_v47 = vmul.f32 %v5023_v18, %v1283_v32  ;;  %v996_v14 = vadd.f32 %v5053_v11, %v5018_v10  ;;  %v1744_v15 = vsel %vm184_vm0, %v1476_v0, 0.0 }
 0x11c   :  { %v5064_v25 = vpop.f32.mrb[11].mxu1  ;;  %v1479_v16 = vmul.f32 %v5023_v18, %v1347_v62  ;;  %v1011_v11 = vadd.f32 %v5057_v19, %v5018_v10  ;;  %v1414_v32 = vmul.f32 %v5023_v18, %v1282_v13  ;;  %v686_v19 = vadd.f32 %v5062_v24, %v5018_v10 }
 0x11d   :  { %v1285_v44 = vmax.f32 %v691_v33, 0.0  ;;  %v1561_v56 = vsel %vm184_vm0, %v1415_v47, 0.0  ;;  %v1346_v29 = vmax.f32 %v996_v14, 0.0 }
 0x11e   :  { %1742 = vadd.xlane.f32.xlu0 %v1741_v22  ;;  %v4056_v30 = vpop.f32.mrb[12].mxu0 }
 0x11f   :  { %1550 = vadd.xlane.f32.xlu1 %v1549_v21  ;;  %v5070_v31 = vpop.f32.mrb[12].mxu1  ;;  %v5074_v35 = vpop.f32.mrb[13].mxu0  ;;  %v701_v46 = vadd.f32 %v4056_v30, %v5018_v10  ;;  %v1417_v58 = vmul.f32 %v5023_v18, %v1285_v44  ;;  %v1753_v30 = vsel %vm184_vm0, %v1479_v16, 0.0  ;;  %v1349_v44 = vmax.f32 %v1011_v11, 0.0 }
 0x120   :  { %v5076_v36 = vpop.f32.mrb[13].mxu1  ;;  %v1021_v13 = vadd.f32 %v5070_v31, %v5018_v10  ;;  %v696_v31 = vadd.f32 %v5074_v35, %v5018_v10 }
 0x121   :  { %v1287_v55 = vmax.f32 %v701_v46, 0.0  ;;  %v1567_v4 = vsel %vm184_vm0, %v1417_v58, 0.0  ;;  %v1478_v46 = vmul.f32 %v5023_v18, %v1346_v29  ;;  %v1481_v61 = vmul.f32 %v5023_v18, %v1349_v44 }
 0x122   :  { %1547 = vadd.xlane.f32.xlu0 %v1546_v40  ;;  %v4059_v42 = vpop.f32.mrb[14].mxu0  ;;  %v1351_v29 = vmax.f32 %v1021_v13, 0.0 }
 0x123   :  { %1739 = vadd.xlane.f32.xlu1 %v1738_v39  ;;  %v5082_v43 = vpop.f32.mrb[14].mxu1  ;;  %v5087_v48 = vpop.f32.mrb[15].mxu0  ;;  %v711_v57 = vadd.f32 %v4059_v42, %v5018_v10  ;;  %v1419_v8 = vmul.f32 %v5023_v18, %v1287_v55  ;;  %v1750_v58 = vsel %vm184_vm0, %v1478_v46, 0.0  ;;  %v1759_v14 = vsel %vm184_vm0, %v1481_v61, 0.0 }
 0x124   :  { %v5089_v49 = vpop.f32.mrb[15].mxu1 }
 0x125   :  { %v1289_v3 = vmax.f32 %v711_v57, 0.0  ;;  %v1573_v22 = vsel %vm184_vm0, %v1419_v8, 0.0  ;;  %v1006_v57 = vadd.f32 %v5064_v25, %v5018_v10 }
 0x126   :  { %1748 = vadd.xlane.f32.xlu0 %v1747_v45  ;;  %v4062_v53 = vpop.f32.mrb[16].mxu0  ;;  %v1558_v45 = vsel %vm184_vm0, %v1414_v32, 0.0 }
 0x127   :  { %1556 = vadd.xlane.f32.xlu1 %v1555_v41  ;;  %v4158_v54 = vpop.f32.mrb[16].mxu1  ;;  %v5096_v59 = vpop.f32.mrb[17].mxu0  ;;  %v721_v5 = vadd.f32 %v4062_v53, %v5018_v10  ;;  %v1421_v26 = vmul.f32 %v5023_v18, %v1289_v3  ;;  %v1348_v8 = vmax.f32 %v1006_v57, 0.0 }
 0x128   :  { %v5098_v60 = vpop.f32.mrb[17].mxu1  ;;  %v1041_v23 = vadd.f32 %v4158_v54, %v5018_v10 }
 0x129   :  { %v1291_v21 = vmax.f32 %v721_v5, 0.0  ;;  %v1579_v38 = vsel %vm184_vm0, %v1421_v26, 0.0  ;;  %v1480_v32 = vmul.f32 %v5023_v18, %v1348_v8 }
 0x12a   :  { %1553 = vadd.xlane.f32.xlu0 %v1552_v63  ;;  %v4065_v1 = vpop.f32.mrb[18].mxu0  ;;  %v1355_v37 = vmax.f32 %v1041_v23, 0.0 }
 0x12b   :  { %1562 = vadd.xlane.f32.xlu1 %v1561_v56  ;;  %v5103_v2 = vpop.f32.mrb[18].mxu1  ;;  %v5108_v12 = vpop.f32.mrb[19].mxu0  ;;  %v731_v39 = vadd.f32 %v4065_v1, %v5018_v10  ;;  %v1423_v40 = vmul.f32 %v5023_v18, %v1291_v21  ;;  %v1284_v56 = vmax.f32 %v686_v19, 0.0 }
 0x12c   :  { %v5110_v9 = vpop.f32.mrb[19].mxu1  ;;  %v1487_v54 = vmul.f32 %v5023_v18, %v1355_v37 }
 0x12d   :  { %v1293_v51 = vmax.f32 %v731_v39, 0.0  ;;  %v1585_v52 = vsel %vm184_vm0, %v1423_v40, 0.0 }
 0x12e   :  { %1745 = vadd.xlane.f32.xlu0 %v1744_v15  ;;  %v4068_v17 = vpop.f32.mrb[20].mxu0  ;;  %v1777_v1 = vsel %vm184_vm0, %v1487_v54, 0.0  ;;  %v1416_v15 = vmul.f32 %v5023_v18, %v1284_v56 }
 0x12f   :  { %1568 = vadd.xlane.f32.xlu1 %v1567_v4  ;;  %v4164_v20 = vpop.f32.mrb[20].mxu1  ;;  %v5119_v27 = vpop.f32.mrb[21].mxu0  ;;  %v741_v53 = vadd.f32 %v4068_v17, %v5018_v10  ;;  %v1425_v4 = vmul.f32 %v5023_v18, %v1293_v51  ;;  %v1756_v51 = vsel %vm184_vm0, %v1480_v32, 0.0 }
 0x130   :  { %v1055_v28 = vpop.f32.mrb[21].mxu1  ;;  %v1061_v3 = vadd.f32 %v4164_v20, %v5018_v10  ;;  %v1564_v11 = vsel %vm184_vm0, %v1416_v15, 0.0 }
 0x131   :  { %v1295_v0 = vmax.f32 %v741_v53, 0.0  ;;  %v1591_v21 = vsel %vm184_vm0, %v1425_v4, 0.0 }
 0x132   :  { %1754 = vadd.xlane.f32.xlu0 %v1753_v30  ;;  %v4071_v33 = vpop.f32.mrb[22].mxu0  ;;  %v1359_v20 = vmax.f32 %v1061_v3, 0.0  ;;  %v1056_v30 = vadd.f32 %v1055_v28, %v5018_v10  ;;  %v1016_v28 = vadd.f32 %v5076_v36, %v5018_v10 }
 0x133   :  { %1574 = vadd.xlane.f32.xlu1 %v1573_v22  ;;  %v5125_v34 = vpop.f32.mrb[22].mxu1  ;;  %v5130_v41 = vpop.f32.mrb[23].mxu0  ;;  %v1427_v22 = vmul.f32 %v5023_v18, %v1295_v0  ;;  %v751_v40 = vadd.f32 %v4071_v33, %v5018_v10  ;;  %v1031_v0 = vadd.f32 %v5082_v43, %v5018_v10  ;;  %v706_v43 = vadd.f32 %v5087_v48, %v5018_v10 }
 0x134   :  { %v5132_v42 = vpop.f32.mrb[23].mxu1  ;;  %v1491_v19 = vmul.f32 %v5023_v18, %v1359_v20  ;;  %v1358_v46 = vmax.f32 %v1056_v30, 0.0  ;;  %v1071_v57 = vadd.f32 %v5125_v34, %v5018_v10  ;;  %v1350_v61 = vmax.f32 %v1016_v28, 0.0 }
 0x135   :  { %v1597_v39 = vsel %vm184_vm0, %v1427_v22, 0.0  ;;  %v1297_v54 = vmax.f32 %v751_v40, 0.0  ;;  %v1353_v22 = vmax.f32 %v1031_v0, 0.0 }
 0x136   :  { %1559 = vadd.xlane.f32.xlu0 %v1558_v45  ;;  %v5138_v47 = vpop.f32.mrb[24].mxu0  ;;  %v1286_v45 = vmax.f32 %v696_v31, 0.0  ;;  %v1789_v56 = vsel %vm184_vm0, %v1491_v19, 0.0  ;;  %v1490_v3 = vmul.f32 %v5023_v18, %v1358_v46  ;;  %v1361_v34 = vmax.f32 %v1071_v57, 0.0 }
 0x137   :  { %1580 = vadd.xlane.f32.xlu1 %v1579_v38  ;;  %v5140_v50 = vpop.f32.mrb[24].mxu1  ;;  %v5145_v55 = vpop.f32.mrb[25].mxu0  ;;  %v761_v48 = vadd.f32 %v5138_v47, %v5018_v10 }
 0x138   :  { %v5147_v24 = vpop.f32.mrb[25].mxu1  ;;  %v1418_v4 = vmul.f32 %v5023_v18, %v1286_v45  ;;  %v1786_v31 = vsel %vm184_vm0, %v1490_v3, 0.0  ;;  %v1493_v40 = vmul.f32 %v5023_v18, %v1361_v34  ;;  %v1288_v45 = vmax.f32 %v706_v43, 0.0 }
 0x139   :  { %v716_v3 = vadd.f32 %v5096_v59, %v5018_v10  ;;  %v1036_v59 = vadd.f32 %v5098_v60, %v5018_v10 }
 0x13a   :  { %1751 = vadd.xlane.f32.xlu0 %v1750_v58  ;;  %v5153_v62 = vpop.f32.mrb[26].mxu0  ;;  %v1795_v57 = vsel %vm184_vm0, %v1493_v40, 0.0 }
 0x13b   :  { %1586 = vadd.xlane.f32.xlu1 %v1585_v52  ;;  %v5155_v63 = vpop.f32.mrb[26].mxu1  ;;  %v5160_v5 = vpop.f32.mrb[27].mxu0  ;;  %v1483_v52 = vmul.f32 %v5023_v18, %v1351_v29  ;;  %v1570_v29 = vsel %vm184_vm0, %v1418_v4, 0.0 }
 0x13c   :  { %v5162_v25 = vpop.f32.mrb[27].mxu1 }
 0x13e   :  { %1760 = vadd.xlane.f32.xlu0 %v1759_v14  ;;  %v5168_v16 = vpop.f32.mrb[28].mxu0  ;;  %v1429_v14 = vmul.f32 %v5023_v18, %v1297_v54 }
 0x13f   :  { %1778 = vadd.xlane.f32.xlu1 %v1777_v1  ;;  %v5170_v17 = vpop.f32.mrb[28].mxu1  ;;  %v5174_v23 = vpop.f32.mrb[29].mxu0  ;;  %v1765_v1 = vsel %vm184_vm0, %v1483_v52, 0.0  ;;  %v1485_v52 = vmul.f32 %v5023_v18, %v1353_v22 }
 0x140   :  { %v5176_v26 = vpop.f32.mrb[29].mxu1 }
 0x141   :  { %v1771_v4 = vsel %vm184_vm0, %v1485_v52, 0.0  ;;  %v771_v52 = vadd.f32 %v5153_v62, %v5018_v10  ;;  %v736_v62 = vadd.f32 %v5119_v27, %v5018_v10  ;;  %v746_v27 = vadd.f32 %v5130_v41, %v5018_v10 }
 0x142   :  { %1565 = vadd.xlane.f32.xlu0 %v1564_v11  ;;  %v5183_v37 = vpop.f32.mrb[30].mxu0  ;;  %v1066_v11 = vadd.f32 %v5132_v42, %v5018_v10  ;;  %v1026_v42 = vadd.f32 %v5089_v49, %v5018_v10 }
 0x143   :  { %1592 = vadd.xlane.f32.xlu1 %v1591_v21  ;;  %v5185_v38 = vpop.f32.mrb[30].mxu1  ;;  %v5190_v35 = vpop.f32.mrb[31].mxu0  ;;  %v1482_v21 = vmul.f32 %v5023_v18, %v1350_v61  ;;  %v1081_v61 = vadd.f32 %v5140_v50, %v5018_v10 }
 0x144   :  { %v5192_v44 = vpop.f32.mrb[31].mxu1  ;;  %v1360_v46 = vmax.f32 %v1066_v11, 0.0 }
 0x145   :  { %v1363_v50 = vmax.f32 %v1081_v61, 0.0 }
 0x146   :  { %1757 = vadd.xlane.f32.xlu0 %v1756_v51  ;;  %v5198_v53 = vpop.f32.mrb[32].mxu0  ;;  %v1762_v51 = vsel %vm184_vm0, %v1482_v21, 0.0  ;;  %v1492_v34 = vmul.f32 %v5023_v18, %v1360_v46 }
 0x147   :  { %1598 = vadd.xlane.f32.xlu1 %v1597_v39  ;;  %v5200_v33 = vpop.f32.mrb[32].mxu1  ;;  %v5205_v58 = vpop.f32.mrb[33].mxu0  ;;  %v1603_v39 = vsel %vm184_vm0, %v1429_v14, 0.0  ;;  %v1420_v14 = vmul.f32 %v5023_v18, %v1288_v45 }
 0x148   :  { %v5207_v36 = vpop.f32.mrb[33].mxu1 }
 0x149   :  { %v1576_v40 = vsel %vm184_vm0, %v1420_v14, 0.0  ;;  %v1091_v14 = vadd.f32 %v5155_v63, %v5018_v10  ;;  %v756_v63 = vadd.f32 %v5145_v55, %v5018_v10 }
 0x14a   :  { %1766 = vadd.xlane.f32.xlu0 %v1765_v1  ;;  %v5214_v8 = vpop.f32.mrb[34].mxu0  ;;  %v1352_v1 = vmax.f32 %v1026_v42, 0.0  ;;  %v1076_v42 = vadd.f32 %v5147_v24, %v5018_v10  ;;  %v1354_v24 = vmax.f32 %v1036_v59, 0.0  ;;  %v1301_v59 = vmax.f32 %v771_v52, 0.0 }
 0x14b   :  { %1790 = vadd.xlane.f32.xlu1 %v1789_v56  ;;  %v5216_v13 = vpop.f32.mrb[34].mxu1  ;;  %v5219_v15 = vpop.f32.mrb[35].mxu0  ;;  %v1299_v56 = vmax.f32 %v761_v48, 0.0  ;;  %v1792_v48 = vsel %vm184_vm0, %v1492_v34, 0.0  ;;  %v1294_v52 = vmax.f32 %v736_v62, 0.0  ;;  %v766_v62 = vadd.f32 %v5160_v5, %v5018_v10 }
 0x14c   :  { %v5221_v20 = vpop.f32.mrb[35].mxu1  ;;  %v1484_v11 = vmul.f32 %v5023_v18, %v1352_v1  ;;  %v726_v1 = vadd.f32 %v5108_v12, %v5018_v10 }
 0x14d   :  { %v1431_v22 = vmul.f32 %v5023_v18, %v1299_v56  ;;  %v1495_v56 = vmul.f32 %v5023_v18, %v1363_v50 }
 0x14e   :  { %1571 = vadd.xlane.f32.xlu0 %v1570_v29  ;;  %v5230_v30 = vpop.f32.mrb[36].mxu0 }
 0x14f   :  { %1787 = vadd.xlane.f32.xlu1 %v1786_v31  ;;  %v5232_v32 = vpop.f32.mrb[36].mxu1  ;;  %v5238_v19 = vpop.f32.mrb[37].mxu0  ;;  %v1609_v60 = vsel %vm184_vm0, %v1431_v22, 0.0 }
 0x150   :  { %v5240_v28 = vpop.f32.mrb[37].mxu1 }
 0x152   :  { %1763 = vadd.xlane.f32.xlu0 %v1762_v51  ;;  %v5246_v54 = vpop.f32.mrb[38].mxu0  ;;  %v1051_v51 = vadd.f32 %v5103_v2, %v5018_v10  ;;  %v1768_v2 = vsel %vm184_vm0, %v1484_v11, 0.0 }
 0x153   :  { %1604 = vadd.xlane.f32.xlu1 %v1603_v39  ;;  %v5248_v47 = vpop.f32.mrb[38].mxu1  ;;  %v5253_v0 = vpop.f32.mrb[39].mxu0  ;;  %v1290_v39 = vmax.f32 %v716_v3, 0.0  ;;  %v1046_v3 = vadd.f32 %v5110_v9, %v5018_v10  ;;  %v1801_v9 = vsel %vm184_vm0, %v1495_v56, 0.0  ;;  %v1365_v56 = vmax.f32 %v1091_v14, 0.0 }
 0x154   :  { %v5255_v49 = vpop.f32.mrb[39].mxu1  ;;  %v1357_v12 = vmax.f32 %v1051_v51, 0.0 }
 0x155   :  { %v1422_v34 = vmul.f32 %v5023_v18, %v1290_v39  ;;  %v1292_v39 = vmax.f32 %v726_v1, 0.0  ;;  %v1086_v1 = vadd.f32 %v5162_v25, %v5018_v10 }
 0x156   :  { %1772 = vadd.xlane.f32.xlu0 %v1771_v4  ;;  %v5262_v43 = vpop.f32.mrb[40].mxu0  ;;  %v1362_v4 = vmax.f32 %v1076_v42, 0.0  ;;  %v1356_v42 = vmax.f32 %v1046_v3, 0.0  ;;  %v1489_v3 = vmul.f32 %v5023_v18, %v1357_v12 }
 0x157   :  { %1796 = vadd.xlane.f32.xlu1 %v1795_v57  ;;  %v5264_v21 = vpop.f32.mrb[40].mxu1  ;;  %v5267_v31 = vpop.f32.mrb[41].mxu0  ;;  %v1424_v25 = vmul.f32 %v5023_v18, %v1292_v39  ;;  %v1364_v6 = vmax.f32 %v1086_v1, 0.0  ;;  %v1300_v1 = vmax.f32 %v766_v62, 0.0 }
 0x158   :  { %v5269_v29 = vpop.f32.mrb[41].mxu1  ;;  %v1494_v51 = vmul.f32 %v5023_v18, %v1362_v4  ;;  %v1296_v4 = vmax.f32 %v746_v27, 0.0  ;;  %v1488_v12 = vmul.f32 %v5023_v18, %v1356_v42  ;;  %v1497_v27 = vmul.f32 %v5023_v18, %v1365_v56 }
 0x159   :  { %v776_v56 = vadd.f32 %v5174_v23, %v5018_v10  ;;  %v1496_v62 = vmul.f32 %v5023_v18, %v1364_v6 }
 0x15a   :  { %1577 = vadd.xlane.f32.xlu0 %v1576_v40  ;;  %v5278_v45 = vpop.f32.mrb[42].mxu0  ;;  %v1486_v40 = vmul.f32 %v5023_v18, %v1354_v24  ;;  %v1433_v24 = vmul.f32 %v5023_v18, %v1301_v59  ;;  %v781_v59 = vadd.f32 %v5168_v16, %v5018_v10  ;;  %v1101_v16 = vadd.f32 %v5170_v17, %v5018_v10 }
 0x15b   :  { %1793 = vadd.xlane.f32.xlu1 %v1792_v48  ;;  %v5280_v46 = vpop.f32.mrb[42].mxu1  ;;  %v5288_v57 = vpop.f32.mrb[43].mxu0 }
 0x15c   :  { %v5290_v61 = vpop.f32.mrb[43].mxu1  ;;  %v1774_v14 = vsel %vm184_vm0, %v1486_v40, 0.0  ;;  %v1615_v39 = vsel %vm184_vm0, %v1433_v24, 0.0  ;;  %v1588_v24 = vsel %vm184_vm0, %v1424_v25, 0.0  ;;  %v1367_v25 = vmax.f32 %v1101_v16, 0.0 }
 0x15e   :  { %1769 = vadd.xlane.f32.xlu0 %v1768_v2  ;;  %v5302_v50 = vpop.f32.mrb[44].mxu0 }
 0x15f   :  { %1610 = vadd.xlane.f32.xlu1 %v1609_v60  ;;  %v5304_v22 = vpop.f32.mrb[44].mxu1  ;;  %v5307_v48 = vpop.f32.mrb[45].mxu0  ;;  %v1582_v60 = vsel %vm184_vm0, %v1422_v34, 0.0 }
 0x160   :  { %v5309_v11 = vpop.f32.mrb[45].mxu1 }
 0x162   :  { %1583 = vadd.xlane.f32.xlu0 %v1582_v60  ;;  %v5320_v2 = vpop.f32.mrb[46].mxu0  ;;  %v1798_v60 = vsel %vm184_vm0, %v1494_v51, 0.0 }
 0x163   :  { %1802 = vadd.xlane.f32.xlu1 %v1801_v9  ;;  %v5322_v41 = vpop.f32.mrb[46].mxu1  ;;  %v5326_v55 = vpop.f32.mrb[47].mxu0  ;;  %v1298_v9 = vmax.f32 %v756_v63, 0.0  ;;  %v1783_v63 = vsel %vm184_vm0, %v1489_v3, 0.0  ;;  %v1780_v3 = vsel %vm184_vm0, %v1488_v12, 0.0  ;;  %v1106_v12 = vadd.f32 %v5192_v44, %v5018_v10 }
 0x164   :  { %v5328_v34 = vpop.f32.mrb[47].mxu1  ;;  %v1121_v44 = vadd.f32 %v5200_v33, %v5018_v10 }
 0x165   :  { %6724 = vst [vmem:[#allocation12_spill] sm:$0xff] %v5328_v34  ;;  %v1426_v34 = vmul.f32 %v5023_v18, %v1294_v52  ;;  %v1096_v52 = vadd.f32 %v5176_v26, %v5018_v10  ;;  %v1430_v17 = vmul.f32 %v5023_v18, %v1298_v9  ;;  %v791_v26 = vadd.f32 %v5183_v37, %v5018_v10 }
 0x166   :  { %1775 = vadd.xlane.f32.xlu0 %v1774_v14  ;;  %v5340_v5 = vpop.f32.mrb[48].mxu0  ;;  %v1428_v14 = vmul.f32 %v5023_v18, %v1296_v4  ;;  %v1111_v9 = vadd.f32 %v5185_v38, %v5018_v10  ;;  %v801_v38 = vadd.f32 %v5198_v53, %v5018_v10  ;;  %v1499_v53 = vmul.f32 %v5023_v18, %v1367_v25 }
 0x167   :  { %1799 = vadd.xlane.f32.xlu1 %v1798_v60  ;;  %v5342_v40 = vpop.f32.mrb[48].mxu1  ;;  %v5348_v51 = vpop.f32.mrb[49].mxu0  ;;  %v1303_v60 = vmax.f32 %v781_v59, 0.0  ;;  %v1594_v23 = vsel %vm184_vm0, %v1426_v34, 0.0  ;;  %v786_v59 = vadd.f32 %v5190_v35, %v5018_v10  ;;  %v1366_v37 = vmax.f32 %v1096_v52, 0.0 }
 0x168   :  { %6725 = vst [vmem:[#allocation13_spill] sm:$0xff] %v5342_v40  ;;  %v5350_v42 = vpop.f32.mrb[49].mxu1  ;;  %v5385_v35 = vsel %vm184_vm0, %v1430_v17, 0.0  ;;  %v1305_v52 = vmax.f32 %v791_v26, 0.0  ;;  %v1368_v33 = vmax.f32 %v1106_v12, 0.0  ;;  %v811_v26 = vadd.f32 %v5214_v8, %v5018_v10 }
 0x169   :  { %6726 = vst [vmem:[#allocation14_spill] sm:$0xff] %v5350_v42  ;;  %v1807_v42 = vsel %vm184_vm0, %v1497_v27, 0.0  ;;  %v1302_v27 = vmax.f32 %v776_v56, 0.0  ;;  %v1435_v16 = vmul.f32 %v5023_v18, %v1303_v60  ;;  %v1804_v56 = vsel %vm184_vm0, %v1496_v62, 0.0 }
 0x16a   :  { %1784 = vadd.xlane.f32.xlu0 %v1783_v63  ;;  %v5365_v40 = vpop.f32.mrb[50].mxu0  ;;  %v1432_v63 = vmul.f32 %v5023_v18, %v1300_v1  ;;  %v1116_v1 = vadd.f32 %v5207_v36, %v5018_v10  ;;  %v1498_v62 = vmul.f32 %v5023_v18, %v1366_v37  ;;  %v1307_v25 = vmax.f32 %v801_v38, 0.0 }
 0x16b   :  { %1616 = vadd.xlane.f32.xlu1 %v1615_v39  ;;  %v5367_v4 = vpop.f32.mrb[50].mxu1  ;;  %v5375_v6 = vpop.f32.mrb[51].mxu0  ;;  %v5380_v39 = vsel %vm184_vm0, %v1428_v14, 0.0  ;;  %v796_v14 = vadd.f32 %v5205_v58, %v5018_v10  ;;  %v1434_v36 = vmul.f32 %v5023_v18, %v1302_v27  ;;  %v1437_v12 = vmul.f32 %v5023_v18, %v1305_v52 }
 0x16c   :  { %6727 = vst [vmem:[#allocation15_spill] sm:$0xff] %v5367_v4  ;;  %v5377_v34 = vpop.f32.mrb[51].mxu1  ;;  %v1369_v4 = vmax.f32 %v1111_v9, 0.0  ;;  %v5407_v58 = vsel %vm184_vm0, %v1432_v63, 0.0  ;;  %v1131_v9 = vadd.f32 %v5216_v13, %v5018_v10  ;;  %v1126_v63 = vadd.f32 %v5221_v20, %v5018_v10 }
 0x16d   :  { %6728 = vst [vmem:[#allocation16_spill] sm:$0xff] %v5377_v34  ;;  %v1304_v34 = vmax.f32 %v786_v59, 0.0  ;;  %v1371_v59 = vmax.f32 %v1121_v44, 0.0  ;;  %v1306_v37 = vmax.f32 %v796_v14, 0.0  ;;  %v1813_v8 = vsel %vm184_vm0, %v1499_v53, 0.0 }
 0x16e   :  { %1589 = vadd.xlane.f32.xlu0 %v1588_v24  ;;  %v5396_v60 = vpop.f32.mrb[52].mxu0  ;;  %v1501_v38 = vmul.f32 %v5023_v18, %v1369_v4  ;;  %v1309_v52 = vmax.f32 %v811_v26, 0.0  ;;  %v806_v20 = vadd.f32 %v5219_v15, %v5018_v10  ;;  %v821_v14 = vadd.f32 %v5230_v30, %v5018_v10 }
 0x16f   :  { %1808 = vadd.xlane.f32.xlu1 %v1807_v42  ;;  %v5398_v17 = vpop.f32.mrb[52].mxu1  ;;  %v5401_v42 = vpop.f32.mrb[53].mxu0  ;;  %v1436_v13 = vmul.f32 %v5023_v18, %v1304_v34  ;;  %v1439_v4 = vmul.f32 %v5023_v18, %v1307_v25  ;;  %v1373_v53 = vmax.f32 %v1131_v9, 0.0  ;;  %v1503_v34 = vmul.f32 %v5023_v18, %v1371_v59 }
 0x170   :  { %6729 = vst [vmem:[#allocation17_spill] sm:$0xff] %v5398_v17  ;;  %6730 = vst [vmem:[#allocation18_spill] sm:$0xff] %v5401_v42  ;;  %v5403_v24 = vpop.f32.mrb[53].mxu1  ;;  %v1621_v17 = vsel %vm184_vm0, %v1435_v16, 0.0  ;;  %v1500_v16 = vmul.f32 %v5023_v18, %v1368_v33  ;;  %v5441_v33 = vsel %vm184_vm0, %v1437_v12, 0.0  ;;  %v1438_v15 = vmul.f32 %v5023_v18, %v1306_v37 }
 0x171   :  { %6731 = vst [vmem:[#allocation19_spill] sm:$0xff] %v5403_v24  ;;  %v1370_v24 = vmax.f32 %v1116_v1, 0.0  ;;  %v5436_v1 = vsel %vm184_vm0, %v1434_v36, 0.0  ;;  %v5453_v25 = vsel %vm184_vm0, %v1501_v38, 0.0  ;;  %v1308_v9 = vmax.f32 %v806_v20, 0.0 }
 0x172   :  { %1781 = vadd.xlane.f32.xlu0 %v1780_v3  ;;  %v5418_v27 = vpop.f32.mrb[54].mxu0  ;;  %v5450_v36 = vsel %vm184_vm0, %v1500_v16, 0.0  ;;  %v1311_v12 = vmax.f32 %v821_v14, 0.0  ;;  %v1441_v37 = vmul.f32 %v5023_v18, %v1309_v52  ;;  %v5468_v16 = vsel %vm184_vm0, %v1439_v4, 0.0 }
 0x173   :  { %1805 = vadd.xlane.f32.xlu1 %v1804_v56  ;;  %v5420_v42 = vpop.f32.mrb[54].mxu1  ;;  %v5426_v3 = vpop.f32.mrb[55].mxu0  ;;  %v1810_v56 = vsel %vm184_vm0, %v1498_v62, 0.0  ;;  %v1372_v62 = vmax.f32 %v1126_v63, 0.0  ;;  %v1502_v26 = vmul.f32 %v5023_v18, %v1370_v24  ;;  %v1141_v63 = vadd.f32 %v5232_v32, %v5018_v10 }
 0x174   :  { %v5428_v44 = vpop.f32.mrb[55].mxu1  ;;  %v5471_v38 = vsel %vm184_vm0, %v1503_v34, 0.0  ;;  %v5482_v32 = vsel %vm184_vm0, %v1438_v15, 0.0  ;;  %v6734_v14 = vlaneseq  ;;  %v5509_v15 = vsel %vm184_vm0, %v1441_v37, 0.0 }
 0x175   :  { %6732 = vst [vmem:[#allocation20_spill] sm:$0xff] %v5428_v44  ;;  %v5478_v20 = vsel %vm184_vm0, %v1502_v26, 0.0  ;;  %v1504_v52 = vmul.f32 %v5023_v18, %v1372_v62 }
 0x176   :  { %1595 = vadd.xlane.f32.xlu0 %v1594_v23  ;;  %v5445_v44 = vpop.f32.mrb[56].mxu0  ;;  %v5456_v23 = vsel %vm184_vm0, %v1436_v13, 0.0  ;;  %v1505_v13 = vmul.f32 %v5023_v18, %v1373_v53  ;;  %v5485_v4 = vand.u32 127, %v6734_v14  ;;  %v5502_v53 = vstv %s6712_s3  ;;  %s4833_s3 = smov [#allocation8]  }
 0x177   :  { %1622 = vadd.xlane.f32.xlu1 %v1621_v17  ;;  %v5447_v30 = vpop.f32.mrb[56].mxu1  ;;  %v831_v17 = vadd.f32 %v5246_v54, %v5018_v10  ;;  %v5460_v59 = vpop.f32.mrb[57].mxu0  ;;  %v816_v54 = vadd.f32 %v5238_v19, %v5018_v10  ;;  %v1440_v14 = vmul.f32 %v5023_v18, %v1308_v9  ;;  %v5524_v37 = vsel %vm184_vm0, %v1504_v52, 0.0  ;;  %s3630_s17 = sshll.u32 %s4833_s3, 4  ;;  %s3631_s17 = int_to_ptr.vmem [resolvable:$true] %s3630_s17 }
 0x178   :  { %v5462_v24 = vpop.f32.mrb[57].mxu1  ;;  %v5529_v9 = vadd.f32 %v5255_v49, %v5018_v10  ;;  %s4801_s18 = scalar_lea.vmem %s3631_s17, 128  ;;  %p4806_p3 = scmp.lt.s32.totalorder %s3631_s17, %s3631_s17 }
 0x179   :  { %6733 = vst [vmem:[#allocation21_spill] sm:$0xff] %v5462_v24  ;;  %v1313_v19 = vmax.f32 %v831_v17, 0.0  ;;  %v1375_v17 = vmax.f32 %v1141_v63, 0.0  ;;  %p4802_p2 = scmp.ne.s32.totalorder %s3631_s17, %s4801_s18  ;;  %p4807_p4 = scmp.lt.s32.totalorder %s4801_s18, %s4801_s18 }
 0x17a   :  { %1601 = vadd.xlane.f32.xlu0 %v5380_v39  ;;  %v5487_v34 = vpop.f32.mrb[58].mxu0  ;;  %v5497_v39 = vadd.f32 %v5248_v47, %v5018_v10  ;;  %v5515_v47 = vadd.f32 %v5253_v0, %v5018_v10  ;;  %v2964_v0 = vadd.s32 4294967272, %v5485_v4 }
 0x17b   :  { %1814 = vadd.xlane.f32.xlu1 %v1813_v8  ;;  %6735 = vst [vmem:[#allocation22_spill] sm:$0xff] %v5487_v34  ;;  %v5489_v24 = vpop.f32.mrb[58].mxu1  ;;  %v5493_v8 = vadd.f32 %v5240_v28, %v5018_v10  ;;  %v5504_v62 = vpop.f32.mrb[59].mxu0  ;;  %v1443_v28 = vmul.f32 %v5023_v18, %v1311_v12  ;;  %v841_v34 = vadd.f32 %v5262_v43, %v5018_v10  ;;  %v2950_v12 = vadd.s32 4294967288, %v5485_v4  ;;  %p4808_p5 = por %p4807_p4, %p4806_p3 }
 0x17c   :  { %6736 = vst [vmem:[#allocation23_spill] sm:$0xff] %v5489_v24  ;;  %6737 = vst [vmem:[#allocation24_spill] sm:$0xff] %v5504_v62  ;;  %v5506_v26 = vpop.f32.mrb[59].mxu1  ;;  %v1310_v24 = vmax.f32 %v816_v54, 0.0  ;;  %v5520_v62 = vsel %vm184_vm0, %v1505_v13, 0.0  ;;  %v1445_v13 = vmul.f32 %v5023_v18, %v1313_v19 }
 0x17d   :  { %6738 = vst [vmem:[#allocation25_spill] sm:$0xff] %v5506_v26  ;;  %v1374_v54 = vmax.f32 %v5493_v8, 0.0  ;;  %v5548_v26 = vsel %vm184_vm0, %v1443_v28, 0.0  ;;  %v5555_v8 = vsel %vm184_vm0, %v1440_v14, 0.0  ;;  %v5573_v14 = vsub.s32 %v2964_v0, %v5012_v7  ;;  %p4809_p6 = pnand %p4808_p5, %p4802_p2 }
 0x17e   :  { %1607 = vadd.xlane.f32.xlu0 %v5385_v35  ;;  %v5534_v43 = vpop.f32.mrb[60].mxu0  ;;  %v5540_v35 = vadd.f32 %v5264_v21, %v5018_v10  ;;  %v5559_v21 = vadd.f32 %v5269_v29, %v5018_v10  ;;  %v851_v29 = vadd.f32 %v5278_v45, %v5018_v10  ;;  %v861_v28 = vadd.f32 %v5302_v50, %v5018_v10 }
 0x17f   :  { %1811 = vadd.xlane.f32.xlu1 %v1810_v56  ;;  %v5532_v63 = vpop.f32.mrb[60].mxu1  ;;  %6740 = vst [vmem:[#allocation27_spill] sm:$0xff] %v5534_v43  ;;  %v1377_v56 = vmax.f32 %v5497_v39, 0.0  ;;  %v5545_v49 = vpop.f32.mrb[61].mxu0  ;;  %v5552_v43 = vadd.f32 %v5267_v31, %v5018_v10  ;;  %v1315_v39 = vmax.f32 %v841_v34, 0.0  ;;  %v5567_v31 = vsub.s32 %v2950_v12, %v5012_v7  ;;  %6743 = vst [vmem:[#allocation30_spill] sm:$0xff] %v5573_v14 }
 0x180   :  { %6739 = vst [vmem:[#allocation26_spill] sm:$0xff] %v5532_v63  ;;  %v5543_v52 = vpop.f32.mrb[61].mxu1  ;;  %6742 = vst [vmem:[#allocation29_spill] sm:$0xff] %v5545_v49  ;;  %v1442_v49 = vmul.f32 %v5023_v18, %v1310_v24  ;;  %v5579_v24 = vsel %vm184_vm0, %v1445_v13, 0.0  ;;  %v5613_v50 = vadd.f32 %v5288_v57, %v5018_v10 }
 0x181   :  { %6741 = vst [vmem:[#allocation28_spill] sm:$0xff] %v5543_v52  ;;  %v1507_v52 = vmul.f32 %v5023_v18, %v1375_v17  ;;  %v5594_v17 = vadd.f32 %v5280_v46, %v5018_v10  ;;  %v1447_v19 = vmul.f32 %v5023_v18, %v1315_v39  ;;  %v1317_v46 = vmax.f32 %v851_v29, 0.0 }
 0x182   :  { %1613 = vadd.xlane.f32.xlu0 %v5407_v58  ;;  %v5575_v34 = vpop.f32.mrb[62].mxu0  ;;  %v5583_v58 = vsub.s32 %v5485_v4, %v5012_v7  ;;  %v5605_v45 = vsel %vm184_vm0, %v1442_v49, 0.0  ;;  %v856_v49 = vadd.f32 %v5307_v48, %v5018_v10  ;;  %v1176_v39 = vadd.f32 %v5309_v11, %v5018_v10 }
 0x183   :  { %1628 = vadd.xlane.f32.xlu1 %v5441_v33  ;;  %6744 = vst [vmem:[#allocation31_spill] sm:$0xff] %v5575_v34  ;;  %v2957_v33 = vadd.s32 4294967280, %v5485_v4  ;;  %v5586_v12 = vpop.f32.mrb[63].mxu0  ;;  %v5596_v13 = vpop.f32.mrb[62].mxu1  ;;  %v5600_v34 = vsel %vm184_vm0, %v1507_v52, 0.0  ;;  %v5617_v52 = vadd.f32 %v5290_v61, %v5018_v10  ;;  %v1319_v29 = vmax.f32 %v861_v28, 0.0 }
 0x184   :  { %6745 = vst [vmem:[#allocation32_spill] sm:$0xff] %v5586_v12  ;;  %6746 = vst [vmem:[#allocation33_spill] sm:$0xff] %v5596_v13  ;;  %v1181_v12 = vadd.f32 %v5304_v22, %v5018_v10  ;;  %v5607_v0 = vpop.f32.mrb[63].mxu1  ;;  %v1506_v22 = vmul.f32 %v5023_v18, %v1374_v54  ;;  %v871_v61 = vadd.f32 %v5320_v2, %v5018_v10  ;;  %v5633_v54 = vsel %vm184_vm0, %v1447_v19, 0.0 }
 0x185   :  { %6747 = vst [vmem:[#allocation34_spill] sm:$0xff] %v5607_v0  ;;  %v1509_v0 = vmul.f32 %v5023_v18, %v1377_v56  ;;  %v866_v11 = vadd.f32 %v5326_v55, %v5018_v10  ;;  %v1449_v56 = vmul.f32 %v5023_v18, %v1317_v46  ;;  %v1382_v57 = vmax.f32 %v1176_v39, 0.0  ;;  %v6748_v55 = vld [vmem:[#allocation12_spill] sm:$0xff] }
 0x186   :  { %1619 = vadd.xlane.f32.xlu0 %v5436_v1  ;;  %v2978_v1 = vadd.s32 4294967256, %v5485_v4  ;;  %v1383_v48 = vmax.f32 %v1181_v12, 0.0  ;;  %v5645_v19 = vsel %vm184_vm0, %v1506_v22, 0.0  ;;  %v1318_v12 = vmax.f32 %v856_v49, 0.0 }
 0x187   :  { %1817 = vadd.xlane.f32.xlu1 %v5450_v36  ;;  %v5625_v36 = vsub.s32 %v2957_v33, %v5012_v7  ;;  %v1191_v33 = vadd.f32 %v5322_v41, %v5018_v10  ;;  %v1186_v13 = vadd.f32 %v6748_v55, %v5018_v10  ;;  %v5654_v28 = vsel %vm184_vm0, %v1509_v0, 0.0 }
 0x188   :  { %v5650_v41 = vsub.s32 %v2978_v1, %v5012_v7  ;;  %v881_v46 = vadd.f32 %v5340_v5, %v5018_v10  ;;  %v5659_v22 = vmul.f32 %v5023_v18, %v1383_v48  ;;  %v1320_v49 = vmax.f32 %v866_v11, 0.0 }
 0x189   :  { %v1385_v39 = vmax.f32 %v1191_v33, 0.0  ;;  %v2971_v2 = vadd.s32 4294967264, %v5485_v4  ;;  %v5665_v1 = vsel %vm184_vm0, %v1449_v56, 0.0  ;;  %v6750_v0 = vmax.f32 %v5515_v47, 0.0 }
 0x18a   :  { %1820 = vadd.xlane.f32.xlu0 %v5453_v25  ;;  %6749 = vst [vmem:[#allocation12_spill] sm:$0xff] %v5650_v41  ;;  %v1451_v25 = vmul.f32 %v5023_v18, %v1319_v29  ;;  %v876_v5 = vadd.f32 %v5348_v51, %v5018_v10  ;;  %v5675_v11 = vmul.f32 %v5023_v18, %v1318_v12  ;;  %v2992_v33 = vadd.s32 4294967240, %v5485_v4  ;;  %v6752_v51 = vld [vmem:[#allocation14_spill] sm:$0xff] }
 0x18b   :  { %1634 = vadd.xlane.f32.xlu1 %v5468_v16  ;;  %v1321_v16 = vmax.f32 %v871_v61, 0.0  ;;  %v1444_v29 = vmul.f32 %v5023_v18, %v6750_v0  ;;  %v6751_v61 = vld [vmem:[#allocation13_spill] sm:$0xff]  ;;  %v1323_v55 = vmax.f32 %v881_v46, 0.0  ;;  %v1196_v0 = vadd.f32 %v6752_v51, %v5018_v10  ;;  %v6766_v41 = vld [vmem:[#allocation18_spill] sm:$0xff] }
 0x18c   :  { %v1201_v48 = vadd.f32 %v6751_v61, %v5018_v10  ;;  %v5682_v56 = vsel %vm184_vm0, %v1451_v25, 0.0  ;;  %v5688_v61 = vmul.f32 %v5023_v18, %v1320_v49  ;;  %v5691_v12 = vsub.s32 %v2971_v2, %v5012_v7 }
 0x18d   :  { %v1453_v47 = vmul.f32 %v5023_v18, %v1321_v16  ;;  %v5699_v16 = vsel %vm184_vm0, %v1444_v29, 0.0  ;;  %v1322_v25 = vmax.f32 %v876_v5, 0.0  ;;  %v886_v49 = vadd.f32 %v5375_v6, %v5018_v10 }
 0x18e   :  { %1625 = vadd.xlane.f32.xlu0 %v5456_v23  ;;  %v1384_v23 = vmax.f32 %v1186_v13, 0.0  ;;  %6753 = vst [vmem:[#allocation13_spill] sm:$0xff] %v5691_v12  ;;  %v891_v13 = vadd.f32 %v5365_v40, %v5018_v10  ;;  %v1387_v46 = vmax.f32 %v1201_v48, 0.0  ;;  %v5704_v2 = vsub.s32 %v2992_v33, %v5012_v7 }
 0x18f   :  { %1823 = vadd.xlane.f32.xlu1 %v5478_v20  ;;  %v5678_v20 = vmul.f32 %v5023_v18, %v1382_v57  ;;  %v1517_v57 = vmul.f32 %v5023_v18, %v1385_v39  ;;  %v6755_v51 = vmax.f32 %v5529_v9, 0.0  ;;  %v1386_v29 = vmax.f32 %v1196_v0, 0.0 }
 0x190   :  { %6754 = vst [vmem:[#allocation14_spill] sm:$0xff] %v5704_v2  ;;  %v1516_v39 = vmul.f32 %v5023_v18, %v1384_v23  ;;  %v2985_v5 = vadd.s32 4294967248, %v5485_v4  ;;  %v1455_v48 = vmul.f32 %v5023_v18, %v1323_v55  ;;  %v1325_v33 = vmax.f32 %v891_v13, 0.0 }
 0x191   :  { %v1508_v40 = vmul.f32 %v5023_v18, %v6755_v51  ;;  %v5717_v6 = vsel %vm184_vm0, %v1517_v57, 0.0  ;;  %v6756_v23 = vmax.f32 %v5540_v35, 0.0  ;;  %v6757_v51 = vld [vmem:[#allocation15_spill] sm:$0xff]  ;;  %v1324_v0 = vmax.f32 %v886_v49, 0.0 }
 0x192   :  { %1826 = vadd.xlane.f32.xlu0 %v5471_v38  ;;  %v5712_v38 = vsel %vm184_vm0, %v1453_v47, 0.0  ;;  %v1211_v2 = vadd.f32 %v6757_v51, %v5018_v10  ;;  %v5727_v47 = vmul.f32 %v5023_v18, %v1322_v25  ;;  %v3020_v55 = vadd.s32 4294967208, %v5485_v4 }
 0x193   :  { %1640 = vadd.xlane.f32.xlu1 %v5509_v15  ;;  %v3006_v15 = vadd.s32 4294967224, %v5485_v4  ;;  %v1511_v9 = vmul.f32 %v5023_v18, %v6756_v23  ;;  %v1519_v57 = vmul.f32 %v5023_v18, %v1387_v46  ;;  %v5732_v13 = vsel %vm184_vm0, %v1516_v39, 0.0  ;;  %v6761_v39 = vld [vmem:[#allocation16_spill] sm:$0xff] }
 0x194   :  { %v5735_v35 = vsel %vm184_vm0, %v1508_v40, 0.0  ;;  %v5744_v25 = vmul.f32 %v5023_v18, %v1386_v29  ;;  %v5747_v49 = vsub.s32 %v2985_v5, %v5012_v7  ;;  %v5750_v46 = vsel %vm184_vm0, %v1455_v48, 0.0 }
 0x195   :  { %v5738_v23 = vsub.s32 %v3006_v15, %v5012_v7  ;;  %v1206_v40 = vadd.f32 %v6761_v39, %v5018_v10  ;;  %v5755_v51 = vsel %vm184_vm0, %v1511_v9, 0.0  ;;  %v1389_v15 = vmax.f32 %v1211_v2, 0.0 }
 0x196   :  { %1631 = vadd.xlane.f32.xlu0 %v5482_v32  ;;  %6760 = vst [vmem:[#allocation35_spill] sm:$0xff] %v5747_v49  ;;  %v5762_v29 = vmul.f32 %v5023_v18, %v1324_v0  ;;  %v5765_v5 = vsub.s32 %v3020_v55, %v5012_v7  ;;  %v5768_v48 = vsel %vm184_vm0, %v1519_v57, 0.0  ;;  %v6763_v9 = vmax.f32 %v5559_v21, 0.0  ;;  %v6764_v21 = vld [vmem:[#allocation17_spill] sm:$0xff] }
 0x197   :  { %1829 = vadd.xlane.f32.xlu1 %v5524_v37  ;;  %6758 = vst [vmem:[#allocation15_spill] sm:$0xff] %v5738_v23  ;;  %v6759_v37 = vmax.f32 %v5552_v43, 0.0  ;;  %v3034_v43 = vadd.s32 4294967192, %v5485_v4  ;;  %v901_v0 = vadd.f32 %v5396_v60, %v5018_v10  ;;  %v1521_v63 = vmul.f32 %v5023_v18, %v1389_v15 }
 0x198   :  { %6762 = vst [vmem:[#allocation16_spill] sm:$0xff] %v5765_v5  ;;  %v1510_v2 = vmul.f32 %v5023_v18, %v6763_v9  ;;  %v1388_v5 = vmax.f32 %v1206_v40, 0.0  ;;  %v1221_v9 = vadd.f32 %v6764_v21, %v5018_v10  ;;  %v896_v12 = vadd.f32 %v6766_v41, %v5018_v10  ;;  %v6767_v40 = vld [vmem:[#allocation19_spill] sm:$0xff] }
 0x199   :  { %v1446_v32 = vmul.f32 %v5023_v18, %v6759_v37  ;;  %v1457_v37 = vmul.f32 %v5023_v18, %v1325_v33  ;;  %v5785_v49 = vsub.s32 %v3034_v43, %v5012_v7  ;;  %v1216_v43 = vadd.f32 %v6767_v40, %v5018_v10 }
 0x19a   :  { %1832 = vadd.xlane.f32.xlu0 %v5520_v62  ;;  %v3048_v62 = vadd.s32 4294967176, %v5485_v4  ;;  %v1327_v41 = vmax.f32 %v901_v0, 0.0  ;;  %v5812_v40 = vsel %vm184_vm0, %v1521_v63, 0.0 }
 0x19b   :  { %1646 = vadd.xlane.f32.xlu1 %v5548_v26  ;;  %v1539_v23 = vpop.xlane.xlu0 %1538  ;;  %v5774_v33 = vsel %vm184_vm0, %v1446_v32, 0.0  ;;  %v2999_v26 = vadd.s32 4294967232, %v5485_v4  ;;  %6765 = vst [vmem:[#allocation17_spill] sm:$0xff] %v5785_v49  ;;  %v5788_v32 = vsel %vm184_vm0, %v1457_v37, 0.0 }
 0x19c   :  { %v1731_v39 = vpop.xlane.xlu1 %1730  ;;  %v1921_v57 = vadd.f32 %v5502_v53, %v1539_v23  ;;  %v5796_v23 = vsel %vm184_vm0, %v1510_v2, 0.0  ;;  %v5801_v21 = vsub.s32 %v3048_v62, %v5012_v7  ;;  %v1326_v62 = vmax.f32 %v896_v12, 0.0 }
 0x19d   :  { %v1985_v55 = vadd.f32 %v5502_v53, %v1731_v39  ;;  %v5804_v15 = vsub.s32 %v2999_v26, %v5012_v7  ;;  %v1459_v63 = vmul.f32 %v5023_v18, %v1327_v41  ;;  %v6771_v12 = vmax.f32 %v5617_v52, 0.0 }
 0x19e   :  { %v3769_v14 = vmul.f32 -1.442695, %v1921_v57  ;;  %1637 = vadd.xlane.f32.xlu0 %v5555_v8  ;;  %6768 = vst [vmem:[#allocation18_spill] sm:$0xff] %v5801_v21  ;;  %v1391_v57 = vmax.f32 %v1221_v9, 0.0  ;;  %v1520_v21 = vmul.f32 %v5023_v18, %v1388_v5  ;;  %v911_v52 = vadd.f32 %v5418_v27, %v5018_v10 }
 0x19f   :  { %v3833_v60 = vmul.f32 -1.442695, %v1985_v55  ;;  %1652 = vadd.xlane.f32.xlu1 %v5579_v24  ;;  %v1536_v37 = vpop.xlane.xlu0 %1535  ;;  %v6769_v55 = vmax.f32 %v5594_v17, 0.0  ;;  %v6770_v17 = vmax.f32 %v5613_v50, 0.0  ;;  %v1512_v5 = vmul.f32 %v5023_v18, %v6771_v12 }
 0x1a0   :  { %v1545_v39 = vpop.xlane.xlu1 %1544  ;;  %v1920_v2 = vadd.f32 %v5502_v53, %v1536_v37  ;;  %v5832_v37 = vmul.f32 %v5023_v18, %v1326_v62  ;;  %v5846_v62 = vsel %vm184_vm0, %v1459_v63, 0.0  ;;  %v906_v27 = vadd.f32 %v5426_v3, %v5018_v10  ;;  %v6772_v3 = vld [vmem:[#allocation20_spill] sm:$0xff] }
 0x1a1   :  { %v1513_v24 = vmul.f32 %v5023_v18, %v6769_v55  ;;  %4245 = vpow2.f32 %v3833_v60  ;;  %v1923_v8 = vadd.f32 %v5502_v53, %v1545_v39  ;;  %v1448_v0 = vmul.f32 %v5023_v18, %v6770_v17 }
 0x1a2   :  { %4247 = vpow2.f32 %v3769_v14  ;;  %v3768_v49 = vmul.f32 -1.442695, %v1920_v2  ;;  %1838 = vadd.xlane.f32.xlu0 %v5600_v34  ;;  %v1390_v60 = vmax.f32 %v1216_v43, 0.0  ;;  %v1523_v43 = vmul.f32 %v5023_v18, %v1391_v57 }
 0x1a3   :  { %v3771_v26 = vmul.f32 -1.442695, %v1923_v8  ;;  %1658 = vadd.xlane.f32.xlu1 %v5633_v54  ;;  %v1728_v9 = vpop.xlane.xlu0 %1727  ;;  %v5821_v14 = vsel %vm184_vm0, %v1513_v24, 0.0  ;;  %v3013_v54 = vadd.s32 4294967216, %v5485_v4  ;;  %v5835_v55 = vsel %vm184_vm0, %v1520_v21, 0.0 }
 0x1a4   :  { %v1737_v39 = vpop.xlane.xlu1 %1736  ;;  %v1984_v50 = vadd.f32 %v5502_v53, %v1728_v9  ;;  %v5842_v8 = vsel %vm184_vm0, %v1448_v0, 0.0  ;;  %v5849_v21 = vsel %vm184_vm0, %v1512_v5, 0.0  ;;  %v5861_v0 = vsel %vm184_vm0, %v1523_v43, 0.0 }
 0x1a5   :  { %4249 = vpow2.f32 %v3771_v26  ;;  %v1987_v34 = vadd.f32 %v5502_v53, %v1737_v39  ;;  %v5858_v17 = vsub.s32 %v3013_v54, %v5012_v7  ;;  %v5865_v39 = vsel %vm184_vm0, %v5659_v22, 0.0 }
 0x1a6   :  { %4251 = vpow2.f32 %v3768_v49  ;;  %v3832_v24 = vmul.f32 -1.442695, %v1984_v50  ;;  %1643 = vadd.xlane.f32.xlu0 %v5605_v45  ;;  %v1522_v49 = vmul.f32 %v5023_v18, %v1390_v60  ;;  %v1329_v60 = vmax.f32 %v911_v52, 0.0 }
 0x1a7   :  { %v3835_v41 = vmul.f32 -1.442695, %v1987_v34  ;;  %1664 = vadd.xlane.f32.xlu1 %v5665_v1  ;;  %v1734_v57 = vpop.xlane.xlu0 %1733  ;;  %v1231_v1 = vadd.f32 %v5420_v42, %v5018_v10  ;;  %v1226_v9 = vadd.f32 %v6772_v3, %v5018_v10  ;;  %v5876_v5 = vsel %vm184_vm0, %v5675_v11, 0.0 }
 0x1a8   :  { %v1542_v2 = vpop.xlane.xlu1 %1541  ;;  %v1986_v26 = vadd.f32 %v5502_v53, %v1734_v57  ;;  %4253 = vpow2.f32 %v3832_v24  ;;  %v5872_v12 = vsel %vm184_vm0, %v1522_v49, 0.0  ;;  %v1328_v43 = vmax.f32 %v906_v27, 0.0 }
 0x1a9   :  { %v1922_v45 = vadd.f32 %v5502_v53, %v1542_v2  ;;  %4255 = vpow2.f32 %v3835_v41  ;;  %v1393_v52 = vmax.f32 %v1231_v1, 0.0  ;;  %v5880_v41 = vsel %vm184_vm0, %v5678_v20, 0.0 }
 0x1aa   :  { %1835 = vadd.xlane.f32.xlu0 %v5645_v19  ;;  %v3834_v22 = vmul.f32 -1.442695, %v1986_v26  ;;  %v1461_v11 = vmul.f32 %v5023_v18, %v1329_v60  ;;  %v1392_v2 = vmax.f32 %v1226_v9, 0.0  ;;  %v3027_v57 = vadd.s32 4294967200, %v5485_v4 }
 0x1ab   :  { %v4246_v42 = vpop.eup %4245  ;;  %v3770_v63 = vmul.f32 -1.442695, %v1922_v45  ;;  %1670 = vadd.xlane.f32.xlu1 %v5682_v56  ;;  %v1743_v50 = vpop.xlane.xlu0 %1742  ;;  %v921_v20 = vadd.f32 %v5445_v44, %v5018_v10  ;;  %v5892_v1 = vsel %vm184_vm0, %v5688_v61, 0.0 }
 0x1ac   :  { %v4248_v54 = vpop.eup %4247  ;;  %v1551_v34 = vpop.xlane.xlu1 %1550  ;;  %v1989_v24 = vadd.f32 %v5502_v53, %v1743_v50  ;;  %v2497_v49 = vadd.f32 1.0, %v4246_v42  ;;  %v5895_v42 = vmul.f32 %v5023_v18, %v1328_v43  ;;  %v1524_v61 = vmul.f32 %v5023_v18, %v1392_v2 }
 0x1ad   :  { %v2433_v56 = vadd.f32 1.0, %v4248_v54  ;;  %4257 = vpow2.f32 %v3770_v63  ;;  %v1925_v19 = vadd.f32 %v5502_v53, %v1551_v34  ;;  %v1525_v63 = vmul.f32 %v5023_v18, %v1393_v52 }
 0x1ae   :  { %1844 = vadd.xlane.f32.xlu0 %v5654_v28  ;;  %v3837_v60 = vmul.f32 -1.442695, %v1989_v24  ;;  %v5907_v50 = vsel %vm184_vm0, %v1461_v11, 0.0  ;;  %v1331_v43 = vmax.f32 %v921_v20, 0.0  ;;  %v1241_v2 = vadd.f32 %v5447_v30, %v5018_v10 }
 0x1af   :  { %v4250_v45 = vpop.eup %4249  ;;  %4259 = vrcp.f32 %v2433_v56  ;;  %v3773_v27 = vmul.f32 -1.442695, %v1925_v19  ;;  %1676 = vadd.xlane.f32.xlu1 %v5712_v38  ;;  %v1548_v9 = vpop.xlane.xlu0 %1547 }
 0x1b0   :  { %v4252_v26 = vpop.eup %4251  ;;  %4261 = vpow2.f32 %v3834_v22  ;;  %v1740_v3 = vpop.xlane.xlu1 %1739  ;;  %v1924_v44 = vadd.f32 %v5502_v53, %v1548_v9  ;;  %v2435_v54 = vadd.f32 1.0, %v4250_v45  ;;  %v5902_v22 = vsub.s32 %v3027_v57, %v5012_v7 }
 0x1b1   :  { %v2432_v38 = vadd.f32 1.0, %v4252_v26  ;;  %4263 = vpow2.f32 %v3773_v27  ;;  %v1988_v28 = vadd.f32 %v5502_v53, %v1740_v3  ;;  %v5916_v45 = vsel %vm184_vm0, %v1525_v63, 0.0 }
 0x1b2   :  { %4265 = vrcp.f32 %v2497_v49  ;;  %1649 = vadd.xlane.f32.xlu0 %v5699_v16  ;;  %v4254_v52 = vpop.eup %4253  ;;  %v3772_v56 = vmul.f32 -1.442695, %v1924_v44  ;;  %v916_v49 = vadd.f32 %v5460_v59, %v5018_v10  ;;  %v5919_v27 = vsel %vm184_vm0, %v1524_v61, 0.0  ;;  %v6773_v59 = vld [vmem:[#allocation21_spill] sm:$0xff] }
 0x1b3   :  { %4267 = vrcp.f32 %v2432_v38  ;;  %v3836_v34 = vmul.f32 -1.442695, %v1988_v28  ;;  %1868 = vadd.xlane.f32.xlu1 %v5717_v6  ;;  %v1749_v24 = vpop.xlane.xlu0 %1748  ;;  %v4256_v57 = vpop.eup %4255  ;;  %v2496_v6 = vadd.f32 1.0, %v4254_v52  ;;  %v5923_v20 = vadd.f32 %v6773_v59, %v5018_v10 }
 0x1b4   :  { %4269 = vpow2.f32 %v3837_v60  ;;  %v1557_v19 = vpop.xlane.xlu1 %1556  ;;  %v1991_v11 = vadd.f32 %v5502_v53, %v1749_v24  ;;  %v5929_v3 = vsel %vm184_vm0, %v5727_v47, 0.0  ;;  %v2499_v9 = vadd.f32 1.0, %v4256_v57 }
 0x1b5   :  { %4271 = vpow2.f32 %v3836_v34  ;;  %v1927_v16 = vadd.f32 %v5502_v53, %v1557_v19  ;;  %v1330_v44 = vmax.f32 %v916_v49, 0.0  ;;  %v1395_v52 = vmax.f32 %v1241_v2, 0.0 }
 0x1b6   :  { %4273 = vrcp.f32 %v2435_v54  ;;  %v3839_v60 = vmul.f32 -1.442695, %v1991_v11  ;;  %1841 = vadd.xlane.f32.xlu0 %v5735_v35  ;;  %v1463_v35 = vmul.f32 %v5023_v18, %v1331_v43  ;;  %v1394_v47 = vmax.f32 %v5923_v20, 0.0 }
 0x1b7   :  { %v4258_v30 = vpop.eup %4257  ;;  %4275 = vrcp.f32 %v2496_v6  ;;  %v3775_v26 = vmul.f32 -1.442695, %v1927_v16  ;;  %1865 = vadd.xlane.f32.xlu1 %v5732_v13  ;;  %v1554_v28 = vpop.xlane.xlu0 %1553  ;;  %v5937_v19 = vsel %vm184_vm0, %v5744_v25, 0.0  ;;  %v3041_v2 = vadd.s32 4294967184, %v5485_v4 }
 0x1b8   :  { %v2434_v63 = vadd.f32 1.0, %v4258_v30  ;;  %4277 = vpow2.f32 %v3772_v56  ;;  %v1563_v38 = vpop.xlane.xlu1 %1562  ;;  %v1926_v34 = vadd.f32 %v5502_v53, %v1554_v28  ;;  %v5943_v25 = vmul.f32 %v5023_v18, %v1330_v44  ;;  %v6774_v28 = vld [vmem:[#allocation22_spill] sm:$0xff] }
 0x1b9   :  { %v4260_v54 = vpop.eup %4259  ;;  %4279 = vpow2.f32 %v3775_v26  ;;  %v1929_v61 = vadd.f32 %v5502_v53, %v1563_v38  ;;  %v5959_v44 = vadd.f32 %v6774_v28, %v5018_v10 }
 0x1ba   :  { %v4262_v13 = vpop.eup %4261  ;;  %4281 = vrcp.f32 %v2434_v63  ;;  %1850 = vadd.xlane.f32.xlu0 %v5755_v51  ;;  %v3774_v6 = vmul.f32 -1.442695, %v1926_v34  ;;  %v5948_v51 = vmul.f32 %v5023_v18, %v1395_v52  ;;  %v2954_v30 = vrot.slane %v4260_v54, %v5567_v31 }
 0x1bb   :  { %v4264_v56 = vpop.eup %4263  ;;  %v2498_v24 = vadd.f32 1.0, %v4262_v13  ;;  %4283 = vpow2.f32 %v3839_v60  ;;  %v3777_v49 = vmul.f32 -1.442695, %v1929_v61  ;;  %1682 = vadd.xlane.f32.xlu1 %v5750_v46  ;;  %v1746_v11 = vpop.xlane.xlu0 %1745  ;;  %v5953_v60 = vsel %vm184_vm0, %v1463_v35, 0.0 }
 0x1bc   :  { %v4266_v57 = vpop.eup %4265  ;;  %4285 = vrcp.f32 %v2499_v9  ;;  %v2437_v43 = vadd.f32 1.0, %v4264_v56  ;;  %v1569_v16 = vpop.xlane.xlu1 %1568  ;;  %v1990_v46 = vadd.f32 %v5502_v53, %v1746_v11 }
 0x1bd   :  { %v4268_v59 = vpop.eup %4267  ;;  %4287 = vrcp.f32 %v2498_v24  ;;  %v1931_v20 = vadd.f32 %v5502_v53, %v1569_v16 }
 0x1be   :  { %v4270_v4 = vpop.eup %4269  ;;  %v2949_v26 = vrot.slane %v4268_v59, %v5583_v58  ;;  %4289 = vrcp.f32 %v2437_v43  ;;  %1655 = vadd.xlane.f32.xlu0 %v5774_v33  ;;  %v3838_v52 = vmul.f32 -1.442695, %v1990_v46  ;;  %v5965_v33 = vmul.f32 %v5023_v18, %v1394_v47 }
 0x1bf   :  { %v4272_v9 = vpop.eup %4271  ;;  %v2501_v63 = vadd.f32 1.0, %v4270_v4  ;;  %4291 = vpow2.f32 %v3777_v49  ;;  %v3779_v38 = vmul.f32 -1.442695, %v1931_v20  ;;  %1874 = vadd.xlane.f32.xlu1 %v5768_v48  ;;  %v1755_v35 = vpop.xlane.xlu0 %1754  ;;  %v3299_v43 = vrot.slane %v4266_v57, %v5567_v31 }
 0x1c0   :  { %v4274_v61 = vpop.eup %4273  ;;  %v2956_v54 = vsel %vm2955_vm1, %v2954_v30, %v2949_v26  ;;  %v2500_v34 = vadd.f32 1.0, %v4272_v9  ;;  %4293 = vpow2.f32 %v3774_v6  ;;  %v1575_v13 = vpop.xlane.xlu1 %1574  ;;  %v1993_v48 = vadd.f32 %v5502_v53, %v1755_v35 }
 0x1c1   :  { %v4276_v56 = vpop.eup %4275  ;;  %4295 = vrcp.f32 %v2501_v63  ;;  %v1933_v24 = vadd.f32 %v5502_v53, %v1575_v13  ;;  %v5970_v6 = vsub.s32 %v3041_v2, %v5012_v7  ;;  %v5976_v47 = vsel %vm184_vm0, %v5762_v29, 0.0  ;;  %v6775_v63 = vld [vmem:[#allocation30_spill] sm:$0xff] }
 0x1c2   :  { %v4278_v49 = vpop.eup %4277  ;;  %v3295_v16 = vrot.slane %v4276_v56, %v5583_v58  ;;  %4297 = vrcp.f32 %v2500_v34  ;;  %1847 = vadd.xlane.f32.xlu0 %v5796_v23  ;;  %v3841_v7 = vmul.f32 -1.442695, %v1993_v48  ;;  %v6776_v34 = vld [vmem:[#allocation24_spill] sm:$0xff] }
 0x1c3   :  { %v4280_v11 = vpop.eup %4279  ;;  %v2436_v59 = vadd.f32 1.0, %v4278_v49  ;;  %4299 = vpow2.f32 %v3779_v38  ;;  %v3781_v20 = vmul.f32 -1.442695, %v1933_v24  ;;  %1688 = vadd.xlane.f32.xlu1 %v5788_v32  ;;  %v1560_v30 = vpop.xlane.xlu0 %1559  ;;  %v2968_v38 = vrot.slane %v4274_v61, %v6775_v63 }
 0x1c4   :  { %v4282_v46 = vpop.eup %4281  ;;  %v3300_v57 = vsel %vm2955_vm1, %v3299_v43, %v3295_v16  ;;  %v2439_v4 = vadd.f32 1.0, %v4280_v11  ;;  %4301 = vpow2.f32 %v3838_v52  ;;  %v1581_v2 = vpop.xlane.xlu1 %1580  ;;  %v1928_v23 = vadd.f32 %v5502_v53, %v1560_v30 }
 0x1c5   :  { %v4284_v26 = vpop.eup %4283  ;;  %v2961_v9 = vrot.slane %v4282_v46, %v5625_v36  ;;  %4303 = vrcp.f32 %v2436_v59  ;;  %v1935_v32 = vadd.f32 %v5502_v53, %v1581_v2  ;;  %v5985_v52 = vadd.f32 %v6776_v34, %v5018_v10 }
 0x1c6   :  { %v4286_v29 = vpop.eup %4285  ;;  %4305 = vrcp.f32 %v2439_v4  ;;  %v2503_v28 = vadd.f32 1.0, %v4284_v26  ;;  %v3776_v24 = vmul.f32 -1.442695, %v1928_v23  ;;  %1856 = vadd.xlane.f32.xlu0 %v5821_v14  ;;  %v1333_v11 = vmax.f32 %v5959_v44, 0.0  ;;  %v6782_v44 = vld [vmem:[#allocation27_spill] sm:$0xff] }
 0x1c7   :  { %v4288_v13 = vpop.eup %4287  ;;  %v2963_v35 = vsel %vm2962_vm2, %v2961_v9, %v2956_v54  ;;  %4307 = vpow2.f32 %v3781_v20  ;;  %v3783_v56 = vmul.f32 -1.442695, %v1935_v32  ;;  %1880 = vadd.xlane.f32.xlu1 %v5812_v40  ;;  %v1752_v16 = vpop.xlane.xlu0 %1751  ;;  %v3309_v54 = vrot.slane %v4286_v29, %v6775_v63 }
 0x1c8   :  { %v5990_v48 = vpop.eup %4289  ;;  %v3304_v61 = vrot.slane %v4288_v13, %v5625_v36  ;;  %v2970_v49 = vsel %vm2969_vm3, %v2968_v38, %v2963_v35  ;;  %4309 = vrcp.f32 %v2503_v28  ;;  %v1587_v43 = vpop.xlane.xlu1 %1586  ;;  %v1992_v40 = vadd.f32 %v5502_v53, %v1752_v16  ;;  %v6777_v38 = vld [vmem:[#allocation23_spill] sm:$0xff]  ;;  %v6778_v13 = vld [vmem:[#allocation13_spill] sm:$0xff] }
 0x1c9   :  { %v4292_v59 = vpop.eup %4291  ;;  %4311 = vpow2.f32 %v3841_v7  ;;  %v1937_v20 = vadd.f32 %v5502_v53, %v1587_v43  ;;  %v6001_v2 = vsel %vm184_vm0, %v5948_v51, 0.0  ;;  %v6008_v28 = vadd.f32 %v6777_v38, %v5018_v10 }
 0x1ca   :  { %v4294_v14 = vpop.eup %4293  ;;  %v3305_v46 = vsel %vm2962_vm2, %v3304_v61, %v3300_v57  ;;  %v2441_v4 = vadd.f32 1.0, %v4292_v59  ;;  %4313 = vpow2.f32 %v3783_v56  ;;  %1661 = vadd.xlane.f32.xlu0 %v5842_v8  ;;  %v3840_v23 = vmul.f32 -1.442695, %v1992_v40 }
 0x1cb   :  { %v4296_v30 = vpop.eup %4295  ;;  %v3310_v26 = vsel %vm2969_vm3, %v3309_v54, %v3305_v46  ;;  %v2438_v9 = vadd.f32 1.0, %v4294_v14  ;;  %4315 = vpow2.f32 %v3776_v24  ;;  %v3785_v32 = vmul.f32 -1.442695, %v1937_v20  ;;  %1877 = vadd.xlane.f32.xlu1 %v5835_v55  ;;  %v1761_v29 = vpop.xlane.xlu0 %1760  ;;  %v6779_v24 = vld [vmem:[#allocation12_spill] sm:$0xff] }
 0x1cc   :  { %v4298_v7 = vpop.eup %4297  ;;  %4317 = vrcp.f32 %v2441_v4  ;;  %v1779_v57 = vpop.xlane.xlu1 %1778  ;;  %v6012_v51 = vsel %vm184_vm0, %v5832_v37, 0.0  ;;  %v1995_v8 = vadd.f32 %v5502_v53, %v1761_v29  ;;  %v3319_v61 = vrot.slane %v4296_v30, %v6779_v24 }
 0x1cd   :  { %v4300_v34 = vpop.eup %4299  ;;  %v3314_v35 = vrot.slane %v4298_v7, %v6778_v13  ;;  %4319 = vrcp.f32 %v2438_v9  ;;  %v2001_v55 = vadd.f32 %v5502_v53, %v1779_v57  ;;  %v1332_v43 = vmax.f32 %v5985_v52, 0.0  ;;  %v6780_v57 = vld [vmem:[#allocation25_spill] sm:$0xff] }
 0x1ce   :  { %v4302_v56 = vpop.eup %4301  ;;  %4321 = vpow2.f32 %v3785_v32  ;;  %v6021_v16 = vsel %vm184_vm0, %v5965_v33, 0.0  ;;  %1853 = vadd.xlane.f32.xlu0 %v5849_v21  ;;  %v2443_v52 = vadd.f32 1.0, %v4300_v34  ;;  %v3843_v33 = vmul.f32 -1.442695, %v1995_v8 }
 0x1cf   :  { %v4304_v37 = vpop.eup %4303  ;;  %v3315_v59 = vsel %vm2976_vm4, %v3314_v35, %v3310_v26  ;;  %v2502_v54 = vadd.f32 1.0, %v4302_v56  ;;  %4323 = vpow2.f32 %v3840_v23  ;;  %v3849_v20 = vmul.f32 -1.442695, %v2001_v55  ;;  %1694 = vadd.xlane.f32.xlu1 %v5846_v62  ;;  %v1566_v30 = vpop.xlane.xlu0 %1565 }
 0x1d0   :  { %v6026_v40 = vpop.eup %4305  ;;  %v2975_v14 = vrot.slane %v4304_v37, %v6778_v13  ;;  %v6030_v46 = vsel %vm2983_vm5, %v3319_v61, %v3315_v59  ;;  %v1593_v4 = vpop.xlane.xlu1 %1592  ;;  %v2982_v9 = vrot.slane %v5990_v48, %v6779_v24  ;;  %v1930_v21 = vadd.f32 %v5502_v53, %v1566_v30 }
 0x1d1   :  { %v4308_v26 = vpop.eup %4307  ;;  %4325 = vrcp.f32 %v2502_v54  ;;  %v1939_v62 = vadd.f32 %v5502_v53, %v1593_v4  ;;  %v6041_v29 = vadd.f32 %v6780_v57, %v5018_v10  ;;  %v6048_v35 = vsel %vm184_vm0, %v5895_v42, 0.0 }
 0x1d2   :  { %v6036_v32 = vpop.eup %4309  ;;  %v2977_v7 = vsel %vm2976_vm4, %v2975_v14, %v2970_v49  ;;  %v2445_v23 = vadd.f32 1.0, %v4308_v26  ;;  %4327 = vpow2.f32 %v3849_v20  ;;  %1862 = vadd.xlane.f32.xlu0 %v5865_v39  ;;  %v6053_v61 = vmul.f32 %v5023_v18, %v1333_v11  ;;  %v6781_v14 = vld [vmem:[#allocation26_spill] sm:$0xff] }
 0x1d3   :  { %v4312_v38 = vpop.eup %4311  ;;  %v2984_v34 = vsel %vm2983_vm5, %v2982_v9, %v2977_v7  ;;  %4329 = vpow2.f32 %v3843_v33  ;;  %v3787_v48 = vmul.f32 -1.442695, %v1939_v62  ;;  %1886 = vadd.xlane.f32.xlu1 %v5861_v0  ;;  %v1758_v56 = vpop.xlane.xlu0 %1757  ;;  %v1397_v37 = vmax.f32 %v6008_v28, 0.0  ;;  %v6783_v62 = vld [vmem:[#allocation14_spill] sm:$0xff]  ;;  %v6784_v7 = vld [vmem:[#allocation35_spill] sm:$0xff] }
 0x1d4   :  { %v4314_v49 = vpop.eup %4313  ;;  %4331 = vrcp.f32 %v2443_v52  ;;  %v2505_v55 = vadd.f32 1.0, %v4312_v38  ;;  %v1599_v8 = vpop.xlane.xlu1 %1598  ;;  %v3778_v0 = vmul.f32 -1.442695, %v1930_v21  ;;  %v1994_v42 = vadd.f32 %v5502_v53, %v1758_v56 }
 0x1d5   :  { %v4316_v59 = vpop.eup %4315  ;;  %4333 = vrcp.f32 %v2445_v23  ;;  %v1941_v39 = vadd.f32 %v5502_v53, %v1599_v8  ;;  %v6062_v52 = vadd.f32 %v6781_v14, %v5018_v10  ;;  %v6066_v11 = vadd.f32 %v6782_v44, %v5018_v10 }
 0x1d6   :  { %v6058_v54 = vpop.eup %4317  ;;  %v2440_v20 = vadd.f32 1.0, %v4316_v59  ;;  %4335 = vpow2.f32 %v3787_v48  ;;  %v2447_v4 = vadd.f32 1.0, %v4314_v49  ;;  %1667 = vadd.xlane.f32.xlu0 %v5876_v5  ;;  %v6071_v26 = vmul.f32 %v5023_v18, %v1332_v43 }
 0x1d7   :  { %v4320_v33 = vpop.eup %4319  ;;  %4337 = vrcp.f32 %v2505_v55  ;;  %v3789_v30 = vmul.f32 -1.442695, %v1941_v39  ;;  %1883 = vadd.xlane.f32.xlu1 %v5872_v12  ;;  %v2996_v21 = vrot.slane %v6026_v40, %v6783_v62  ;;  %v1767_v38 = vpop.xlane.xlu0 %1766  ;;  %v1396_v48 = vmax.f32 %v6041_v29, 0.0  ;;  %v6785_v40 = vld [vmem:[#allocation28_spill] sm:$0xff] }
 0x1d8   :  { %v4322_v9 = vpop.eup %4321  ;;  %v2989_v23 = vrot.slane %v4320_v33, %v6784_v7  ;;  %4339 = vrcp.f32 %v2440_v20  ;;  %v1791_v57 = vpop.xlane.xlu1 %1790  ;;  %v3842_v55 = vmul.f32 -1.442695, %v1994_v42  ;;  %v1997_v5 = vadd.f32 %v5502_v53, %v1767_v38 }
 0x1d9   :  { %v4324_v49 = vpop.eup %4323  ;;  %4341 = vpow2.f32 %v3778_v0  ;;  %v2005_v12 = vadd.f32 %v5502_v53, %v1791_v57  ;;  %v6082_v56 = vadd.f32 %v6785_v40, %v5018_v10  ;;  %v2449_v0 = vadd.f32 1.0, %v4322_v9 }
 0x1da   :  { %v2991_v43 = vsel %vm2990_vm6, %v2989_v23, %v2984_v34  ;;  %v2504_v8 = vadd.f32 1.0, %v4324_v49  ;;  %4343 = vpow2.f32 %v3789_v30  ;;  %1859 = vadd.xlane.f32.xlu0 %v5880_v41  ;;  %v3329_v42 = vrot.slane %v6036_v32, %v6783_v62 }
 0x1db   :  { %v4326_v59 = vpop.eup %4325  ;;  %4345 = vrcp.f32 %v2447_v4  ;;  %v6085_v29 = vsel %vm2997_vm7, %v2996_v21, %v2991_v43  ;;  %v3853_v39 = vmul.f32 -1.442695, %v2005_v12  ;;  %1700 = vadd.xlane.f32.xlu1 %v5907_v50  ;;  %v3845_v14 = vmul.f32 -1.442695, %v1997_v5  ;;  %v1572_v33 = vpop.xlane.xlu0 %1571 }
 0x1dc   :  { %v4328_v34 = vpop.eup %4327  ;;  %v3324_v20 = vrot.slane %v4326_v59, %v6784_v7  ;;  %4347 = vrcp.f32 %v2504_v8  ;;  %v1788_v44 = vpop.xlane.xlu1 %1787  ;;  %v1932_v21 = vadd.f32 %v5502_v53, %v1572_v33  ;;  %v6100_v32 = vsel %vm184_vm0, %v5943_v25, 0.0 }
 0x1dd   :  { %v4330_v4 = vpop.eup %4329  ;;  %v2513_v30 = vadd.f32 1.0, %v4328_v34  ;;  %4349 = vpow2.f32 %v3842_v55  ;;  %v2004_v9 = vadd.f32 %v5502_v53, %v1788_v44  ;;  %v6116_v43 = vsel %vm184_vm0, %v6053_v61, 0.0  ;;  %v6786_v61 = vld [vmem:[#allocation29_spill] sm:$0xff] }
 0x1de   :  { %v6094_v50 = vpop.eup %4331  ;;  %v3325_v41 = vsel %vm2990_vm6, %v3324_v20, %v6030_v46  ;;  %v2507_v23 = vadd.f32 1.0, %v4330_v4  ;;  %4351 = vpow2.f32 %v3853_v39  ;;  %1673 = vadd.xlane.f32.xlu0 %v5892_v1  ;;  %v6112_v46 = vmul.f32 %v5023_v18, %v1397_v37 }
 0x1df   :  { %v6102_v57 = vpop.eup %4333  ;;  %4353 = vrcp.f32 %v2449_v0  ;;  %v6105_v38 = vsel %vm2997_vm7, %v3329_v42, %v3325_v41  ;;  %v3852_v49 = vmul.f32 -1.442695, %v2004_v9  ;;  %1892 = vadd.xlane.f32.xlu1 %v5916_v45  ;;  %v3780_v25 = vmul.f32 -1.442695, %v1932_v21  ;;  %v1764_v5 = vpop.xlane.xlu0 %1763 }
 0x1e0   :  { %v4336_v55 = vpop.eup %4335  ;;  %4355 = vrcp.f32 %v2513_v30  ;;  %v1605_v12 = vpop.xlane.xlu1 %1604  ;;  %v1399_v8 = vmax.f32 %v6062_v52, 0.0  ;;  %v1996_v45 = vadd.f32 %v5502_v53, %v1764_v5  ;;  %v1335_v28 = vmax.f32 %v6066_v11, 0.0 }
 0x1e1   :  { %v4338_v40 = vpop.eup %4337  ;;  %4357 = vpow2.f32 %v3845_v14  ;;  %v1943_v1 = vadd.f32 %v5502_v53, %v1605_v12  ;;  %v6123_v59 = vmul.f32 %v5023_v18, %v1396_v48  ;;  %v1398_v0 = vmax.f32 %v6082_v56, 0.0  ;;  %v6787_v14 = vld [vmem:[#allocation15_spill] sm:$0xff]  ;;  %v6789_v56 = vld [vmem:[#allocation32_spill] sm:$0xff] }
 0x1e2   :  { %v4340_v37 = vpop.eup %4339  ;;  %4359 = vrcp.f32 %v2507_v23  ;;  %v6128_v39 = vadd.f32 %v6786_v61, %v5018_v10  ;;  %v2451_v42 = vadd.f32 1.0, %v4336_v55  ;;  %1679 = vadd.xlane.f32.xlu0 %v5929_v3  ;;  %v3010_v48 = vrot.slane %v6058_v54, %v6787_v14 }
 0x1e3   :  { %v4342_v52 = vpop.eup %4341  ;;  %v3003_v34 = vrot.slane %v4340_v37, %v5804_v15  ;;  %4361 = vpow2.f32 %v3852_v49  ;;  %v3791_v20 = vmul.f32 -1.442695, %v1943_v1  ;;  %1889 = vadd.xlane.f32.xlu1 %v5919_v27  ;;  %v3844_v33 = vmul.f32 -1.442695, %v1996_v45  ;;  %v1773_v30 = vpop.xlane.xlu0 %1772 }
 0x1e4   :  { %v4344_v11 = vpop.eup %4343  ;;  %v2442_v44 = vadd.f32 1.0, %v4342_v52  ;;  %4363 = vpow2.f32 %v3780_v25  ;;  %v1797_v4 = vpop.xlane.xlu1 %1796  ;;  %v6142_v27 = vsel %vm184_vm0, %v6071_v26, 0.0  ;;  %v1999_v23 = vadd.f32 %v5502_v53, %v1773_v30 }
 0x1e5   :  { %v6135_v9 = vpop.eup %4345  ;;  %v3005_v21 = vsel %vm3004_vm8, %v3003_v34, %v6085_v29  ;;  %4365 = vpow2.f32 %v3791_v20  ;;  %v2007_v41 = vadd.f32 %v5502_v53, %v1797_v4  ;;  %v6149_v49 = vmul.f32 %v5023_v18, %v1399_v8 }
 0x1e6   :  { %v4348_v3 = vpop.eup %4347  ;;  %v6145_v54 = vsel %vm3011_vm9, %v3010_v48, %v3005_v21  ;;  %4367 = vrcp.f32 %v2442_v44  ;;  %v2453_v25 = vadd.f32 1.0, %v4344_v11  ;;  %1871 = vadd.xlane.f32.xlu0 %v5937_v19  ;;  %v3339_v5 = vrot.slane %v4338_v40, %v6787_v14  ;;  %v6788_v44 = vld [vmem:[#allocation31_spill] sm:$0xff] }
 0x1e7   :  { %v4350_v55 = vpop.eup %4349  ;;  %v3334_v29 = vrot.slane %v4348_v3, %v5804_v15  ;;  %4369 = vrcp.f32 %v2451_v42  ;;  %v3855_v12 = vmul.f32 -1.442695, %v2007_v41  ;;  %1706 = vadd.xlane.f32.xlu1 %v5953_v60  ;;  %v3847_v45 = vmul.f32 -1.442695, %v1999_v23  ;;  %v1578_v8 = vpop.xlane.xlu0 %1577 }
 0x1e8   :  { %v4352_v26 = vpop.eup %4351  ;;  %v2506_v1 = vadd.f32 1.0, %v4350_v55  ;;  %4371 = vpow2.f32 %v3844_v33  ;;  %v1794_v37 = vpop.xlane.xlu1 %1793  ;;  %v1934_v42 = vadd.f32 %v5502_v53, %v1578_v8  ;;  %v1467_v20 = vmul.f32 %v5023_v18, %v1335_v28 }
 0x1e9   :  { %v6155_v61 = vpop.eup %4353  ;;  %v3335_v52 = vsel %vm3004_vm8, %v3334_v29, %v6105_v38  ;;  %v2517_v34 = vadd.f32 1.0, %v4352_v26  ;;  %4373 = vpow2.f32 %v3855_v12  ;;  %v2006_v60 = vadd.f32 %v5502_v53, %v1794_v37 }
 0x1ea   :  { %v6160_v19 = vpop.eup %4355  ;;  %v6163_v40 = vsel %vm3011_vm9, %v3339_v5, %v3335_v52  ;;  %4375 = vrcp.f32 %v2506_v1  ;;  %1685 = vadd.xlane.f32.xlu0 %v5976_v47  ;;  %v6171_v38 = vsel %vm184_vm0, %v6112_v46, 0.0  ;;  %v6175_v33 = vadd.f32 %v6788_v44, %v5018_v10  ;;  %v6791_v44 = vld [vmem:[#allocation33_spill] sm:$0xff] }
 0x1eb   :  { %v4358_v11 = vpop.eup %4357  ;;  %4377 = vrcp.f32 %v2453_v25  ;;  %v3854_v48 = vmul.f32 -1.442695, %v2006_v60  ;;  %1898 = vadd.xlane.f32.xlu1 %v6001_v2  ;;  %v3782_v28 = vmul.f32 -1.442695, %v1934_v42  ;;  %v1770_v41 = vpop.xlane.xlu0 %1769  ;;  %v6182_v2 = vmul.f32 %v5023_v18, %v1398_v0 }
 0x1ec   :  { %v6177_v4 = vpop.eup %4359  ;;  %v2509_v30 = vadd.f32 1.0, %v4358_v11  ;;  %4379 = vpow2.f32 %v3847_v45  ;;  %v1611_v21 = vpop.xlane.xlu1 %1610  ;;  %v1998_v3 = vadd.f32 %v5502_v53, %v1770_v41  ;;  %v1334_v23 = vmax.f32 %v6128_v39, 0.0  ;;  %v6790_v11 = vld [vmem:[#allocation16_spill] sm:$0xff] }
 0x1ed   :  { %v4362_v47 = vpop.eup %4361  ;;  %4381 = vrcp.f32 %v2517_v34  ;;  %v1945_v46 = vadd.f32 %v5502_v53, %v1611_v21  ;;  %v6189_v25 = vsel %vm184_vm0, %v6123_v59, 0.0  ;;  %v6193_v12 = vadd.f32 %v6789_v56, %v5018_v10 }
 0x1ee   :  { %v4364_v55 = vpop.eup %4363  ;;  %v2516_v29 = vadd.f32 1.0, %v4362_v47  ;;  %4383 = vpow2.f32 %v3854_v48  ;;  %1691 = vadd.xlane.f32.xlu0 %v6012_v51  ;;  %v1337_v39 = vmax.f32 %v6175_v33, 0.0  ;;  %v3846_v45 = vmul.f32 -1.442695, %v1998_v3 }
 0x1ef   :  { %v4366_v0 = vpop.eup %4365  ;;  %v2444_v26 = vadd.f32 1.0, %v4364_v55  ;;  %4385 = vpow2.f32 %v3782_v28  ;;  %v3793_v5 = vmul.f32 -1.442695, %v1945_v46  ;;  %1895 = vadd.xlane.f32.xlu1 %v6021_v16  ;;  %v1584_v59 = vpop.xlane.xlu0 %1583  ;;  %v6199_v8 = vsel %vm184_vm0, %v1467_v20, 0.0 }
 0x1f0   :  { %v4368_v1 = vpop.eup %4367  ;;  %4387 = vrcp.f32 %v2509_v30  ;;  %v1803_v37 = vpop.xlane.xlu1 %1802  ;;  %v6203_v52 = vsel %vm184_vm0, %v6149_v49, 0.0  ;;  %v1936_v60 = vadd.f32 %v5502_v53, %v1584_v59  ;;  %v3024_v48 = vrot.slane %v6094_v50, %v6790_v11 }
 0x1f1   :  { %v6205_v34 = vpop.eup %4369  ;;  %v3017_v16 = vrot.slane %v4368_v1, %v5858_v17  ;;  %4389 = vrcp.f32 %v2444_v26  ;;  %v2009_v51 = vadd.f32 %v5502_v53, %v1803_v37  ;;  %v2455_v20 = vadd.f32 1.0, %v4366_v0 }
 0x1f2   :  { %v4372_v42 = vpop.eup %4371  ;;  %4391 = vrcp.f32 %v2516_v29  ;;  %v6214_v30 = vadd.f32 %v6791_v44, %v5018_v10  ;;  %1697 = vadd.xlane.f32.xlu0 %v6048_v35  ;;  %v3784_v3 = vmul.f32 -1.442695, %v1936_v60  ;;  %v3349_v35 = vrot.slane %v6177_v4, %v6790_v11 }
 0x1f3   :  { %v4374_v49 = vpop.eup %4373  ;;  %v3019_v28 = vsel %vm3018_vm10, %v3017_v16, %v6145_v54  ;;  %v2508_v21 = vadd.f32 1.0, %v4372_v42  ;;  %4393 = vpow2.f32 %v3793_v5  ;;  %v3857_v41 = vmul.f32 -1.442695, %v2009_v51  ;;  %1712 = vadd.xlane.f32.xlu1 %v6116_v43  ;;  %v1776_v29 = vpop.xlane.xlu0 %1775 }
 0x1f4   :  { %v4376_v47 = vpop.eup %4375  ;;  %v3026_v50 = vsel %vm3025_vm11, %v3024_v48, %v3019_v28  ;;  %v2519_v46 = vadd.f32 1.0, %v4374_v49  ;;  %4395 = vpow2.f32 %v3846_v45  ;;  %v1800_v55 = vpop.xlane.xlu1 %1799  ;;  %v2000_v43 = vadd.f32 %v5502_v53, %v1776_v29 }
 0x1f5   :  { %v6221_v56 = vpop.eup %4377  ;;  %v3344_v54 = vrot.slane %v4376_v47, %v5858_v17  ;;  %4397 = vrcp.f32 %v2508_v21  ;;  %v2008_v0 = vadd.f32 %v5502_v53, %v1800_v55  ;;  %v1466_v5 = vmul.f32 %v5023_v18, %v1334_v23  ;;  %v6792_v23 = vld [vmem:[#allocation34_spill] sm:$0xff] }
 0x1f6   :  { %v4380_v26 = vpop.eup %4379  ;;  %4399 = vrcp.f32 %v2455_v20  ;;  %v1336_v1 = vmax.f32 %v6193_v12, 0.0  ;;  %1703 = vadd.xlane.f32.xlu0 %v6100_v32  ;;  %v1266_v42 = vadd.f32 %v6792_v23, %v5018_v10  ;;  %v6240_v12 = vsel %vm184_vm0, %v6182_v2, 0.0 }
 0x1f7   :  { %v6230_v45 = vpop.eup %4381  ;;  %v3345_v37 = vsel %vm3018_vm10, %v3344_v54, %v6163_v40  ;;  %v2511_v59 = vadd.f32 1.0, %v4380_v26  ;;  %4401 = vpow2.f32 %v3857_v41  ;;  %v3856_v16 = vmul.f32 -1.442695, %v2008_v0  ;;  %1904 = vadd.xlane.f32.xlu1 %v6171_v38  ;;  %v1785_v60 = vpop.xlane.xlu0 %1784  ;;  %v6793_v54 = vld [vmem:[#allocation17_spill] sm:$0xff] }
 0x1f8   :  { %v4384_v51 = vpop.eup %4383  ;;  %4403 = vpow2.f32 %v3784_v3  ;;  %v1617_v4 = vpop.xlane.xlu1 %1616  ;;  %v3350_v40 = vsel %vm3025_vm11, %v3349_v35, %v3345_v37  ;;  %v3848_v20 = vmul.f32 -1.442695, %v2000_v43  ;;  %v2003_v32 = vadd.f32 %v5502_v53, %v1785_v60 }
 0x1f9   :  { %v4386_v48 = vpop.eup %4385  ;;  %4405 = vrcp.f32 %v2519_v46  ;;  %v1947_v38 = vadd.f32 %v5502_v53, %v1617_v4  ;;  %v1469_v10 = vmul.f32 %v5023_v18, %v1337_v39  ;;  %v1401_v2 = vmax.f32 %v6214_v30, 0.0 }
 0x1fa   :  { %v6245_v44 = vpop.eup %4387  ;;  %4407 = vrcp.f32 %v2511_v59  ;;  %v2446_v49 = vadd.f32 1.0, %v4386_v48  ;;  %v3851_v41 = vmul.f32 -1.442695, %v2003_v32  ;;  %1709 = vadd.xlane.f32.xlu0 %v6142_v27  ;;  %v1468_v47 = vmul.f32 %v5023_v18, %v1336_v1 }
 0x1fb   :  { %v4390_v28 = vpop.eup %4389  ;;  %4409 = vpow2.f32 %v3856_v16  ;;  %v3795_v21 = vmul.f32 -1.442695, %v1947_v38  ;;  %1901 = vadd.xlane.f32.xlu1 %v6189_v25  ;;  %v2518_v55 = vadd.f32 1.0, %v4384_v51  ;;  %v1590_v39 = vpop.xlane.xlu0 %1589  ;;  %v1400_v29 = vmax.f32 %v1266_v42, 0.0 }
 0x1fc   :  { %v6254_v46 = vpop.eup %4391  ;;  %v3031_v3 = vrot.slane %v4390_v28, %v5902_v22  ;;  %4411 = vrcp.f32 %v2446_v49  ;;  %v1809_v33 = vpop.xlane.xlu1 %1808  ;;  %v3038_v0 = vrot.slane %v6102_v57, %v6793_v54  ;;  %v1938_v27 = vadd.f32 %v5502_v53, %v1590_v39 }
 0x1fd   :  { %v4394_v30 = vpop.eup %4393  ;;  %4413 = vpow2.f32 %v3848_v20  ;;  %v2011_v25 = vadd.f32 %v5502_v53, %v1809_v33  ;;  %v1533_v35 = vmul.f32 %v5023_v18, %v1401_v2  ;;  %v1714_v1 = vsel %vm184_vm0, %v1466_v5, 0.0 }
 0x1fe   :  { %v4396_v43 = vpop.eup %4395  ;;  %v3033_v26 = vsel %vm3032_vm12, %v3031_v3, %v3026_v50  ;;  %4415 = vpow2.f32 %v3795_v21  ;;  %1910 = vadd.xlane.f32.xlu0 %v6203_v52  ;;  %v2457_v4 = vadd.f32 1.0, %v4394_v30  ;;  %v3786_v60 = vmul.f32 -1.442695, %v1938_v27 }
 0x1ff   :  { %v4398_v37 = vpop.eup %4397  ;;  %v6265_v59 = vsel %vm3039_vm13, %v3038_v0, %v3033_v26  ;;  %v2510_v16 = vadd.f32 1.0, %v4396_v43  ;;  %4417 = vpow2.f32 %v3851_v41  ;;  %v3859_v57 = vmul.f32 -1.442695, %v2011_v25  ;;  %1718 = vadd.xlane.f32.xlu1 %v6199_v8  ;;  %v1782_v5 = vpop.xlane.xlu0 %1781 }
 0x200   :  { %v6269_v51 = vpop.eup %4399  ;;  %v3354_v50 = vrot.slane %v4398_v37, %v5902_v22  ;;  %4419 = vrcp.f32 %v2518_v55  ;;  %v1806_v23 = vpop.xlane.xlu1 %1805  ;;  %v2002_v20 = vadd.f32 %v5502_v53, %v1782_v5  ;;  %v1723_v38 = vsel %vm184_vm0, %v1469_v10, 0.0 }
 0x201   :  { %v4402_v42 = vpop.eup %4401  ;;  %4421 = vrcp.f32 %v2510_v16  ;;  %v2010_v48 = vadd.f32 %v5502_v53, %v1806_v23  ;;  %v3359_v52 = vrot.slane %v6245_v44, %v6793_v54  ;;  %v1532_v32 = vmul.f32 %v5023_v18, %v1400_v29 }
 0x202   :  { %v4404_v8 = vpop.eup %4403  ;;  %4423 = vpow2.f32 %v3859_v57  ;;  %v3355_v49 = vsel %vm3032_vm12, %v3354_v50, %v3350_v40  ;;  %v3850_v41 = vmul.f32 -1.442695, %v2002_v20  ;;  %1715 = vadd.xlane.f32.xlu0 %v1714_v1  ;;  %v2521_v10 = vadd.f32 1.0, %v4402_v42  ;;  %v6794_v1 = vld [vmem:[#allocation18_spill] sm:$0xff] }
 0x203   :  { %v6279_v2 = vpop.eup %4405  ;;  %v2448_v28 = vadd.f32 1.0, %v4404_v8  ;;  %4425 = vpow2.f32 %v3786_v60  ;;  %v3858_v21 = vmul.f32 -1.442695, %v2010_v48  ;;  %1907 = vadd.xlane.f32.xlu1 %v6240_v12  ;;  %v1596_v44 = vpop.xlane.xlu0 %1595  ;;  %v1720_v33 = vsel %vm184_vm0, %v1468_v47, 0.0 }
 0x204   :  { %v6282_v3 = vpop.eup %4407  ;;  %4427 = vrcp.f32 %v2457_v4  ;;  %v1623_v55 = vpop.xlane.xlu1 %1622  ;;  %v3360_v18 = vsel %vm3039_vm13, %v3359_v52, %v3355_v49  ;;  %v1940_v29 = vadd.f32 %v5502_v53, %v1596_v44  ;;  %v1915_v12 = vsel %vm184_vm0, %v1533_v35, 0.0 }
 0x205   :  { %v4410_v40 = vpop.eup %4409  ;;  %4429 = vrcp.f32 %v2448_v28  ;;  %v1949_v39 = vadd.f32 %v5502_v53, %v1623_v55  ;;  %v1912_v0 = vsel %vm184_vm0, %v1532_v32, 0.0  ;;  %v3052_v37 = vrot.slane %v6135_v9, %v6794_v1 }
 0x206   :  { %v4412_v30 = vpop.eup %4411  ;;  %4431 = vpow2.f32 %v3858_v21  ;;  %v2520_v47 = vadd.f32 1.0, %v4410_v40  ;;  %1721 = vadd.xlane.f32.xlu0 %v1720_v33  ;;  %v3788_v57 = vmul.f32 -1.442695, %v1940_v29  ;;  %vm3608_vm0 = vcmask 1041409  }
 0x207   :  { %v4414_v25 = vpop.eup %4413  ;;  %v3045_v27 = vrot.slane %v4412_v30, %v5970_v6  ;;  %4433 = vpow2.f32 %v3850_v41  ;;  %v3797_v43 = vmul.f32 -1.442695, %v1949_v39  ;;  %1724 = vadd.xlane.f32.xlu1 %v1723_v38  ;;  %v1602_v35 = vpop.xlane.xlu0 %1601 }
 0x208   :  { %v4416_v26 = vpop.eup %4415  ;;  %4435 = vrcp.f32 %v2521_v10  ;;  %v2512_v16 = vadd.f32 1.0, %v4414_v25  ;;  %v1815_v50 = vpop.xlane.xlu1 %1814  ;;  %v1942_v48 = vadd.f32 %v5502_v53, %v1602_v35 }
 0x209   :  { %v4418_v4 = vpop.eup %4417  ;;  %v3047_v60 = vsel %vm3046_vm14, %v3045_v27, %v6265_v59  ;;  %v2459_v23 = vadd.f32 1.0, %v4416_v26  ;;  %4437 = vpow2.f32 %v3797_v43  ;;  %v2013_v5 = vadd.f32 %v5502_v53, %v1815_v50 }
 0x20a   :  { %v6296_v42 = vpop.eup %4419  ;;  %4439 = vrcp.f32 %v2512_v16  ;;  %v6300_v9 = vsel %vm3053_vm15, %v3052_v37, %v3047_v60  ;;  %v2515_v38 = vadd.f32 1.0, %v4418_v4  ;;  %1913 = vadd.xlane.f32.xlu0 %v1912_v0  ;;  %v3369_v59 = vrot.slane %v6282_v3, %v6794_v1 }
 0x20b   :  { %v4422_v20 = vpop.eup %4421  ;;  %4441 = vrcp.f32 %v2520_v47  ;;  %v3861_v8 = vmul.f32 -1.442695, %v2013_v5  ;;  %1916 = vadd.xlane.f32.xlu1 %v1915_v12  ;;  %v1608_v28 = vpop.xlane.xlu0 %1607  ;;  %v3790_v41 = vmul.f32 -1.442695, %v1942_v48  ;;  %v3062_v12 = vrot.slane %v6155_v61, %v5567_v31 }
 0x20c   :  { %v4424_v52 = vpop.eup %4423  ;;  %v3364_v32 = vrot.slane %v4422_v20, %v5970_v6  ;;  %4443 = vrcp.f32 %v2459_v23  ;;  %v1812_v49 = vpop.xlane.xlu1 %1811  ;;  %v1944_v55 = vadd.f32 %v5502_v53, %v1608_v28  ;;  %v3378_v23 = vrot.slane %v6160_v19, %v5567_v31 }
 0x20d   :  { %v4426_v21 = vpop.eup %4425  ;;  %4445 = vpow2.f32 %v3788_v57  ;;  %v2012_v10 = vadd.f32 %v5502_v53, %v1812_v49  ;;  %v2523_v33 = vadd.f32 1.0, %v4424_v52 }
 0x20e   :  { %v6307_v44 = vpop.eup %4427  ;;  %v2450_v40 = vadd.f32 1.0, %v4426_v21  ;;  %4447 = vpow2.f32 %v3861_v8  ;;  %v3365_v39 = vsel %vm3046_vm14, %v3364_v32, %v3360_v18  ;;  %v3792_v26 = vmul.f32 -1.442695, %v1944_v55 }
 0x20f   :  { %v4430_v3 = vpop.eup %4429  ;;  %4449 = vrcp.f32 %v2515_v38  ;;  %v3860_v29 = vmul.f32 -1.442695, %v2012_v10  ;;  %v1614_v27 = vpop.xlane.xlu0 %1613  ;;  %v6314_v47 = vsel %vm3053_vm15, %v3369_v59, %v3365_v39  ;;  %v3072_v10 = vrot.slane %v6205_v34, %v6775_v63 }
 0x210   :  { %v4432_v30 = vpop.eup %4431  ;;  %v3058_v0 = vrot.slane %v4430_v3, %v5583_v58  ;;  %4451 = vrcp.f32 %v2450_v40  ;;  %v1629_v25 = vpop.xlane.xlu1 %1628  ;;  %v1946_v37 = vadd.f32 %v5502_v53, %v1614_v27  ;;  %v3398_v27 = vrot.slane %v6230_v45, %v6779_v24 }
 0x211   :  { %v4434_v43 = vpop.eup %4433  ;;  %4453 = vpow2.f32 %v3790_v41  ;;  %v1951_v18 = vadd.f32 %v5502_v53, %v1629_v25  ;;  %v2522_v61 = vadd.f32 1.0, %v4432_v30  ;;  %v3082_v25 = vrot.slane %v6221_v56, %v6779_v24 }
 0x212   :  { %v6318_v16 = vpop.eup %4435  ;;  %v3063_v57 = vsel %vm2955_vm1, %v3062_v12, %v3058_v0  ;;  %4455 = vrcp.f32 %v2523_v33  ;;  %v2514_v50 = vadd.f32 1.0, %v4434_v43  ;;  %v3794_v5 = vmul.f32 -1.442695, %v1946_v37 }
 0x213   :  { %v4438_v35 = vpop.eup %4437  ;;  %4457 = vpow2.f32 %v3860_v29  ;;  %v3799_v4 = vmul.f32 -1.442695, %v1951_v18  ;;  %v1620_v20 = vpop.xlane.xlu0 %1619  ;;  %v3393_v34 = vrot.slane %v6254_v46, %v6778_v13 }
 0x214   :  { %v4440_v60 = vpop.eup %4439  ;;  %4459 = vrcp.f32 %v2514_v50  ;;  %v1818_v48 = vpop.xlane.xlu1 %1817  ;;  %v1948_v59 = vadd.f32 %v5502_v53, %v1620_v20  ;;  %v2461_v19 = vadd.f32 1.0, %v4438_v35  ;;  %v3408_v50 = vrot.slane %v6279_v2, %v6783_v62 }
 0x215   :  { %v6323_v38 = vpop.eup %4441  ;;  %v3374_v8 = vrot.slane %v4440_v60, %v5583_v58  ;;  %4461 = vpow2.f32 %v3792_v26  ;;  %v2014_v52 = vadd.f32 %v5502_v53, %v1818_v48  ;;  %v3092_v26 = vrot.slane %v6269_v51, %v6783_v62 }
 0x216   :  { %v6328_v32 = vpop.eup %4443  ;;  %4463 = vrcp.f32 %v2522_v61  ;;  %v3796_v33 = vmul.f32 -1.442695, %v1948_v59 }
 0x217   :  { %v4446_v49 = vpop.eup %4445  ;;  %v3379_v28 = vsel %vm2955_vm1, %v3378_v23, %v3374_v8  ;;  %4465 = vpow2.f32 %v3799_v4  ;;  %v3862_v21 = vmul.f32 -1.442695, %v2014_v52  ;;  %v1821_v39 = vpop.xlane.xlu0 %1820  ;;  %v3403_v23 = vrot.slane %v6296_v42, %v6784_v7 }
 0x218   :  { %v4448_v41 = vpop.eup %4447  ;;  %v2452_v55 = vadd.f32 1.0, %v4446_v49  ;;  %4467 = vpow2.f32 %v3794_v5  ;;  %v1635_v40 = vpop.xlane.xlu1 %1634  ;;  %v2015_v12 = vadd.f32 %v5502_v53, %v1821_v39  ;;  %v3102_v8 = vrot.slane %v6307_v44, %v6787_v14 }
 0x219   :  { %v4450_v3 = vpop.eup %4449  ;;  %v2525_v29 = vadd.f32 1.0, %v4448_v41  ;;  %4469 = vpow2.f32 %v3862_v21  ;;  %v1953_v30 = vadd.f32 %v5502_v53, %v1635_v40 }
 0x21a   :  { %v4452_v0 = vpop.eup %4451  ;;  %4471 = vrcp.f32 %v2452_v55  ;;  %v3863_v45 = vmul.f32 -1.442695, %v2015_v12  ;;  %v3388_v49 = vrot.slane %v4450_v3, %v6775_v63 }
 0x21b   :  { %v4454_v43 = vpop.eup %4453  ;;  %v3067_v18 = vrot.slane %v4452_v0, %v5625_v36  ;;  %4473 = vrcp.f32 %v2461_v19  ;;  %v3801_v37 = vmul.f32 -1.442695, %v1953_v30  ;;  %v1626_v60 = vpop.xlane.xlu0 %1625 }
 0x21c   :  { %v6344_v61 = vpop.eup %4455  ;;  %v2454_v35 = vadd.f32 1.0, %v4454_v43  ;;  %4475 = vpow2.f32 %v3796_v33  ;;  %v1824_v4 = vpop.xlane.xlu1 %1823  ;;  %v1950_v52 = vadd.f32 %v5502_v53, %v1626_v60 }
 0x21d   :  { %v4458_v46 = vpop.eup %4457  ;;  %v3068_v5 = vsel %vm2962_vm2, %v3067_v18, %v3063_v57  ;;  %4477 = vrcp.f32 %v2525_v29  ;;  %v2016_v48 = vadd.f32 %v5502_v53, %v1824_v4 }
 0x21e   :  { %v4460_v20 = vpop.eup %4459  ;;  %v3073_v2 = vsel %vm2969_vm3, %v3072_v10, %v3068_v5  ;;  %4479 = vrcp.f32 %v2454_v35  ;;  %v2524_v21 = vadd.f32 1.0, %v4458_v46  ;;  %v3798_v55 = vmul.f32 -1.442695, %v1950_v52 }
 0x21f   :  { %v4462_v59 = vpop.eup %4461  ;;  %v3383_v19 = vrot.slane %v4460_v20, %v5625_v36  ;;  %4481 = vpow2.f32 %v3801_v37  ;;  %v3864_v42 = vmul.f32 -1.442695, %v2016_v48  ;;  %v1827_v40 = vpop.xlane.xlu0 %1826  ;;  %v3418_v10 = vrot.slane %v6318_v16, %v6787_v14 }
 0x220   :  { %v6358_v57 = vpop.eup %4463  ;;  %v2456_v41 = vadd.f32 1.0, %v4462_v59  ;;  %4483 = vpow2.f32 %v3863_v45  ;;  %v1641_v33 = vpop.xlane.xlu1 %1640  ;;  %v2017_v43 = vadd.f32 %v5502_v53, %v1827_v40  ;;  %v3413_v37 = vrot.slane %v6323_v38, %v5804_v15 }
 0x221   :  { %v4466_v39 = vpop.eup %4465  ;;  %v3384_v29 = vsel %vm2962_vm2, %v3383_v19, %v3379_v28  ;;  %4485 = vpow2.f32 %v3864_v42  ;;  %v1955_v3 = vadd.f32 %v5502_v53, %v1641_v33  ;;  %v3112_v33 = vrot.slane %v6328_v32, %v6790_v11 }
 0x222   :  { %v4468_v30 = vpop.eup %4467  ;;  %v3389_v12 = vsel %vm2969_vm3, %v3388_v49, %v3384_v29  ;;  %4487 = vrcp.f32 %v2456_v41  ;;  %v2463_v0 = vadd.f32 1.0, %v4466_v39  ;;  %v3865_v46 = vmul.f32 -1.442695, %v2017_v43 }
 0x223   :  { %v4470_v18 = vpop.eup %4469  ;;  %v3394_v35 = vsel %vm2976_vm4, %v3393_v34, %v3389_v12  ;;  %v2458_v45 = vadd.f32 1.0, %v4468_v30  ;;  %4489 = vpow2.f32 %v3798_v55  ;;  %v1632_v48 = vpop.xlane.xlu0 %1631  ;;  %v3803_v49 = vmul.f32 -1.442695, %v1955_v3 }
 0x224   :  { %v4472_v4 = vpop.eup %4471  ;;  %v3399_v28 = vsel %vm2983_vm5, %v3398_v27, %v3394_v35  ;;  %4491 = vrcp.f32 %v2524_v21  ;;  %v2526_v60 = vadd.f32 1.0, %v4470_v18  ;;  %v1830_v5 = vpop.xlane.xlu1 %1829  ;;  %v1952_v19 = vadd.f32 %v5502_v53, %v1632_v48 }
 0x225   :  { %v6370_v20 = vpop.eup %4473  ;;  %v3404_v52 = vsel %vm2990_vm6, %v3403_v23, %v3399_v28  ;;  %v3077_v59 = vrot.slane %v4472_v4, %v6778_v13  ;;  %4493 = vrcp.f32 %v2458_v45  ;;  %v2018_v38 = vadd.f32 %v5502_v53, %v1830_v5 }
 0x226   :  { %v4476_v34 = vpop.eup %4475  ;;  %4495 = vrcp.f32 %v2463_v0  ;;  %v3409_v27 = vsel %vm2997_vm7, %v3408_v50, %v3404_v52  ;;  %v3800_v39 = vmul.f32 -1.442695, %v1952_v19  ;;  %v3428_v32 = vrot.slane %v6344_v61, %v6790_v11 }
 0x227   :  { %v6377_v42 = vpop.eup %4477  ;;  %v3078_v21 = vsel %vm2976_vm4, %v3077_v59, %v3073_v2  ;;  %4497 = vrcp.f32 %v2526_v60  ;;  %v2460_v41 = vadd.f32 1.0, %v4476_v34  ;;  %v3866_v55 = vmul.f32 -1.442695, %v2018_v38  ;;  %v1833_v50 = vpop.xlane.xlu0 %1832 }
 0x228   :  { %v4480_v23 = vpop.eup %4479  ;;  %v3083_v40 = vsel %vm2983_vm5, %v3082_v25, %v3078_v21  ;;  %4499 = vpow2.f32 %v3865_v46  ;;  %v1647_v29 = vpop.xlane.xlu1 %1646  ;;  %v2019_v12 = vadd.f32 %v5502_v53, %v1833_v50  ;;  %v3423_v56 = vrot.slane %v6358_v57, %v5858_v17 }
 0x229   :  { %v4482_v3 = vpop.eup %4481  ;;  %v3087_v30 = vrot.slane %v4480_v23, %v6784_v7  ;;  %4501 = vrcp.f32 %v2460_v41  ;;  %v1957_v2 = vadd.f32 %v5502_v53, %v1647_v29  ;;  %v3414_v25 = vsel %vm3004_vm8, %v3413_v37, %v3409_v27 }
 0x22a   :  { %v4484_v0 = vpop.eup %4483  ;;  %4503 = vpow2.f32 %v3803_v49  ;;  %v3867_v61 = vmul.f32 -1.442695, %v2019_v12  ;;  %v3122_v38 = vrot.slane %v6370_v20, %v6793_v54  ;;  %v2465_v19 = vadd.f32 1.0, %v4482_v3 }
 0x22b   :  { %v4486_v43 = vpop.eup %4485  ;;  %v3088_v18 = vsel %vm2990_vm6, %v3087_v30, %v3083_v40  ;;  %v2527_v35 = vadd.f32 1.0, %v4484_v0  ;;  %4505 = vpow2.f32 %v3866_v55  ;;  %v3805_v45 = vmul.f32 -1.442695, %v1957_v2  ;;  %v1638_v57 = vpop.xlane.xlu0 %1637 }
 0x22c   :  { %v4488_v4 = vpop.eup %4487  ;;  %v3093_v28 = vsel %vm2997_vm7, %v3092_v26, %v3088_v18  ;;  %v2528_v60 = vadd.f32 1.0, %v4486_v43  ;;  %4507 = vpow2.f32 %v3800_v39  ;;  %v1653_v46 = vpop.xlane.xlu1 %1652  ;;  %v1954_v52 = vadd.f32 %v5502_v53, %v1638_v57 }
 0x22d   :  { %v4490_v5 = vpop.eup %4489  ;;  %v3097_v37 = vrot.slane %v4488_v4, %v5804_v15  ;;  %4509 = vrcp.f32 %v2527_v35  ;;  %v1959_v48 = vadd.f32 %v5502_v53, %v1653_v46  ;;  %v3419_v26 = vsel %vm3011_vm9, %v3418_v10, %v3414_v25 }
 0x22e   :  { %v4492_v59 = vpop.eup %4491  ;;  %4511 = vrcp.f32 %v2528_v60  ;;  %v2462_v51 = vadd.f32 1.0, %v4490_v5  ;;  %v3802_v55 = vmul.f32 -1.442695, %v1954_v52  ;;  %v3438_v40 = vrot.slane %v6377_v42, %v6793_v54 }
 0x22f   :  { %v4494_v34 = vpop.eup %4493  ;;  %v3098_v49 = vsel %vm3004_vm8, %v3097_v37, %v3093_v28  ;;  %4513 = vpow2.f32 %v3805_v45  ;;  %v3807_v27 = vmul.f32 -1.442695, %v1959_v48  ;;  %v1839_v23 = vpop.xlane.xlu0 %1838  ;;  %v3433_v44 = vrot.slane %v4492_v59, %v5902_v22 }
 0x230   :  { %v6409_v21 = vpop.eup %4495  ;;  %v3103_v20 = vsel %vm3011_vm9, %v3102_v8, %v3098_v49  ;;  %v3107_v41 = vrot.slane %v4494_v34, %v5858_v17  ;;  %4515 = vrcp.f32 %v2462_v51  ;;  %v1659_v16 = vpop.xlane.xlu1 %1658  ;;  %v2021_v29 = vadd.f32 %v5502_v53, %v1839_v23 }
 0x231   :  { %v4498_v10 = vpop.eup %4497  ;;  %4517 = vpow2.f32 %v3867_v61  ;;  %v1961_v39 = vadd.f32 %v5502_v53, %v1659_v16  ;;  %v3424_v3 = vsel %vm3018_vm10, %v3423_v56, %v3419_v26  ;;  %v3132_v23 = vrot.slane %v6409_v21, %v6794_v1 }
 0x232   :  { %v4500_v50 = vpop.eup %4499  ;;  %v3108_v8 = vsel %vm3018_vm10, %v3107_v41, %v3103_v20  ;;  %4519 = vpow2.f32 %v3807_v27  ;;  %v3869_v43 = vmul.f32 -1.442695, %v2021_v29  ;;  %v3429_v45 = vsel %vm3025_vm11, %v3428_v32, %v3424_v3 }
 0x233   :  { %v4502_v30 = vpop.eup %4501  ;;  %v3113_v2 = vsel %vm3025_vm11, %v3112_v33, %v3108_v8  ;;  %v2529_v12 = vadd.f32 1.0, %v4500_v50  ;;  %4521 = vpow2.f32 %v3802_v55  ;;  %v3809_v0 = vmul.f32 -1.442695, %v1961_v39  ;;  %v1644_v35 = vpop.xlane.xlu0 %1643 }
 0x234   :  { %v4504_v42 = vpop.eup %4503  ;;  %v3117_v25 = vrot.slane %v4502_v30, %v5902_v22  ;;  %4523 = vrcp.f32 %v2465_v19  ;;  %v1665_v18 = vpop.xlane.xlu1 %1664  ;;  %v3443_v28 = vrot.slane %v4498_v10, %v5970_v6  ;;  %v1956_v33 = vadd.f32 %v5502_v53, %v1644_v35 }
 0x235   :  { %v4506_v4 = vpop.eup %4505  ;;  %4525 = vrcp.f32 %v2529_v12  ;;  %v1963_v56 = vadd.f32 %v5502_v53, %v1665_v18  ;;  %v3434_v57 = vsel %vm3032_vm12, %v3433_v44, %v3429_v45  ;;  %v2467_v48 = vadd.f32 1.0, %v4504_v42 }
 0x236   :  { %v4508_v60 = vpop.eup %4507  ;;  %v3118_v61 = vsel %vm3032_vm12, %v3117_v25, %v3113_v2  ;;  %v2530_v46 = vadd.f32 1.0, %v4506_v4  ;;  %4527 = vpow2.f32 %v3809_v0  ;;  %v3804_v59 = vmul.f32 -1.442695, %v1956_v33 }
 0x237   :  { %v4510_v5 = vpop.eup %4509  ;;  %v3123_v37 = vsel %vm3039_vm13, %v3122_v38, %v3118_v61  ;;  %v2464_v32 = vadd.f32 1.0, %v4508_v60  ;;  %4529 = vpow2.f32 %v3869_v43  ;;  %v1836_v26 = vpop.xlane.xlu0 %1835  ;;  %v3439_v34 = vsel %vm3039_vm13, %v3438_v40, %v3434_v57 }
 0x238   :  { %v4512_v52 = vpop.eup %4511  ;;  %4531 = vrcp.f32 %v2530_v46  ;;  %v1671_v51 = vpop.xlane.xlu1 %1670  ;;  %v3448_v49 = vrot.slane %v4510_v5, %v6794_v1  ;;  %v3811_v27 = vmul.f32 -1.442695, %v1963_v56  ;;  %v2020_v41 = vadd.f32 %v5502_v53, %v1836_v26 }
 0x239   :  { %v4514_v19 = vpop.eup %4513  ;;  %4533 = vrcp.f32 %v2464_v32  ;;  %v1965_v20 = vadd.f32 %v5502_v53, %v1671_v51  ;;  %v3444_v55 = vsel %vm3046_vm14, %v3443_v28, %v3439_v34  ;;  %v3453_v28 = vrot.slane %v4512_v52, %v5583_v58 }
 0x23a   :  { %v4516_v38 = vpop.eup %4515  ;;  %4535 = vpow2.f32 %v3804_v59  ;;  %v2469_v29 = vadd.f32 1.0, %v4514_v19  ;;  %v6441_v3 = vsel %vm3053_vm15, %v3448_v49, %v3444_v55  ;;  %v3868_v12 = vmul.f32 -1.442695, %v2020_v41 }
 0x23b   :  { %v4518_v16 = vpop.eup %4517  ;;  %v3127_v10 = vrot.slane %v4516_v38, %v5970_v6  ;;  %v3813_v40 = vmul.f32 -1.442695, %v1965_v20  ;;  %4537 = vrcp.f32 %v2467_v48  ;;  %v1845_v8 = vpop.xlane.xlu0 %1844 }
 0x23c   :  { %v4520_v39 = vpop.eup %4519  ;;  %v2531_v50 = vadd.f32 1.0, %v4518_v16  ;;  %v1677_v44 = vpop.xlane.xlu1 %1676  ;;  %4539 = vpow2.f32 %v3811_v27  ;;  %v2023_v25 = vadd.f32 %v5502_v53, %v1845_v8 }
 0x23d   :  { %v4522_v30 = vpop.eup %4521  ;;  %v3128_v2 = vsel %vm3046_vm14, %v3127_v10, %v3123_v37  ;;  %v1967_v21 = vadd.f32 %v5502_v53, %v1677_v44  ;;  %v2471_v35 = vadd.f32 1.0, %v4520_v39 }
 0x23e   :  { %v4524_v0 = vpop.eup %4523  ;;  %4541 = vrcp.f32 %v2531_v50  ;;  %v2466_v42 = vadd.f32 1.0, %v4522_v30  ;;  %v3133_v43 = vsel %vm3053_vm15, %v3132_v23, %v3128_v2  ;;  %v3871_v57 = vmul.f32 -1.442695, %v2023_v25 }
 0x23f   :  { %v4526_v18 = vpop.eup %4525  ;;  %4543 = vpow2.f32 %v3813_v40  ;;  %v6449_v45 = vsel %vm3608_vm0, %v3133_v43, %v6300_v9  ;;  %v3815_v33 = vmul.f32 -1.442695, %v1967_v21  ;;  %v1650_v61 = vpop.xlane.xlu0 %1649  ;;  %v3141_v26 = vrot.slane %v4524_v0, %v5567_v31 }
 0x240   :  { %v4528_v4 = vpop.eup %4527  ;;  %v3457_v56 = vrot.slane %v4526_v18, %v5567_v31  ;;  %4545 = vrcp.f32 %v2466_v42  ;;  %v1869_v60 = vpop.xlane.xlu1 %1868  ;;  %v1958_v37 = vadd.f32 %v5502_v53, %v1650_v61  ;;  %vm3610_vm0 = vcmask 1042434  }
 0x241   :  { %v4530_v46 = vpop.eup %4529  ;;  %4547 = vpow2.f32 %v3868_v12  ;;  %v2031_v5 = vadd.f32 %v5502_v53, %v1869_v60  ;;  %v2473_v32 = vadd.f32 1.0, %v4528_v4 }
 0x242   :  { %v4532_v48 = vpop.eup %4531  ;;  %v3458_v9 = vsel %vm2955_vm1, %v3457_v56, %v3453_v28  ;;  %4549 = vrcp.f32 %v2469_v29  ;;  %v2533_v49 = vadd.f32 1.0, %v4530_v46  ;;  %v3806_v38 = vmul.f32 -1.442695, %v1958_v37 }
 0x243   :  { %v4534_v59 = vpop.eup %4533  ;;  %v3462_v52 = vrot.slane %v4532_v48, %v5625_v36  ;;  %4551 = vrcp.f32 %v2471_v35  ;;  %v3879_v51 = vmul.f32 -1.442695, %v2031_v5  ;;  %v1842_v27 = vpop.xlane.xlu0 %1841 }
 0x244   :  { %v3137_v34 = vrot.slane %v4534_v59, %v5583_v58  ;;  %4553 = vpow2.f32 %v3815_v33  ;;  %v1866_v19 = vpop.xlane.xlu1 %1865  ;;  %v4536_v20 = vpop.eup %4535  ;;  %v2022_v40 = vadd.f32 %v5502_v53, %v1842_v27 }
 0x245   :  { %v3463_v41 = vsel %vm2962_vm2, %v3462_v52, %v3458_v9  ;;  %4555 = vpow2.f32 %v3871_v57  ;;  %v2030_v55 = vadd.f32 %v5502_v53, %v1866_v19  ;;  %v4538_v16 = vpop.eup %4537  ;;  %v2468_v10 = vadd.f32 1.0, %v4536_v20 }
 0x246   :  { %v3142_v23 = vsel %vm2955_vm1, %v3141_v26, %v3137_v34  ;;  %4557 = vrcp.f32 %v2473_v32  ;;  %v4540_v39 = vpop.eup %4539  ;;  %v3870_v44 = vmul.f32 -1.442695, %v2022_v40  ;;  %v3151_v56 = vrot.slane %v4538_v16, %v6775_v63 }
 0x247   :  { %4559 = vpow2.f32 %v3879_v51  ;;  %v3878_v29 = vmul.f32 -1.442695, %v2030_v55  ;;  %v1851_v30 = vpop.xlane.xlu0 %1850  ;;  %v2475_v25 = vadd.f32 1.0, %v4540_v39 }
 0x248   :  { %v4542_v50 = vpop.eup %4541  ;;  %4561 = vrcp.f32 %v2468_v10  ;;  %v1683_v8 = vpop.xlane.xlu1 %1682  ;;  %v2025_v0 = vadd.f32 %v5502_v53, %v1851_v30 }
 0x249   :  { %v4544_v2 = vpop.eup %4543  ;;  %v3467_v12 = vrot.slane %v4542_v50, %v6775_v63  ;;  %4563 = vpow2.f32 %v3806_v38  ;;  %v1969_v21 = vadd.f32 %v5502_v53, %v1683_v8 }
 0x24a   :  { %v4546_v42 = vpop.eup %4545  ;;  %4565 = vrcp.f32 %v2533_v49  ;;  %v2477_v33 = vadd.f32 1.0, %v4544_v2  ;;  %v3873_v37 = vmul.f32 -1.442695, %v2025_v0 }
 0x24b   :  { %v4548_v43 = vpop.eup %4547  ;;  %v6467_v18 = vsel %vm2969_vm3, %v3467_v12, %v3463_v41  ;;  %v3146_v35 = vrot.slane %v4546_v42, %v5625_v36  ;;  %4567 = vpow2.f32 %v3878_v29  ;;  %v3817_v4 = vmul.f32 -1.442695, %v1969_v21  ;;  %v1656_v46 = vpop.xlane.xlu0 %1655 }
 0x24c   :  { %v4550_v28 = vpop.eup %4549  ;;  %v2532_v60 = vadd.f32 1.0, %v4548_v43  ;;  %4569 = vpow2.f32 %v3870_v44  ;;  %v1875_v61 = vpop.xlane.xlu1 %1874  ;;  %v1960_v59 = vadd.f32 %v5502_v53, %v1656_v46 }
 0x24d   :  { %v6471_v57 = vpop.eup %4551  ;;  %v3147_v5 = vsel %vm2962_vm2, %v3146_v35, %v3142_v23  ;;  %4571 = vpow2.f32 %v3817_v4  ;;  %v2033_v48 = vadd.f32 %v5502_v53, %v1875_v61  ;;  %v3161_v29 = vrot.slane %v4550_v28, %v6779_v24 }
 0x24e   :  { %v4554_v9 = vpop.eup %4553  ;;  %v3152_v32 = vsel %vm2969_vm3, %v3151_v56, %v3147_v5  ;;  %4573 = vrcp.f32 %v2532_v60  ;;  %v3808_v49 = vmul.f32 -1.442695, %v1960_v59 }
 0x24f   :  { %v4556_v52 = vpop.eup %4555  ;;  %4575 = vrcp.f32 %v2475_v25  ;;  %v3881_v51 = vmul.f32 -1.442695, %v2033_v48  ;;  %v1848_v27 = vpop.xlane.xlu0 %1847  ;;  %v2479_v50 = vadd.f32 1.0, %v4554_v9 }
 0x250   :  { %v6477_v26 = vpop.eup %4557  ;;  %4577 = vrcp.f32 %v2477_v33  ;;  %v2535_v34 = vadd.f32 1.0, %v4556_v52  ;;  %v1689_v19 = vpop.xlane.xlu1 %1688  ;;  %v2024_v38 = vadd.f32 %v5502_v53, %v1848_v27 }
 0x251   :  { %v4560_v20 = vpop.eup %4559  ;;  %4579 = vpow2.f32 %v3873_v37  ;;  %v1971_v41 = vadd.f32 %v5502_v53, %v1689_v19 }
 0x252   :  { %v4562_v55 = vpop.eup %4561  ;;  %4581 = vpow2.f32 %v3881_v51  ;;  %v3872_v40 = vmul.f32 -1.442695, %v2024_v38  ;;  %v2543_v42 = vadd.f32 1.0, %v4560_v20 }
 0x253   :  { %v4564_v16 = vpop.eup %4563  ;;  %v3156_v23 = vrot.slane %v4562_v55, %v6778_v13  ;;  %4583 = vrcp.f32 %v2535_v34  ;;  %v3819_v10 = vmul.f32 -1.442695, %v1971_v41  ;;  %v1857_v30 = vpop.xlane.xlu0 %1856 }
 0x254   :  { %v4566_v39 = vpop.eup %4565  ;;  %v2470_v44 = vadd.f32 1.0, %v4564_v16  ;;  %4585 = vpow2.f32 %v3808_v49  ;;  %v1881_v8 = vpop.xlane.xlu1 %1880  ;;  %v2027_v43 = vadd.f32 %v5502_v53, %v1857_v30 }
 0x255   :  { %v4568_v2 = vpop.eup %4567  ;;  %v3157_v12 = vsel %vm2976_vm4, %v3156_v23, %v3152_v32  ;;  %4587 = vpow2.f32 %v3819_v10  ;;  %v2035_v21 = vadd.f32 %v5502_v53, %v1881_v8  ;;  %v3477_v59 = vrot.slane %v4566_v39, %v6779_v24 }
 0x256   :  { %v4570_v0 = vpop.eup %4569  ;;  %v3162_v25 = vsel %vm2983_vm5, %v3161_v29, %v3157_v12  ;;  %4589 = vrcp.f32 %v2470_v44  ;;  %v2542_v33 = vadd.f32 1.0, %v4568_v2  ;;  %v3875_v52 = vmul.f32 -1.442695, %v2027_v43 }
 0x257   :  { %v4572_v35 = vpop.eup %4571  ;;  %v2534_v4 = vadd.f32 1.0, %v4570_v0  ;;  %4591 = vpow2.f32 %v3872_v40  ;;  %v3883_v28 = vmul.f32 -1.442695, %v2035_v21  ;;  %v1662_v46 = vpop.xlane.xlu0 %1661  ;;  %v3171_v43 = vrot.slane %v6471_v57, %v6783_v62 }
 0x258   :  { %v4574_v56 = vpop.eup %4573  ;;  %4593 = vrcp.f32 %v2479_v50  ;;  %v2481_v60 = vadd.f32 1.0, %v4572_v35  ;;  %v1878_v61 = vpop.xlane.xlu1 %1877  ;;  %v1962_v9 = vadd.f32 %v5502_v53, %v1662_v46 }
 0x259   :  { %v6487_v5 = vpop.eup %4575  ;;  %v3472_v37 = vrot.slane %v4574_v56, %v6778_v13  ;;  %4595 = vrcp.f32 %v2534_v4  ;;  %v2034_v48 = vadd.f32 %v5502_v53, %v1878_v61 }
 0x25a   :  { %v6492_v32 = vpop.eup %4577  ;;  %4597 = vrcp.f32 %v2543_v42  ;;  %v3810_v20 = vmul.f32 -1.442695, %v1962_v9 }
 0x25b   :  { %v4580_v51 = vpop.eup %4579  ;;  %v3473_v34 = vsel %vm2976_vm4, %v3472_v37, %v6467_v18  ;;  %4599 = vpow2.f32 %v3883_v28  ;;  %v3882_v49 = vmul.f32 -1.442695, %v2034_v48  ;;  %v1854_v38 = vpop.xlane.xlu0 %1853 }
 0x25c   :  { %v4582_v19 = vpop.eup %4581  ;;  %4601 = vrcp.f32 %v2542_v33  ;;  %v3478_v27 = vsel %vm2983_vm5, %v3477_v59, %v3473_v34  ;;  %v1695_v41 = vpop.xlane.xlu1 %1694  ;;  %v2026_v23 = vadd.f32 %v5502_v53, %v1854_v38  ;;  %v2537_v40 = vadd.f32 1.0, %v4580_v51 }
 0x25d   :  { %v4584_v55 = vpop.eup %4583  ;;  %4603 = vrcp.f32 %v2481_v60  ;;  %v1973_v16 = vadd.f32 %v5502_v53, %v1695_v41  ;;  %v2545_v35 = vadd.f32 1.0, %v4582_v19 }
 0x25e   :  { %v4586_v10 = vpop.eup %4585  ;;  %4605 = vpow2.f32 %v3875_v52  ;;  %v3874_v44 = vmul.f32 -1.442695, %v2026_v23  ;;  %v3487_v56 = vrot.slane %v4584_v55, %v6783_v62 }
 0x25f   :  { %v4588_v39 = vpop.eup %4587  ;;  %v2472_v18 = vadd.f32 1.0, %v4586_v10  ;;  %4607 = vpow2.f32 %v3882_v49  ;;  %v3821_v29 = vmul.f32 -1.442695, %v1973_v16  ;;  %v1863_v30 = vpop.xlane.xlu0 %1862 }
 0x260   :  { %v4590_v50 = vpop.eup %4589  ;;  %4609 = vpow2.f32 %v3810_v20  ;;  %v1887_v8 = vpop.xlane.xlu1 %1886  ;;  %v2029_v0 = vadd.f32 %v5502_v53, %v1863_v30  ;;  %v2483_v48 = vadd.f32 1.0, %v4588_v39 }
 0x261   :  { %v4592_v2 = vpop.eup %4591  ;;  %v3166_v12 = vrot.slane %v4590_v50, %v6784_v7  ;;  %4611 = vrcp.f32 %v2472_v18  ;;  %v2037_v21 = vadd.f32 %v5502_v53, %v1887_v8 }
 0x262   :  { %v6503_v42 = vpop.eup %4593  ;;  %4613 = vrcp.f32 %v2537_v40  ;;  %v2536_v4 = vadd.f32 1.0, %v4592_v2  ;;  %v3877_v52 = vmul.f32 -1.442695, %v2029_v0 }
 0x263   :  { %v4596_v28 = vpop.eup %4595  ;;  %v3167_v33 = vsel %vm2990_vm6, %v3166_v12, %v3162_v25  ;;  %4615 = vpow2.f32 %v3821_v29  ;;  %v3885_v60 = vmul.f32 -1.442695, %v2037_v21  ;;  %v1668_v57 = vpop.xlane.xlu0 %1667 }
 0x264   :  { %v6509_v61 = vpop.eup %4597  ;;  %v3482_v46 = vrot.slane %v4596_v28, %v6784_v7  ;;  %v3172_v37 = vsel %vm2997_vm7, %v3171_v43, %v3167_v33  ;;  %4617 = vrcp.f32 %v2536_v4  ;;  %v1884_v9 = vpop.xlane.xlu1 %1883  ;;  %v1964_v34 = vadd.f32 %v5502_v53, %v1668_v57 }
 0x265   :  { %v4600_v59 = vpop.eup %4599  ;;  %4619 = vpow2.f32 %v3874_v44  ;;  %v2036_v51 = vadd.f32 %v5502_v53, %v1884_v9 }
 0x266   :  { %v6515_v25 = vpop.eup %4601  ;;  %v3483_v49 = vsel %vm2990_vm6, %v3482_v46, %v3478_v27  ;;  %v2547_v19 = vadd.f32 1.0, %v4600_v59  ;;  %4621 = vpow2.f32 %v3885_v60  ;;  %v3812_v16 = vmul.f32 -1.442695, %v1964_v34 }
 0x267   :  { %v6518_v20 = vpop.eup %4603  ;;  %4623 = vrcp.f32 %v2545_v35  ;;  %v3488_v41 = vsel %vm2997_vm7, %v3487_v56, %v3483_v49  ;;  %v3884_v55 = vmul.f32 -1.442695, %v2036_v51  ;;  %v1860_v10 = vpop.xlane.xlu0 %1859  ;;  %v3181_v35 = vrot.slane %v6477_v26, %v6787_v14 }
 0x268   :  { %v4606_v38 = vpop.eup %4605  ;;  %4625 = vrcp.f32 %v2483_v48  ;;  %v1701_v23 = vpop.xlane.xlu1 %1700  ;;  %v2028_v18 = vadd.f32 %v5502_v53, %v1860_v10 }
 0x269   :  { %v4608_v40 = vpop.eup %4607  ;;  %4627 = vpow2.f32 %v3877_v52  ;;  %v1975_v39 = vadd.f32 %v5502_v53, %v1701_v23  ;;  %v2539_v12 = vadd.f32 1.0, %v4606_v38 }
 0x26a   :  { %v4610_v27 = vpop.eup %4609  ;;  %4629 = vrcp.f32 %v2547_v19  ;;  %v3876_v8 = vmul.f32 -1.442695, %v2028_v18  ;;  %v2546_v60 = vadd.f32 1.0, %v4608_v40 }
 0x26b   :  { %v4612_v29 = vpop.eup %4611  ;;  %v2474_v50 = vadd.f32 1.0, %v4610_v27  ;;  %4631 = vpow2.f32 %v3812_v16  ;;  %v3823_v44 = vmul.f32 -1.442695, %v1975_v39  ;;  %v1674_v0 = vpop.xlane.xlu0 %1673 }
 0x26c   :  { %v4614_v30 = vpop.eup %4613  ;;  %v3176_v2 = vrot.slane %v4612_v29, %v5804_v15  ;;  %4633 = vpow2.f32 %v3884_v55  ;;  %v1893_v21 = vpop.xlane.xlu1 %1892  ;;  %v1966_v28 = vadd.f32 %v5502_v53, %v1674_v0 }
 0x26d   :  { %v4616_v43 = vpop.eup %4615  ;;  %4635 = vrcp.f32 %v2474_v50  ;;  %v2039_v4 = vadd.f32 %v5502_v53, %v1893_v21  ;;  %v3497_v26 = vrot.slane %v4614_v30, %v6787_v14 }
 0x26e   :  { %v4618_v56 = vpop.eup %4617  ;;  %v3177_v33 = vsel %vm3004_vm8, %v3176_v2, %v3172_v37  ;;  %4637 = vpow2.f32 %v3823_v44  ;;  %v2485_v52 = vadd.f32 1.0, %v4616_v43  ;;  %v3814_v38 = vmul.f32 -1.442695, %v1966_v28 }
 0x26f   :  { %v4620_v46 = vpop.eup %4619  ;;  %v3492_v48 = vrot.slane %v4618_v56, %v5804_v15  ;;  %v3182_v9 = vsel %vm3011_vm9, %v3181_v35, %v3177_v33  ;;  %4639 = vpow2.f32 %v3876_v8  ;;  %v3887_v57 = vmul.f32 -1.442695, %v2039_v4  ;;  %v1680_v49 = vpop.xlane.xlu0 %1679 }
 0x270   :  { %v4622_v59 = vpop.eup %4621  ;;  %4641 = vrcp.f32 %v2539_v12  ;;  %v2538_v51 = vadd.f32 1.0, %v4620_v46  ;;  %v1890_v34 = vpop.xlane.xlu1 %1889  ;;  %v1968_v23 = vadd.f32 %v5502_v53, %v1680_v49 }
 0x271   :  { %v6532_v19 = vpop.eup %4623  ;;  %v3493_v37 = vsel %vm3004_vm8, %v3492_v48, %v3488_v41  ;;  %4643 = vpow2.f32 %v3887_v57  ;;  %v2038_v55 = vadd.f32 %v5502_v53, %v1890_v34  ;;  %v2549_v39 = vadd.f32 1.0, %v4622_v59 }
 0x272   :  { %v6536_v16 = vpop.eup %4625  ;;  %4645 = vrcp.f32 %v2538_v51  ;;  %v6540_v10 = vsel %vm3011_vm9, %v3497_v26, %v3493_v37  ;;  %v3816_v44 = vmul.f32 -1.442695, %v1968_v23 }
 0x273   :  { %v4628_v40 = vpop.eup %4627  ;;  %4647 = vrcp.f32 %v2546_v60  ;;  %v3886_v18 = vmul.f32 -1.442695, %v2038_v55  ;;  %v1872_v29 = vpop.xlane.xlu0 %1871  ;;  %v3191_v60 = vrot.slane %v6487_v5, %v6790_v11 }
 0x274   :  { %v6542_v27 = vpop.eup %4629  ;;  %4649 = vrcp.f32 %v2485_v52  ;;  %v1707_v41 = vpop.xlane.xlu1 %1706  ;;  %v2032_v30 = vadd.f32 %v5502_v53, %v1872_v29  ;;  %v2541_v12 = vadd.f32 1.0, %v4628_v40 }
 0x275   :  { %v4632_v50 = vpop.eup %4631  ;;  %4651 = vpow2.f32 %v3814_v38  ;;  %v1977_v8 = vadd.f32 %v5502_v53, %v1707_v41 }
 0x276   :  { %v4634_v2 = vpop.eup %4633  ;;  %v2476_v21 = vadd.f32 1.0, %v4632_v50  ;;  %4653 = vpow2.f32 %v3886_v18  ;;  %v3880_v46 = vmul.f32 -1.442695, %v2032_v30 }
 0x277   :  { %v4636_v0 = vpop.eup %4635  ;;  %4655 = vrcp.f32 %v2549_v39  ;;  %v3825_v43 = vmul.f32 -1.442695, %v1977_v8  ;;  %v1686_v56 = vpop.xlane.xlu0 %1685  ;;  %v2548_v26 = vadd.f32 1.0, %v4634_v2 }
 0x278   :  { %v4638_v35 = vpop.eup %4637  ;;  %v3186_v4 = vrot.slane %v4636_v0, %v5858_v17  ;;  %4657 = vrcp.f32 %v2476_v21  ;;  %v1899_v28 = vpop.xlane.xlu1 %1898  ;;  %v1970_v48 = vadd.f32 %v5502_v53, %v1686_v56 }
 0x279   :  { %v4640_v33 = vpop.eup %4639  ;;  %4659 = vpow2.f32 %v3816_v44  ;;  %v2487_v49 = vadd.f32 1.0, %v4638_v35  ;;  %v2041_v37 = vadd.f32 %v5502_v53, %v1899_v28 }
 0x27a   :  { %v4642_v57 = vpop.eup %4641  ;;  %v3187_v59 = vsel %vm3018_vm10, %v3186_v4, %v3182_v9  ;;  %4661 = vrcp.f32 %v2541_v12  ;;  %v2540_v52 = vadd.f32 1.0, %v4640_v33  ;;  %v3818_v55 = vmul.f32 -1.442695, %v1970_v48 }
 0x27b   :  { %v4644_v51 = vpop.eup %4643  ;;  %v3192_v34 = vsel %vm3025_vm11, %v3191_v60, %v3187_v59  ;;  %4663 = vpow2.f32 %v3825_v43  ;;  %v1692_v40 = vpop.xlane.xlu0 %1691  ;;  %v3507_v44 = vrot.slane %v4642_v57, %v6790_v11  ;;  %v3889_v8 = vmul.f32 -1.442695, %v2041_v37 }
 0x27c   :  { %v4646_v38 = vpop.eup %4645  ;;  %4665 = vrcp.f32 %v2540_v52  ;;  %v2551_v5 = vadd.f32 1.0, %v4644_v51  ;;  %v1896_v23 = vpop.xlane.xlu1 %1895  ;;  %v1972_v41 = vadd.f32 %v5502_v53, %v1692_v40 }
 0x27d   :  { %v6553_v39 = vpop.eup %4647  ;;  %v3502_v9 = vrot.slane %v4646_v38, %v5858_v17  ;;  %4667 = vpow2.f32 %v3880_v46  ;;  %v2040_v18 = vadd.f32 %v5502_v53, %v1896_v23 }
 0x27e   :  { %v6558_v29 = vpop.eup %4649  ;;  %4669 = vrcp.f32 %v2548_v26  ;;  %v3820_v12 = vmul.f32 -1.442695, %v1972_v41 }
 0x27f   :  { %v4652_v50 = vpop.eup %4651  ;;  %4671 = vrcp.f32 %v2487_v49  ;;  %v1698_v0 = vpop.xlane.xlu0 %1697  ;;  %v3503_v43 = vsel %vm3018_vm10, %v3502_v9, %v6540_v10  ;;  %v3888_v4 = vmul.f32 -1.442695, %v2040_v18  ;;  %v3201_v10 = vrot.slane %v6492_v32, %v6793_v54 }
 0x280   :  { %v4654_v30 = vpop.eup %4653  ;;  %v2478_v2 = vadd.f32 1.0, %v4652_v50  ;;  %4673 = vpow2.f32 %v3818_v55  ;;  %v1713_v21 = vpop.xlane.xlu1 %1712  ;;  %v1974_v56 = vadd.f32 %v5502_v53, %v1698_v0  ;;  %v3508_v46 = vsel %vm3025_vm11, %v3507_v44, %v3503_v43 }
 0x281   :  { %v6563_v35 = vpop.eup %4655  ;;  %4675 = vrcp.f32 %v2551_v5  ;;  %v1979_v28 = vadd.f32 %v5502_v53, %v1713_v21  ;;  %v2550_v60 = vadd.f32 1.0, %v4654_v30 }
 0x282   :  { %v4658_v33 = vpop.eup %4657  ;;  %4677 = vrcp.f32 %v2478_v2  ;;  %v3822_v52 = vmul.f32 -1.442695, %v1974_v56 }
 0x283   :  { %v4660_v48 = vpop.eup %4659  ;;  %v3196_v57 = vrot.slane %v4658_v33, %v5902_v22  ;;  %4679 = vpow2.f32 %v3889_v8  ;;  %v3827_v59 = vmul.f32 -1.442695, %v1979_v28  ;;  %v1704_v49 = vpop.xlane.xlu0 %1703 }
 0x284   :  { %v4662_v26 = vpop.eup %4661  ;;  %4681 = vpow2.f32 %v3820_v12  ;;  %v1905_v51 = vpop.xlane.xlu1 %1904  ;;  %v2480_v5 = vadd.f32 1.0, %v4660_v48  ;;  %v1976_v23 = vadd.f32 %v5502_v53, %v1704_v49 }
 0x285   :  { %v4664_v37 = vpop.eup %4663  ;;  %v3197_v38 = vsel %vm3032_vm12, %v3196_v57, %v3192_v34  ;;  %4683 = vpow2.f32 %v3888_v4  ;;  %v2043_v32 = vadd.f32 %v5502_v53, %v1905_v51  ;;  %v3517_v43 = vrot.slane %v4662_v26, %v6793_v54 }
 0x286   :  { %v4666_v55 = vpop.eup %4665  ;;  %4685 = vrcp.f32 %v2550_v60  ;;  %v3202_v40 = vsel %vm3039_vm13, %v3201_v10, %v3197_v38  ;;  %v2489_v50 = vadd.f32 1.0, %v4664_v37  ;;  %v3824_v34 = vmul.f32 -1.442695, %v1976_v23 }
 0x287   :  { %v4668_v9 = vpop.eup %4667  ;;  %v3512_v18 = vrot.slane %v4666_v55, %v5902_v22  ;;  %4687 = vpow2.f32 %v3827_v59  ;;  %v1710_v30 = vpop.xlane.xlu0 %1709  ;;  %v3891_v33 = vmul.f32 -1.442695, %v2043_v32  ;;  %v3527_v55 = vrot.slane %v6509_v61, %v6794_v1 }
 0x288   :  { %v6576_v41 = vpop.eup %4669  ;;  %v2544_v44 = vadd.f32 1.0, %v4668_v9  ;;  %4689 = vpow2.f32 %v3822_v52  ;;  %v1902_v8 = vpop.xlane.xlu1 %1901  ;;  %v1978_v21 = vadd.f32 %v5502_v53, %v1710_v30  ;;  %v3522_v52 = vrot.slane %v6515_v25, %v5970_v6 }
 0x289   :  { %v6578_v2 = vpop.eup %4671  ;;  %4691 = vrcp.f32 %v2480_v5  ;;  %v2042_v12 = vadd.f32 %v5502_v53, %v1902_v8  ;;  %v3513_v4 = vsel %vm3032_vm12, %v3512_v18, %v3508_v46  ;;  %v3211_v25 = vrot.slane %v6503_v42, %v6794_v1 }
 0x28a   :  { %v4674_v0 = vpop.eup %4673  ;;  %4693 = vrcp.f32 %v2544_v44  ;;  %v3826_v48 = vmul.f32 -1.442695, %v1978_v21  ;;  %v3518_v10 = vsel %vm3039_vm13, %v3517_v43, %v3513_v4 }
 0x28b   :  { %v6584_v28 = vpop.eup %4675  ;;  %v2482_v56 = vadd.f32 1.0, %v4674_v0  ;;  %4695 = vpow2.f32 %v3824_v34  ;;  %v1911_v59 = vpop.xlane.xlu0 %1910  ;;  %v3890_v49 = vmul.f32 -1.442695, %v2042_v12  ;;  %v3523_v5 = vsel %vm3046_vm14, %v3522_v52, %v3518_v10 }
 0x28c   :  { %v4678_v60 = vpop.eup %4677  ;;  %4697 = vrcp.f32 %v2489_v50  ;;  %v1719_v57 = vpop.xlane.xlu1 %1718  ;;  %v2045_v37 = vadd.f32 %v5502_v53, %v1911_v59  ;;  %v6601_v30 = vsel %vm3053_vm15, %v3527_v55, %v3523_v5 }
 0x28d   :  { %v4680_v51 = vpop.eup %4679  ;;  %v3206_v26 = vrot.slane %v4678_v60, %v5970_v6  ;;  %v1981_v46 = vadd.f32 %v5502_v53, %v1719_v57  ;;  %4699 = vrcp.f32 %v2482_v56 }
 0x28e   :  { %v4682_v38 = vpop.eup %4681  ;;  %4701 = vpow2.f32 %v3891_v33  ;;  %v2553_v50 = vadd.f32 1.0, %v4680_v51  ;;  %v3893_v12 = vmul.f32 -1.442695, %v2045_v37 }
 0x28f   :  { %v4684_v23 = vpop.eup %4683  ;;  %v2484_v9 = vadd.f32 1.0, %v4682_v38  ;;  %v3829_v18 = vmul.f32 -1.442695, %v1981_v46  ;;  %4703 = vpow2.f32 %v3826_v48  ;;  %v1716_v34 = vpop.xlane.xlu0 %1715  ;;  %v3207_v8 = vsel %vm3046_vm14, %v3206_v26, %v3202_v40 }
 0x290   :  { %v6597_v32 = vpop.eup %4685  ;;  %v1908_v44 = vpop.xlane.xlu1 %1907  ;;  %4705 = vpow2.f32 %v3890_v49  ;;  %v1980_v42 = vadd.f32 %v5502_v53, %v1716_v34  ;;  %v3212_v43 = vsel %vm3053_vm15, %v3211_v25, %v3207_v8  ;;  %v2552_v5 = vadd.f32 1.0, %v4684_v23 }
 0x291   :  { %v4688_v61 = vpop.eup %4687  ;;  %v2044_v21 = vadd.f32 %v5502_v53, %v1908_v44  ;;  %4707 = vrcp.f32 %v2484_v9  ;;  %v6608_v57 = vsel %vm3610_vm0, %v3212_v43, %v6449_v45  ;;  %v3536_v45 = vrot.slane %v6532_v19, %v5567_v31 }
 0x292   :  { %v4690_v0 = vpop.eup %4689  ;;  %4709 = vpow2.f32 %v3829_v18  ;;  %v3828_v10 = vmul.f32 -1.442695, %v1980_v42  ;;  %v2491_v43 = vadd.f32 1.0, %v4688_v61 }
 0x293   :  { %v4692_v4 = vpop.eup %4691  ;;  %v2486_v56 = vadd.f32 1.0, %v4690_v0  ;;  %v3892_v33 = vmul.f32 -1.442695, %v2044_v21  ;;  %4711 = vrcp.f32 %v2553_v50  ;;  %v1722_v48 = vpop.xlane.xlu0 %1721  ;;  %v3541_v21 = vrot.slane %v6553_v39, %v5625_v36 }
 0x294   :  { %v4694_v60 = vpop.eup %4693  ;;  %v1725_v40 = vpop.xlane.xlu1 %1724  ;;  %4713 = vpow2.f32 %v3893_v12  ;;  %v1982_v51 = vadd.f32 %v5502_v53, %v1722_v48  ;;  %v3216_v44 = vrot.slane %v4692_v4, %v5583_v58  ;;  %v3220_v0 = vrot.slane %v6518_v20, %v5567_v31 }
 0x295   :  { %v4696_v59 = vpop.eup %4695  ;;  %v1983_v52 = vadd.f32 %v5502_v53, %v1725_v40  ;;  %v3532_v49 = vrot.slane %v4694_v60, %v5583_v58  ;;  %4715 = vrcp.f32 %v2486_v56 }
 0x296   :  { %v6612_v26 = vpop.eup %4697  ;;  %v2488_v46 = vadd.f32 1.0, %v4696_v59  ;;  %4717 = vpow2.f32 %v3892_v33  ;;  %v3830_v55 = vmul.f32 -1.442695, %v1982_v51  ;;  %v3221_v39 = vsel %vm2955_vm1, %v3220_v0, %v3216_v44 }
 0x297   :  { %v3831_v37 = vmul.f32 -1.442695, %v1983_v52  ;;  %v4700_v38 = vpop.eup %4699  ;;  %v3537_v34 = vsel %vm2955_vm1, %v3536_v45, %v3532_v49  ;;  %v1914_v8 = vpop.xlane.xlu0 %1913  ;;  %v3230_v52 = vrot.slane %v6536_v16, %v6775_v63  ;;  %vm3612_vm1 = vcmask 1043459  }
 0x298   :  { %4719 = vrcp.f32 %v2488_v46  ;;  %v1917_v25 = vpop.xlane.xlu1 %1916  ;;  %v4702_v9 = vpop.eup %4701  ;;  %v3225_v19 = vrot.slane %v4700_v38, %v5625_v36  ;;  %v3542_v4 = vsel %vm2962_vm2, %v3541_v21, %v3537_v34  ;;  %v2046_v60 = vadd.f32 %v5502_v53, %v1914_v8 }
 0x299   :  { %4721 = vpow2.f32 %v3828_v10  ;;  %v2047_v18 = vadd.f32 %v5502_v53, %v1917_v25  ;;  %v4704_v50 = vpop.eup %4703  ;;  %v2555_v33 = vadd.f32 1.0, %v4702_v9  ;;  %v3546_v36 = vrot.slane %v6542_v27, %v6775_v63 }
 0x29a   :  { %4723 = vpow2.f32 %v3831_v37  ;;  %v4706_v12 = vpop.eup %4705  ;;  %v2490_v23 = vadd.f32 1.0, %v4704_v50  ;;  %v3226_v31 = vsel %vm2962_vm2, %v3225_v19, %v3221_v39  ;;  %v3894_v59 = vmul.f32 -1.442695, %v2046_v60 }
 0x29b   :  { %4725 = vpow2.f32 %v3830_v55  ;;  %v4708_v42 = vpop.eup %4707  ;;  %v3895_v56 = vmul.f32 -1.442695, %v2047_v18  ;;  %v2554_v61 = vadd.f32 1.0, %v4706_v12  ;;  %v3547_v53 = vsel %vm2969_vm3, %v3546_v36, %v3542_v4 }
 0x29c   :  { %4727 = vrcp.f32 %v2552_v5  ;;  %v4710_v58 = vpop.eup %4709  ;;  %v3235_v20 = vrot.slane %v4708_v42, %v6778_v13  ;;  %v3551_v27 = vrot.slane %v6576_v41, %v6778_v13  ;;  %v3231_v37 = vsel %vm2969_vm3, %v3230_v52, %v3226_v31 }
 0x29d   :  { %4729 = vrcp.f32 %v2490_v23  ;;  %v6627_v40 = vpop.eup %4711  ;;  %v2493_v51 = vadd.f32 1.0, %v4710_v58  ;;  %v3240_v25 = vrot.slane %v6558_v29, %v6779_v24  ;;  %v3556_v13 = vrot.slane %v6563_v35, %v6779_v24 }
 0x29e   :  { %4731 = vpow2.f32 %v3895_v56  ;;  %v4714_v48 = vpop.eup %4713  ;;  %v3552_v5 = vsel %vm2976_vm4, %v3551_v27, %v3547_v53  ;;  %v3236_v55 = vsel %vm2976_vm4, %v3235_v20, %v3231_v37  ;;  %v3250_v35 = vrot.slane %v6578_v2, %v6783_v62 }
 0x29f   :  { %v4716_v10 = vpop.eup %4715  ;;  %4733 = vrcp.f32 %v2491_v43  ;;  %v3557_v44 = vsel %vm2983_vm5, %v3556_v13, %v3552_v5  ;;  %v3241_v34 = vsel %vm2983_vm5, %v3240_v25, %v3236_v55  ;;  %v2557_v19 = vadd.f32 1.0, %v4714_v48 }
 0x2a0   :  { %v4718_v49 = vpop.eup %4717  ;;  %4735 = vrcp.f32 %v2555_v33  ;;  %v3245_v63 = vrot.slane %v4716_v10, %v6784_v7  ;;  %v3561_v23 = vrot.slane %v6597_v32, %v6784_v7  ;;  %v3566_v4 = vrot.slane %v6584_v28, %v6783_v62 }
 0x2a1   :  { %v2556_v38 = vadd.f32 1.0, %v4718_v49  ;;  %4737 = vpow2.f32 %v3894_v59  ;;  %v3260_v7 = vrot.slane %v6612_v26, %v6787_v14  ;;  %v3576_v52 = vrot.slane %v6627_v40, %v6787_v14 }
 0x2a2   :  { %v4720_v46 = vpop.eup %4719  ;;  %4739 = vrcp.f32 %v2554_v61  ;;  %v3246_v21 = vsel %vm2990_vm6, %v3245_v63, %v3241_v34  ;;  %v3562_v43 = vsel %vm2990_vm6, %v3561_v23, %v3557_v44  ;;  %vm3614_vm2 = vcmask 1044484  }
 0x2a3   :  { %v4722_v45 = vpop.eup %4721  ;;  %4741 = vrcp.f32 %v2493_v51  ;;  %v3255_v29 = vrot.slane %v4720_v46, %v5804_v15  ;;  %v3251_v56 = vsel %vm2997_vm7, %v3250_v35, %v3246_v21  ;;  %v3567_v39 = vsel %vm2997_vm7, %v3566_v4, %v3562_v43 }
 0x2a4   :  { %v4724_v16 = vpop.eup %4723  ;;  %v2492_v41 = vadd.f32 1.0, %v4722_v45  ;;  %4743 = vrcp.f32 %v2556_v38  ;;  %vm3616_vm3 = vcmask 1045509   ;;  %vm3618_vm4 = vcmask 1046534  }
 0x2a5   :  { %v4726_v9 = vpop.eup %4725  ;;  %v2495_v18 = vadd.f32 1.0, %v4724_v16  ;;  %v3256_v33 = vsel %vm3004_vm8, %v3255_v29, %v3251_v56  ;;  %vm3620_vm5 = vcmask 1047559  }
 0x2a6   :  { %v4728_v50 = vpop.eup %4727  ;;  %4745 = vrcp.f32 %v2492_v41  ;;  %v2494_v8 = vadd.f32 1.0, %v4726_v9  ;;  %v3261_v20 = vsel %vm3011_vm9, %v3260_v7, %v3256_v33 }
 0x2a7   :  { %v4730_v12 = vpop.eup %4729  ;;  %4747 = vrcp.f32 %v2495_v18  ;;  %v3571_v32 = vrot.slane %v4728_v50, %v5804_v15 }
 0x2a8   :  { %v4732_v24 = vpop.eup %4731  ;;  %4749 = vrcp.f32 %v2494_v8  ;;  %v3265_v60 = vrot.slane %v4730_v12, %v5858_v17 }
 0x2a9   :  { %v2559_v42 = vadd.f32 1.0, %v4732_v24  ;;  %v4734_v0 = vpop.eup %4733  ;;  %4751 = vrcp.f32 %v2557_v19  ;;  %v3572_v59 = vsel %vm3004_vm8, %v3571_v32, %v3567_v39 }
 0x2aa   :  { %v4736_v58 = vpop.eup %4735  ;;  %v3266_v28 = vsel %vm3018_vm10, %v3265_v60, %v3261_v20  ;;  %v3270_v10 = vrot.slane %v4734_v0, %v6790_v11  ;;  %v3577_v45 = vsel %vm3011_vm9, %v3576_v52, %v3572_v59 }
 0x2ab   :  { %v4738_v2 = vpop.eup %4737  ;;  %4753 = vrcp.f32 %v2559_v42  ;;  %v3586_v55 = vrot.slane %v4736_v58, %v6790_v11 }
 0x2ac   :  { %v4740_v36 = vpop.eup %4739  ;;  %v2558_v48 = vadd.f32 1.0, %v4738_v2  ;;  %v3271_v27 = vsel %vm3025_vm11, %v3270_v10, %v3266_v28 }
 0x2ad   :  { %v4742_v31 = vpop.eup %4741  ;;  %v3581_v26 = vrot.slane %v4740_v36, %v5858_v17 }
 0x2ae   :  { %v4744_v62 = vpop.eup %4743  ;;  %4755 = vrcp.f32 %v2558_v48  ;;  %v3280_v49 = vrot.slane %v4742_v31, %v6793_v54 }
 0x2af   :  { %v3591_v17 = vrot.slane %v4744_v62, %v5902_v22  ;;  %v3582_v14 = vsel %vm3018_vm10, %v3581_v26, %v3577_v45 }
 0x2b0   :  { %v4746_v61 = vpop.eup %4745  ;;  %v3587_v13 = vsel %vm3025_vm11, %v3586_v55, %v3582_v14 }
 0x2b1   :  { %v4748_v15 = vpop.eup %4747  ;;  %v3275_v53 = vrot.slane %v4746_v61, %v5902_v22  ;;  %v3592_v22 = vsel %vm3032_vm12, %v3591_v17, %v3587_v13 }
 0x2b2   :  { %v4750_v51 = vpop.eup %4749  ;;  %v3290_v46 = vrot.slane %v4748_v15, %v6794_v1 }
 0x2b3   :  { %v3276_v37 = vsel %vm3032_vm12, %v3275_v53, %v3271_v27  ;;  %v3285_v38 = vrot.slane %v4750_v51, %v5970_v6  ;;  %v4752_v40 = vpop.eup %4751 }
 0x2b4   :  { %v3281_v5 = vsel %vm3039_vm13, %v3280_v49, %v3276_v37  ;;  %v3596_v50 = vrot.slane %v4752_v40, %v6793_v54 }
 0x2b5   :  { %v3286_v63 = vsel %vm3046_vm14, %v3285_v38, %v3281_v5  ;;  %v4754_v16 = vpop.eup %4753 }
 0x2b6   :  { %v3291_v25 = vsel %vm3053_vm15, %v3290_v46, %v3286_v63  ;;  %v3606_v11 = vrot.slane %v4754_v16, %v6794_v1 }
 0x2b7   :  { %v3613_v41 = vsel %vm3612_vm1, %v3291_v25, %v6608_v57  ;;  %v3597_v57 = vsel %vm3039_vm13, %v3596_v50, %v3592_v22 }
 0x2b8   :  { %v3615_v9 = vsel %vm3614_vm2, %v6314_v47, %v3613_v41  ;;  %v4756_v18 = vpop.eup %4755 }
 0x2b9   :  { %v3617_v44 = vsel %vm3616_vm3, %v6441_v3, %v3615_v9  ;;  %v3601_v34 = vrot.slane %v4756_v18, %v5970_v6 }
 0x2ba   :  { %v3619_v8 = vsel %vm3618_vm4, %v6601_v30, %v3617_v44 }
 0x2bb   :  { %v3602_v12 = vsel %vm3046_vm14, %v3601_v34, %v3597_v57 }
 0x2bc   :  { %v3607_v47 = vsel %vm3053_vm15, %v3606_v11, %v3602_v12 }
 0x2bd   :  { %v3621_v21 = vsel %vm3620_vm5, %v3607_v47, %v3619_v8 }
 0x2be   :  { %3623 = vst [vmem:[#allocation8] sm:$0xff] %v3621_v21 }
 0x2bf   :  { %4812 = shalt.err (!%p4809_p6)
}
 0x2c0   :  { %s4813_s21 = scalar_lea.hbm %s6713_s4, 128 }
 0x2c1   :  { %p4814_p7 = scmp.ne.s32.totalorder %s6713_s4, %s4813_s21  ;;  %p4817_p8 = scmp.lt.u32.totalorder %s4813_s21, %s6713_s4 }
 0x2c3   :  { %p4819_p9 = pnand %p4817_p8, %p4814_p7 }
 0x2c5   :  { %4822 = shalt.err (!%p4819_p9)
}
 0x2c6   :  { %3633 = dma.vmem_to_hbm [thread:$0]  %s3631_s17, 128, %s6713_s4, [#allocation5]  }
 0x2c7   :  { %4827 = dma.done.wait [#allocation5], 128  }
 0x2c8   :  { %4828 = vsyncadd [#allocation5], 4294967168 }
 0x2c9   :  { %3637 = vsyncpa [#allocation4], 1 }
 0x2ca   :  { %3638 = vsyncpa [#allocation7], 1 }
 0x2cb   :  { %3639 = vsyncpa [#allocation5], 1 }

</bundles_post_ra>
